<compile_context>
chip_gen: v5e
topology: v5e:2x2
jax: 0.10.0
libtpu: 0.0.40
codegen_flags: <defaults>
</compile_context>

<pallas_src>
import functools

import jax
import jax.numpy as jnp
from jax.experimental import pallas as pl
from jax.experimental.pallas import tpu as pltpu

CLAMP_EPS = 1e-4   # module-level `eps` in the PyTorch code (clamp lower bound)
BN_EPS = 1e-5      # nn.BatchNorm2d default eps
CP = 8             # 3-channel ends padded to a full sublane tile


def _round_up(x, m):
    return (x + m - 1) // m * m


def _enhance_kernel(x_ref, mask_ref, w_in_ref, b_in_ref, w_blk_ref, b_blk_ref,
                    gamma_ref, beta_ref, w_out_ref, b_out_ref,
                    out_ref, fea_ref, col_ref, *, blocks, inv_n, Wp, NO):
    """Whole forward pass over the flattened padded-grid layout."""

    def conv3x3(src_ref, w_flat_ref, b_ref):
        """3x3 'same' conv over the padded flat layout as ONE MXU matmul.

        src_ref    : (Cin, NF)  zero-padded, channels-first flat feature map
        w_flat_ref : (Cout, 9*Cin) tap-major / channel-minor flattened weights
        b_ref      : (Cout, 1)
        returns    : (Cout, NO) f32; position q is the conv result whose padded
                     -grid centre sits at flat index q + Wp + 1 (halo / tail
                     positions hold garbage and must be masked by callers).
        """
        cin = src_ref.shape[0]
        # im2col: stack the 9 shifted tap views into the column scratch.
        for dh in range(3):
            for dw in range(3):
                t = dh * 3 + dw
                off = dh * Wp + dw
                col_ref[t * cin:(t + 1) * cin, :] = src_ref[:, off:off + NO]
        return jnp.dot(w_flat_ref[...], col_ref[:9 * cin, :],
                       preferred_element_type=jnp.float32) + b_ref[...]

    mask = mask_ref[...]                                   # (1, NO) validity
    gamma = gamma_ref[...]                                 # (C, 1)
    beta = beta_ref[...]                                   # (C, 1)

    # Zero the feature scratch once; every later interior write is masked, so
    # halo rows/columns (and the tail pad) stay exactly zero for all blocks.
    fea_ref[...] = jnp.zeros(fea_ref.shape, fea_ref.dtype)

    # ---------------- in_conv: Conv(3->C) + ReLU ----------------
    fea0 = jnp.maximum(conv3x3(x_ref, w_in_ref, b_in_ref), 0.0)
    fea_ref[:, Wp + 1:Wp + 1 + NO] = fea0 * mask

    # ------- residual blocks (shared Conv+BN weights), in-place state --------
    # Unrolled: `blocks` is small & static.  For large `blocks`, switch to
    # lax.fori_loop — all loop state already lives in fea_ref (no carry).
    for _ in range(blocks):
        y = conv3x3(fea_ref, w_blk_ref, b_blk_ref)         # (C, NO)
        ym = y * mask
        s1 = jnp.sum(ym, axis=1, keepdims=True)            # (C, 1) sum
        s2 = jnp.sum(ym * y, axis=1, keepdims=True)        # (C, 1) sum of sq
        mean = s1 * inv_n
        var = s2 * inv_n - mean * mean                     # biased batch stats
        yn = (y - mean) * jax.lax.rsqrt(var + BN_EPS) * gamma + beta
        fea_ref[:, Wp + 1:Wp + 1 + NO] = (
            fea_ref[:, Wp + 1:Wp + 1 + NO] + jnp.maximum(yn, 0.0) * mask)

    # ---------------- out_conv: Conv(C->3) + Sigmoid; t = clamp(x + o) -------
    o = jax.nn.sigmoid(conv3x3(fea_ref, w_out_ref, b_out_ref))
    x_valid = x_ref[:, Wp + 1:Wp + 1 + NO]                 # (CP, NO)
    out_ref[...] = jnp.clip(x_valid + o, CLAMP_EPS, 1.0)


def enhancement_forward(x_nchw, params, blocks):
    """NCHW in / NCHW out; the whole forward pass is one Pallas kernel."""
    x = x_nchw.astype(jnp.float32)
    B, _, H, W = x.shape
    C = params["w_blk"].shape[-1]
    CC = max(CP, _round_up(C, 8))    # hidden channels padded to sublane tile

    Wp = W + 2                       # padded row width (1 halo column per side)
    L_img = (H + 2) * Wp             # flat length of one padded image
    n_out = B * L_img                # real output-slab length
    NO = _round_up(n_out, 128)       # lane-aligned output-slab length
    NF = NO + 2 * Wp + 2             # flat padded feature length (tap slack)

    # Padded, channels-first, flattened input slab (CP, NF); extra channel rows
    # and tail lanes are zero.
    xp = jnp.pad(x, ((0, 0), (0, 0), (1, 1), (1, 1)))            # (B,3,H+2,Wp)
    xp = jnp.transpose(xp, (1, 0, 2, 3)).reshape(3, n_out)
    x_flat = jnp.pad(xp, ((0, CP - 3), (0, NF - n_out)))

    # Validity mask over the output slab (1 at real pixels, 0 at halo/tail).
    mask = jnp.zeros((B, H + 2, Wp), jnp.float32).at[:, :H, :W].set(1.0)
    mask = jnp.pad(mask.reshape(1, n_out), ((0, 0), (0, NO - n_out)))

    # Conv weights HWIO -> flattened (Cout_pad, 9*Cin_pad), tap-major order
    # matching the kernel's im2col stacking; padded channels are zero.
    def flat_w(w, cout_pad, cin_pad):
        cin, cout = w.shape[2], w.shape[3]
        w = jnp.transpose(w, (3, 0, 1, 2))                       # (Cout,3,3,Cin)
        w = jnp.pad(w, ((0, cout_pad - cout), (0, 0), (0, 0),
                        (0, cin_pad - cin)))
        return w.reshape(cout_pad, 9 * cin_pad)

    w_in = flat_w(params["w_in"], CC, CP)                        # (CC, 9*CP)
    w_blk = flat_w(params["w_blk"], CC, CC)                      # (CC, 9*CC)
    w_out = flat_w(params["w_out"], CP, CC)                      # (CP, 9*CC)

    def col(v, n):                                               # -> (n, 1)
        v = v.reshape(-1, 1)
        return jnp.pad(v, ((0, n - v.shape[0]), (0, 0)))

    b_in, b_blk = col(params["b_in"], CC), col(params["b_blk"], CC)
    gamma, beta = col(params["gamma"], CC), col(params["beta"], CC)
    b_out = col(params["b_out"], CP)

    kernel = functools.partial(_enhance_kernel, blocks=blocks,
                               inv_n=1.0 / float(B * H * W), Wp=Wp, NO=NO)

    n_mac = 3 * C + blocks * C * C + C * 3                       # per pixel/tap
    cost = pl.CostEstimate(
        flops=2 * 9 * B * H * W * n_mac,
        transcendentals=B * H * W * 3 + blocks * C,
        bytes_accessed=4 * (CP * NF + NO + CP * NO + CC * NF + 9 * CC * NO))

    out_slab = pl.pallas_call(
        kernel,
        out_shape=jax.ShapeDtypeStruct((CP, NO), jnp.float32),
        in_specs=[pl.BlockSpec(memory_space=pltpu.MemorySpace.VMEM)] * 10,
        out_specs=pl.BlockSpec(memory_space=pltpu.MemorySpace.VMEM),
        scratch_shapes=[pltpu.VMEM((CC, NF), jnp.float32),       # padded feats
                        pltpu.VMEM((9 * CC, NO), jnp.float32)],  # im2col stack
        compiler_params=pltpu.CompilerParams(vmem_limit_bytes=32 * 1024 * 1024),
        cost_estimate=cost,
    )(x_flat, mask, w_in, b_in, w_blk, b_blk, gamma, beta, w_out, b_out)

    # Layout plumbing back to NCHW (tiny, 3-channel tensors only).
    out = out_slab[:3, :n_out].reshape(3, B, H + 2, Wp)[:, :, :H, :W]
    return jnp.transpose(out, (1, 0, 2, 3))


def _reference_forward(x_nchw, params, blocks):
    """Pure-JAX reference (same math) for a correctness check."""
    x = jnp.transpose(x_nchw, (0, 2, 3, 1)).astype(jnp.float32)

    def conv(inp, w, b):
        return jax.lax.conv_general_dilated(
            inp, w, window_strides=(1, 1), padding="SAME",
            dimension_numbers=("NHWC", "HWIO", "NHWC")) + b

    fea = jax.nn.relu(conv(x, params["w_in"], params["b_in"]))
    for _ in range(blocks):
        y = conv(fea, params["w_blk"], params["b_blk"])
        mean = jnp.mean(y, axis=(0, 1, 2), keepdims=True)
        var = jnp.mean((y - mean) ** 2, axis=(0, 1, 2), keepdims=True)
        y = (y - mean) * jax.lax.rsqrt(var + BN_EPS) * params["gamma"] + params["beta"]
        fea = fea + jax.nn.relu(y)
    o = jax.nn.sigmoid(conv(fea, params["w_out"], params["b_out"]))
    t = jnp.clip(x + o, CLAMP_EPS, 1.0)
    return jnp.transpose(t, (0, 3, 1, 2))


def init_params(key, channels):
    """Deterministic synthetic parameters (HWIO conv weights, (1,C) vectors)."""
    ks = jax.random.split(key, 8)
    n = lambda k, shape, s: s * jax.random.normal(k, shape, jnp.float32)
    return {
        "w_in":  n(ks[0], (3, 3, 3, channels), 0.2),
        "b_in":  n(ks[1], (1, channels), 0.05),
        "w_blk": n(ks[2], (3, 3, channels, channels), 0.1),
        "b_blk": n(ks[3], (1, channels), 0.05),
        "gamma": 1.0 + n(ks[4], (1, channels), 0.1),
        "beta":  n(ks[5], (1, channels), 0.05),
        "w_out": n(ks[6], (3, 3, channels, 3), 0.1),
        "b_out": n(ks[7], (1, 3), 0.05),
    }


if __name__ == "__main__":
    key = jax.random.PRNGKey(0)
    k_x, k_p = jax.random.split(key)

    B, C, H, W = 2, 8, 16, 16
    blocks = 3

    x = jax.random.uniform(k_x, (B, 3, H, W), jnp.float32)   # NCHW, like PyTorch
    params = init_params(k_p, C)

    out = enhancement_forward(x, params, blocks)
    out = jax.block_until_ready(out)

    ref = _reference_forward(x, params, blocks)
    assert out.shape == (B, 3, H, W), out.shape
    assert bool(jnp.all(jnp.isfinite(out)))
    max_err = float(jnp.max(jnp.abs(out - ref)))
    assert max_err < 2e-3, f"mismatch vs reference: {max_err}"

    print("KERNEL_OK")
</pallas_src>

<mosaic_0001>
module attributes {stable_mosaic.version = 11 : i64} {
  func.func @_enhance_kernel(%arg0: memref<8x806xf32, #tpu.memory_space<vmem>>, %arg1: memref<1x768xf32, #tpu.memory_space<vmem>>, %arg2: memref<8x72xf32, #tpu.memory_space<vmem>>, %arg3: memref<8x1xf32, #tpu.memory_space<vmem>>, %arg4: memref<8x72xf32, #tpu.memory_space<vmem>>, %arg5: memref<8x1xf32, #tpu.memory_space<vmem>>, %arg6: memref<8x1xf32, #tpu.memory_space<vmem>>, %arg7: memref<8x1xf32, #tpu.memory_space<vmem>>, %arg8: memref<8x72xf32, #tpu.memory_space<vmem>>, %arg9: memref<8x1xf32, #tpu.memory_space<vmem>>, %arg10: memref<8x768xf32, #tpu.memory_space<vmem>>, %arg11: memref<8x806xf32, #tpu.memory_space<vmem>>, %arg12: memref<72x768xf32, #tpu.memory_space<vmem>>) attributes {dimension_semantics = [], scalar_prefetch = 0 : i64, scratch_operands = 2 : i64, tpu.core_type = #tpu.core_type<tc>} {
    %c0 = arith.constant 0 : index
    %c0_0 = arith.constant 0 : index
    %0 = vector.load %arg1[%c0, %c0_0] : memref<1x768xf32, #tpu.memory_space<vmem>>, vector<1x768xf32>
    %c0_1 = arith.constant 0 : index
    %c0_2 = arith.constant 0 : index
    %1 = vector.load %arg6[%c0_1, %c0_2] : memref<8x1xf32, #tpu.memory_space<vmem>>, vector<8x1xf32>
    %c0_3 = arith.constant 0 : index
    %c0_4 = arith.constant 0 : index
    %2 = vector.load %arg7[%c0_3, %c0_4] : memref<8x1xf32, #tpu.memory_space<vmem>>, vector<8x1xf32>
    %cst = arith.constant 0.000000e+00 : f32
    %3 = vector.broadcast %cst : f32 to vector<8x806xf32>
    %c0_5 = arith.constant 0 : index
    %c0_6 = arith.constant 0 : index
    %4 = vector.load %arg11[%c0_5, %c0_6] : memref<8x806xf32, #tpu.memory_space<vmem>>, vector<8x806xf32>
    tpu.vector_store %arg11[%c0_5, %c0_6], %3 {strides = array<i32>} : memref<8x806xf32, #tpu.memory_space<vmem>>, vector<8x806xf32>,
    %c0_7 = arith.constant 0 : index
    %c0_8 = arith.constant 0 : index
    %5 = vector.load %arg0[%c0_7, %c0_8] : memref<8x806xf32, #tpu.memory_space<vmem>>, vector<8x768xf32>
    %c0_9 = arith.constant 0 : index
    %c0_10 = arith.constant 0 : index
    %6 = vector.load %arg12[%c0_9, %c0_10] : memref<72x768xf32, #tpu.memory_space<vmem>>, vector<8x768xf32>
    tpu.vector_store %arg12[%c0_9, %c0_10], %5 {strides = array<i32>} : memref<72x768xf32, #tpu.memory_space<vmem>>, vector<8x768xf32>,
    %c0_11 = arith.constant 0 : index
    %c1 = arith.constant 1 : index
    %7 = vector.load %arg0[%c0_11, %c1] : memref<8x806xf32, #tpu.memory_space<vmem>>, vector<8x768xf32>
    %c8 = arith.constant 8 : index
    %c0_12 = arith.constant 0 : index
    %8 = vector.load %arg12[%c8, %c0_12] : memref<72x768xf32, #tpu.memory_space<vmem>>, vector<8x768xf32>
    tpu.vector_store %arg12[%c8, %c0_12], %7 {strides = array<i32>} : memref<72x768xf32, #tpu.memory_space<vmem>>, vector<8x768xf32>,
    %c0_13 = arith.constant 0 : index
    %c2 = arith.constant 2 : index
    %9 = vector.load %arg0[%c0_13, %c2] : memref<8x806xf32, #tpu.memory_space<vmem>>, vector<8x768xf32>
    %c16 = arith.constant 16 : index
    %c0_14 = arith.constant 0 : index
    %10 = vector.load %arg12[%c16, %c0_14] : memref<72x768xf32, #tpu.memory_space<vmem>>, vector<8x768xf32>
    tpu.vector_store %arg12[%c16, %c0_14], %9 {strides = array<i32>} : memref<72x768xf32, #tpu.memory_space<vmem>>, vector<8x768xf32>,
    %c0_15 = arith.constant 0 : index
    %c18 = arith.constant 18 : index
    %11 = vector.load %arg0[%c0_15, %c18] : memref<8x806xf32, #tpu.memory_space<vmem>>, vector<8x768xf32>
    %c24 = arith.constant 24 : index
    %c0_16 = arith.constant 0 : index
    %12 = vector.load %arg12[%c24, %c0_16] : memref<72x768xf32, #tpu.memory_space<vmem>>, vector<8x768xf32>
    tpu.vector_store %arg12[%c24, %c0_16], %11 {strides = array<i32>} : memref<72x768xf32, #tpu.memory_space<vmem>>, vector<8x768xf32>,
    %c0_17 = arith.constant 0 : index
    %c19 = arith.constant 19 : index
    %13 = vector.load %arg0[%c0_17, %c19] : memref<8x806xf32, #tpu.memory_space<vmem>>, vector<8x768xf32>
    %c32 = arith.constant 32 : index
    %c0_18 = arith.constant 0 : index
    %14 = vector.load %arg12[%c32, %c0_18] : memref<72x768xf32, #tpu.memory_space<vmem>>, vector<8x768xf32>
    tpu.vector_store %arg12[%c32, %c0_18], %13 {strides = array<i32>} : memref<72x768xf32, #tpu.memory_space<vmem>>, vector<8x768xf32>,
    %c0_19 = arith.constant 0 : index
    %c20 = arith.constant 20 : index
    %15 = vector.load %arg0[%c0_19, %c20] : memref<8x806xf32, #tpu.memory_space<vmem>>, vector<8x768xf32>
    %c40 = arith.constant 40 : index
    %c0_20 = arith.constant 0 : index
    %16 = vector.load %arg12[%c40, %c0_20] : memref<72x768xf32, #tpu.memory_space<vmem>>, vector<8x768xf32>
    tpu.vector_store %arg12[%c40, %c0_20], %15 {strides = array<i32>} : memref<72x768xf32, #tpu.memory_space<vmem>>, vector<8x768xf32>,
    %c0_21 = arith.constant 0 : index
    %c36 = arith.constant 36 : index
    %17 = vector.load %arg0[%c0_21, %c36] : memref<8x806xf32, #tpu.memory_space<vmem>>, vector<8x768xf32>
    %c48 = arith.constant 48 : index
    %c0_22 = arith.constant 0 : index
    %18 = vector.load %arg12[%c48, %c0_22] : memref<72x768xf32, #tpu.memory_space<vmem>>, vector<8x768xf32>
    tpu.vector_store %arg12[%c48, %c0_22], %17 {strides = array<i32>} : memref<72x768xf32, #tpu.memory_space<vmem>>, vector<8x768xf32>,
    %c0_23 = arith.constant 0 : index
    %c37 = arith.constant 37 : index
    %19 = vector.load %arg0[%c0_23, %c37] : memref<8x806xf32, #tpu.memory_space<vmem>>, vector<8x768xf32>
    %c56 = arith.constant 56 : index
    %c0_24 = arith.constant 0 : index
    %20 = vector.load %arg12[%c56, %c0_24] : memref<72x768xf32, #tpu.memory_space<vmem>>, vector<8x768xf32>
    tpu.vector_store %arg12[%c56, %c0_24], %19 {strides = array<i32>} : memref<72x768xf32, #tpu.memory_space<vmem>>, vector<8x768xf32>,
    %c0_25 = arith.constant 0 : index
    %c38 = arith.constant 38 : index
    %21 = vector.load %arg0[%c0_25, %c38] : memref<8x806xf32, #tpu.memory_space<vmem>>, vector<8x768xf32>
    %c64 = arith.constant 64 : index
    %c0_26 = arith.constant 0 : index
    %22 = vector.load %arg12[%c64, %c0_26] : memref<72x768xf32, #tpu.memory_space<vmem>>, vector<8x768xf32>
    tpu.vector_store %arg12[%c64, %c0_26], %21 {strides = array<i32>} : memref<72x768xf32, #tpu.memory_space<vmem>>, vector<8x768xf32>,
    %c0_27 = arith.constant 0 : index
    %c0_28 = arith.constant 0 : index
    %23 = vector.load %arg2[%c0_27, %c0_28] : memref<8x72xf32, #tpu.memory_space<vmem>>, vector<8x72xf32>
    %c0_29 = arith.constant 0 : index
    %c0_30 = arith.constant 0 : index
    %24 = vector.load %arg12[%c0_29, %c0_30] : memref<72x768xf32, #tpu.memory_space<vmem>>, vector<72x768xf32>
    %cst_31 = arith.constant dense<0.000000e+00> : vector<8x768xf32>
    %25 = tpu.matmul %23, %24, %cst_31 {dimension_numbers = #tpu.dot_dimension_numbers<[1], [0], [0], [1], [0, 0, 1, 1], [], []>} : vector<8x72xf32>, vector<72x768xf32>, vector<8x768xf32> -> vector<8x768xf32>
    %c0_32 = arith.constant 0 : index
    %c0_33 = arith.constant 0 : index
    %26 = vector.load %arg3[%c0_32, %c0_33] : memref<8x1xf32, #tpu.memory_space<vmem>>, vector<8x1xf32>
    %27 = vector.broadcast %26 : vector<8x1xf32> to vector<8x768xf32>
    %28 = arith.addf %25, %27 : vector<8x768xf32>
    %cst_34 = arith.constant 0.000000e+00 : f32
    %29 = vector.broadcast %cst_34 : f32 to vector<8x768xf32>
    %30 = arith.maximumf %28, %29 : vector<8x768xf32>
    %31 = vector.broadcast %0 : vector<1x768xf32> to vector<8x768xf32>
    %32 = arith.mulf %30, %31 : vector<8x768xf32>
    %c0_35 = arith.constant 0 : index
    %c19_36 = arith.constant 19 : index
    %33 = vector.load %arg11[%c0_35, %c19_36] : memref<8x806xf32, #tpu.memory_space<vmem>>, vector<8x768xf32>
    tpu.vector_store %arg11[%c0_35, %c19_36], %32 {strides = array<i32>} : memref<8x806xf32, #tpu.memory_space<vmem>>, vector<8x768xf32>,
    %c0_37 = arith.constant 0 : index
    %c0_38 = arith.constant 0 : index
    %34 = vector.load %arg11[%c0_37, %c0_38] : memref<8x806xf32, #tpu.memory_space<vmem>>, vector<8x768xf32>
    %c0_39 = arith.constant 0 : index
    %c0_40 = arith.constant 0 : index
    %35 = vector.load %arg12[%c0_39, %c0_40] : memref<72x768xf32, #tpu.memory_space<vmem>>, vector<8x768xf32>
    tpu.vector_store %arg12[%c0_39, %c0_40], %34 {strides = array<i32>} : memref<72x768xf32, #tpu.memory_space<vmem>>, vector<8x768xf32>,
    %c0_41 = arith.constant 0 : index
    %c1_42 = arith.constant 1 : index
    %36 = vector.load %arg11[%c0_41, %c1_42] : memref<8x806xf32, #tpu.memory_space<vmem>>, vector<8x768xf32>
    %c8_43 = arith.constant 8 : index
    %c0_44 = arith.constant 0 : index
    %37 = vector.load %arg12[%c8_43, %c0_44] : memref<72x768xf32, #tpu.memory_space<vmem>>, vector<8x768xf32>
    tpu.vector_store %arg12[%c8_43, %c0_44], %36 {strides = array<i32>} : memref<72x768xf32, #tpu.memory_space<vmem>>, vector<8x768xf32>,
    %c0_45 = arith.constant 0 : index
    %c2_46 = arith.constant 2 : index
    %38 = vector.load %arg11[%c0_45, %c2_46] : memref<8x806xf32, #tpu.memory_space<vmem>>, vector<8x768xf32>
    %c16_47 = arith.constant 16 : index
    %c0_48 = arith.constant 0 : index
    %39 = vector.load %arg12[%c16_47, %c0_48] : memref<72x768xf32, #tpu.memory_space<vmem>>, vector<8x768xf32>
    tpu.vector_store %arg12[%c16_47, %c0_48], %38 {strides = array<i32>} : memref<72x768xf32, #tpu.memory_space<vmem>>, vector<8x768xf32>,
    %c0_49 = arith.constant 0 : index
    %c18_50 = arith.constant 18 : index
    %40 = vector.load %arg11[%c0_49, %c18_50] : memref<8x806xf32, #tpu.memory_space<vmem>>, vector<8x768xf32>
    %c24_51 = arith.constant 24 : index
    %c0_52 = arith.constant 0 : index
    %41 = vector.load %arg12[%c24_51, %c0_52] : memref<72x768xf32, #tpu.memory_space<vmem>>, vector<8x768xf32>
    tpu.vector_store %arg12[%c24_51, %c0_52], %40 {strides = array<i32>} : memref<72x768xf32, #tpu.memory_space<vmem>>, vector<8x768xf32>,
    %c0_53 = arith.constant 0 : index
    %c19_54 = arith.constant 19 : index
    %42 = vector.load %arg11[%c0_53, %c19_54] : memref<8x806xf32, #tpu.memory_space<vmem>>, vector<8x768xf32>
    %c32_55 = arith.constant 32 : index
    %c0_56 = arith.constant 0 : index
    %43 = vector.load %arg12[%c32_55, %c0_56] : memref<72x768xf32, #tpu.memory_space<vmem>>, vector<8x768xf32>
    tpu.vector_store %arg12[%c32_55, %c0_56], %42 {strides = array<i32>} : memref<72x768xf32, #tpu.memory_space<vmem>>, vector<8x768xf32>,
    %c0_57 = arith.constant 0 : index
    %c20_58 = arith.constant 20 : index
    %44 = vector.load %arg11[%c0_57, %c20_58] : memref<8x806xf32, #tpu.memory_space<vmem>>, vector<8x768xf32>
    %c40_59 = arith.constant 40 : index
    %c0_60 = arith.constant 0 : index
    %45 = vector.load %arg12[%c40_59, %c0_60] : memref<72x768xf32, #tpu.memory_space<vmem>>, vector<8x768xf32>
    tpu.vector_store %arg12[%c40_59, %c0_60], %44 {strides = array<i32>} : memref<72x768xf32, #tpu.memory_space<vmem>>, vector<8x768xf32>,
    %c0_61 = arith.constant 0 : index
    %c36_62 = arith.constant 36 : index
    %46 = vector.load %arg11[%c0_61, %c36_62] : memref<8x806xf32, #tpu.memory_space<vmem>>, vector<8x768xf32>
    %c48_63 = arith.constant 48 : index
    %c0_64 = arith.constant 0 : index
    %47 = vector.load %arg12[%c48_63, %c0_64] : memref<72x768xf32, #tpu.memory_space<vmem>>, vector<8x768xf32>
    tpu.vector_store %arg12[%c48_63, %c0_64], %46 {strides = array<i32>} : memref<72x768xf32, #tpu.memory_space<vmem>>, vector<8x768xf32>,
    %c0_65 = arith.constant 0 : index
    %c37_66 = arith.constant 37 : index
    %48 = vector.load %arg11[%c0_65, %c37_66] : memref<8x806xf32, #tpu.memory_space<vmem>>, vector<8x768xf32>
    %c56_67 = arith.constant 56 : index
    %c0_68 = arith.constant 0 : index
    %49 = vector.load %arg12[%c56_67, %c0_68] : memref<72x768xf32, #tpu.memory_space<vmem>>, vector<8x768xf32>
    tpu.vector_store %arg12[%c56_67, %c0_68], %48 {strides = array<i32>} : memref<72x768xf32, #tpu.memory_space<vmem>>, vector<8x768xf32>,
    %c0_69 = arith.constant 0 : index
    %c38_70 = arith.constant 38 : index
    %50 = vector.load %arg11[%c0_69, %c38_70] : memref<8x806xf32, #tpu.memory_space<vmem>>, vector<8x768xf32>
    %c64_71 = arith.constant 64 : index
    %c0_72 = arith.constant 0 : index
    %51 = vector.load %arg12[%c64_71, %c0_72] : memref<72x768xf32, #tpu.memory_space<vmem>>, vector<8x768xf32>
    tpu.vector_store %arg12[%c64_71, %c0_72], %50 {strides = array<i32>} : memref<72x768xf32, #tpu.memory_space<vmem>>, vector<8x768xf32>,
    %c0_73 = arith.constant 0 : index
    %c0_74 = arith.constant 0 : index
    %52 = vector.load %arg4[%c0_73, %c0_74] : memref<8x72xf32, #tpu.memory_space<vmem>>, vector<8x72xf32>
    %c0_75 = arith.constant 0 : index
    %c0_76 = arith.constant 0 : index
    %53 = vector.load %arg12[%c0_75, %c0_76] : memref<72x768xf32, #tpu.memory_space<vmem>>, vector<72x768xf32>
    %cst_77 = arith.constant dense<0.000000e+00> : vector<8x768xf32>
    %54 = tpu.matmul %52, %53, %cst_77 {dimension_numbers = #tpu.dot_dimension_numbers<[1], [0], [0], [1], [0, 0, 1, 1], [], []>} : vector<8x72xf32>, vector<72x768xf32>, vector<8x768xf32> -> vector<8x768xf32>
    %c0_78 = arith.constant 0 : index
    %c0_79 = arith.constant 0 : index
    %55 = vector.load %arg5[%c0_78, %c0_79] : memref<8x1xf32, #tpu.memory_space<vmem>>, vector<8x1xf32>
    %56 = vector.broadcast %55 : vector<8x1xf32> to vector<8x768xf32>
    %57 = arith.addf %54, %56 : vector<8x768xf32>
    %58 = vector.broadcast %0 : vector<1x768xf32> to vector<8x768xf32>
    %59 = arith.mulf %57, %58 : vector<8x768xf32>
    %cst_80 = arith.constant dense<0.000000e+00> : vector<8xf32>
    %60 = vector.multi_reduction <add>, %59, %cst_80 [1] : vector<8x768xf32> to vector<8xf32>
    %61 = vector.shape_cast %60 : vector<8xf32> to vector<8x1xf32>
    %62 = arith.mulf %59, %57 : vector<8x768xf32>
    %cst_81 = arith.constant dense<0.000000e+00> : vector<8xf32>
    %63 = vector.multi_reduction <add>, %62, %cst_81 [1] : vector<8x768xf32> to vector<8xf32>
    %64 = vector.shape_cast %63 : vector<8xf32> to vector<8x1xf32>
    %cst_82 = arith.constant 0.001953125 : f32
    %65 = vector.broadcast %cst_82 : f32 to vector<8x1xf32>
    %66 = arith.mulf %61, %65 : vector<8x1xf32>
    %cst_83 = arith.constant 0.001953125 : f32
    %67 = vector.broadcast %cst_83 : f32 to vector<8x1xf32>
    %68 = arith.mulf %64, %67 : vector<8x1xf32>
    %69 = arith.mulf %66, %66 : vector<8x1xf32>
    %70 = arith.subf %68, %69 : vector<8x1xf32>
    %71 = vector.broadcast %66 : vector<8x1xf32> to vector<8x768xf32>
    %72 = arith.subf %57, %71 : vector<8x768xf32>
    %cst_84 = arith.constant 9.99999974E-6 : f32
    %73 = vector.broadcast %cst_84 : f32 to vector<8x1xf32>
    %74 = arith.addf %70, %73 : vector<8x1xf32>
    %75 = math.rsqrt %74 : vector<8x1xf32>
    %76 = vector.broadcast %75 : vector<8x1xf32> to vector<8x768xf32>
    %77 = arith.mulf %72, %76 : vector<8x768xf32>
    %78 = vector.broadcast %1 : vector<8x1xf32> to vector<8x768xf32>
    %79 = arith.mulf %77, %78 : vector<8x768xf32>
    %80 = vector.broadcast %2 : vector<8x1xf32> to vector<8x768xf32>
    %81 = arith.addf %79, %80 : vector<8x768xf32>
    %c0_85 = arith.constant 0 : index
    %c19_86 = arith.constant 19 : index
    %82 = vector.load %arg11[%c0_85, %c19_86] : memref<8x806xf32, #tpu.memory_space<vmem>>, vector<8x768xf32>
    %cst_87 = arith.constant 0.000000e+00 : f32
    %83 = vector.broadcast %cst_87 : f32 to vector<8x768xf32>
    %84 = arith.maximumf %81, %83 : vector<8x768xf32>
    %85 = vector.broadcast %0 : vector<1x768xf32> to vector<8x768xf32>
    %86 = arith.mulf %84, %85 : vector<8x768xf32>
    %87 = arith.addf %82, %86 : vector<8x768xf32>
    %c0_88 = arith.constant 0 : index
    %c19_89 = arith.constant 19 : index
    %88 = vector.load %arg11[%c0_88, %c19_89] : memref<8x806xf32, #tpu.memory_space<vmem>>, vector<8x768xf32>
    tpu.vector_store %arg11[%c0_88, %c19_89], %87 {strides = array<i32>} : memref<8x806xf32, #tpu.memory_space<vmem>>, vector<8x768xf32>,
    %c0_90 = arith.constant 0 : index
    %c0_91 = arith.constant 0 : index
    %89 = vector.load %arg11[%c0_90, %c0_91] : memref<8x806xf32, #tpu.memory_space<vmem>>, vector<8x768xf32>
    %c0_92 = arith.constant 0 : index
    %c0_93 = arith.constant 0 : index
    %90 = vector.load %arg12[%c0_92, %c0_93] : memref<72x768xf32, #tpu.memory_space<vmem>>, vector<8x768xf32>
    tpu.vector_store %arg12[%c0_92, %c0_93], %89 {strides = array<i32>} : memref<72x768xf32, #tpu.memory_space<vmem>>, vector<8x768xf32>,
    %c0_94 = arith.constant 0 : index
    %c1_95 = arith.constant 1 : index
    %91 = vector.load %arg11[%c0_94, %c1_95] : memref<8x806xf32, #tpu.memory_space<vmem>>, vector<8x768xf32>
    %c8_96 = arith.constant 8 : index
    %c0_97 = arith.constant 0 : index
    %92 = vector.load %arg12[%c8_96, %c0_97] : memref<72x768xf32, #tpu.memory_space<vmem>>, vector<8x768xf32>
    tpu.vector_store %arg12[%c8_96, %c0_97], %91 {strides = array<i32>} : memref<72x768xf32, #tpu.memory_space<vmem>>, vector<8x768xf32>,
    %c0_98 = arith.constant 0 : index
    %c2_99 = arith.constant 2 : index
    %93 = vector.load %arg11[%c0_98, %c2_99] : memref<8x806xf32, #tpu.memory_space<vmem>>, vector<8x768xf32>
    %c16_100 = arith.constant 16 : index
    %c0_101 = arith.constant 0 : index
    %94 = vector.load %arg12[%c16_100, %c0_101] : memref<72x768xf32, #tpu.memory_space<vmem>>, vector<8x768xf32>
    tpu.vector_store %arg12[%c16_100, %c0_101], %93 {strides = array<i32>} : memref<72x768xf32, #tpu.memory_space<vmem>>, vector<8x768xf32>,
    %c0_102 = arith.constant 0 : index
    %c18_103 = arith.constant 18 : index
    %95 = vector.load %arg11[%c0_102, %c18_103] : memref<8x806xf32, #tpu.memory_space<vmem>>, vector<8x768xf32>
    %c24_104 = arith.constant 24 : index
    %c0_105 = arith.constant 0 : index
    %96 = vector.load %arg12[%c24_104, %c0_105] : memref<72x768xf32, #tpu.memory_space<vmem>>, vector<8x768xf32>
    tpu.vector_store %arg12[%c24_104, %c0_105], %95 {strides = array<i32>} : memref<72x768xf32, #tpu.memory_space<vmem>>, vector<8x768xf32>,
    %c0_106 = arith.constant 0 : index
    %c19_107 = arith.constant 19 : index
    %97 = vector.load %arg11[%c0_106, %c19_107] : memref<8x806xf32, #tpu.memory_space<vmem>>, vector<8x768xf32>
    %c32_108 = arith.constant 32 : index
    %c0_109 = arith.constant 0 : index
    %98 = vector.load %arg12[%c32_108, %c0_109] : memref<72x768xf32, #tpu.memory_space<vmem>>, vector<8x768xf32>
    tpu.vector_store %arg12[%c32_108, %c0_109], %97 {strides = array<i32>} : memref<72x768xf32, #tpu.memory_space<vmem>>, vector<8x768xf32>,
    %c0_110 = arith.constant 0 : index
    %c20_111 = arith.constant 20 : index
    %99 = vector.load %arg11[%c0_110, %c20_111] : memref<8x806xf32, #tpu.memory_space<vmem>>, vector<8x768xf32>
    %c40_112 = arith.constant 40 : index
    %c0_113 = arith.constant 0 : index
    %100 = vector.load %arg12[%c40_112, %c0_113] : memref<72x768xf32, #tpu.memory_space<vmem>>, vector<8x768xf32>
    tpu.vector_store %arg12[%c40_112, %c0_113], %99 {strides = array<i32>} : memref<72x768xf32, #tpu.memory_space<vmem>>, vector<8x768xf32>,
    %c0_114 = arith.constant 0 : index
    %c36_115 = arith.constant 36 : index
    %101 = vector.load %arg11[%c0_114, %c36_115] : memref<8x806xf32, #tpu.memory_space<vmem>>, vector<8x768xf32>
    %c48_116 = arith.constant 48 : index
    %c0_117 = arith.constant 0 : index
    %102 = vector.load %arg12[%c48_116, %c0_117] : memref<72x768xf32, #tpu.memory_space<vmem>>, vector<8x768xf32>
    tpu.vector_store %arg12[%c48_116, %c0_117], %101 {strides = array<i32>} : memref<72x768xf32, #tpu.memory_space<vmem>>, vector<8x768xf32>,
    %c0_118 = arith.constant 0 : index
    %c37_119 = arith.constant 37 : index
    %103 = vector.load %arg11[%c0_118, %c37_119] : memref<8x806xf32, #tpu.memory_space<vmem>>, vector<8x768xf32>
    %c56_120 = arith.constant 56 : index
    %c0_121 = arith.constant 0 : index
    %104 = vector.load %arg12[%c56_120, %c0_121] : memref<72x768xf32, #tpu.memory_space<vmem>>, vector<8x768xf32>
    tpu.vector_store %arg12[%c56_120, %c0_121], %103 {strides = array<i32>} : memref<72x768xf32, #tpu.memory_space<vmem>>, vector<8x768xf32>,
    %c0_122 = arith.constant 0 : index
    %c38_123 = arith.constant 38 : index
    %105 = vector.load %arg11[%c0_122, %c38_123] : memref<8x806xf32, #tpu.memory_space<vmem>>, vector<8x768xf32>
    %c64_124 = arith.constant 64 : index
    %c0_125 = arith.constant 0 : index
    %106 = vector.load %arg12[%c64_124, %c0_125] : memref<72x768xf32, #tpu.memory_space<vmem>>, vector<8x768xf32>
    tpu.vector_store %arg12[%c64_124, %c0_125], %105 {strides = array<i32>} : memref<72x768xf32, #tpu.memory_space<vmem>>, vector<8x768xf32>,
    %c0_126 = arith.constant 0 : index
    %c0_127 = arith.constant 0 : index
    %107 = vector.load %arg4[%c0_126, %c0_127] : memref<8x72xf32, #tpu.memory_space<vmem>>, vector<8x72xf32>
    %c0_128 = arith.constant 0 : index
    %c0_129 = arith.constant 0 : index
    %108 = vector.load %arg12[%c0_128, %c0_129] : memref<72x768xf32, #tpu.memory_space<vmem>>, vector<72x768xf32>
    %cst_130 = arith.constant dense<0.000000e+00> : vector<8x768xf32>
    %109 = tpu.matmul %107, %108, %cst_130 {dimension_numbers = #tpu.dot_dimension_numbers<[1], [0], [0], [1], [0, 0, 1, 1], [], []>} : vector<8x72xf32>, vector<72x768xf32>, vector<8x768xf32> -> vector<8x768xf32>
    %c0_131 = arith.constant 0 : index
    %c0_132 = arith.constant 0 : index
    %110 = vector.load %arg5[%c0_131, %c0_132] : memref<8x1xf32, #tpu.memory_space<vmem>>, vector<8x1xf32>
    %111 = vector.broadcast %110 : vector<8x1xf32> to vector<8x768xf32>
    %112 = arith.addf %109, %111 : vector<8x768xf32>
    %113 = vector.broadcast %0 : vector<1x768xf32> to vector<8x768xf32>
    %114 = arith.mulf %112, %113 : vector<8x768xf32>
    %cst_133 = arith.constant dense<0.000000e+00> : vector<8xf32>
    %115 = vector.multi_reduction <add>, %114, %cst_133 [1] : vector<8x768xf32> to vector<8xf32>
    %116 = vector.shape_cast %115 : vector<8xf32> to vector<8x1xf32>
    %117 = arith.mulf %114, %112 : vector<8x768xf32>
    %cst_134 = arith.constant dense<0.000000e+00> : vector<8xf32>
    %118 = vector.multi_reduction <add>, %117, %cst_134 [1] : vector<8x768xf32> to vector<8xf32>
    %119 = vector.shape_cast %118 : vector<8xf32> to vector<8x1xf32>
    %cst_135 = arith.constant 0.001953125 : f32
    %120 = vector.broadcast %cst_135 : f32 to vector<8x1xf32>
    %121 = arith.mulf %116, %120 : vector<8x1xf32>
    %cst_136 = arith.constant 0.001953125 : f32
    %122 = vector.broadcast %cst_136 : f32 to vector<8x1xf32>
    %123 = arith.mulf %119, %122 : vector<8x1xf32>
    %124 = arith.mulf %121, %121 : vector<8x1xf32>
    %125 = arith.subf %123, %124 : vector<8x1xf32>
    %126 = vector.broadcast %121 : vector<8x1xf32> to vector<8x768xf32>
    %127 = arith.subf %112, %126 : vector<8x768xf32>
    %cst_137 = arith.constant 9.99999974E-6 : f32
    %128 = vector.broadcast %cst_137 : f32 to vector<8x1xf32>
    %129 = arith.addf %125, %128 : vector<8x1xf32>
    %130 = math.rsqrt %129 : vector<8x1xf32>
    %131 = vector.broadcast %130 : vector<8x1xf32> to vector<8x768xf32>
    %132 = arith.mulf %127, %131 : vector<8x768xf32>
    %133 = vector.broadcast %1 : vector<8x1xf32> to vector<8x768xf32>
    %134 = arith.mulf %132, %133 : vector<8x768xf32>
    %135 = vector.broadcast %2 : vector<8x1xf32> to vector<8x768xf32>
    %136 = arith.addf %134, %135 : vector<8x768xf32>
    %c0_138 = arith.constant 0 : index
    %c19_139 = arith.constant 19 : index
    %137 = vector.load %arg11[%c0_138, %c19_139] : memref<8x806xf32, #tpu.memory_space<vmem>>, vector<8x768xf32>
    %cst_140 = arith.constant 0.000000e+00 : f32
    %138 = vector.broadcast %cst_140 : f32 to vector<8x768xf32>
    %139 = arith.maximumf %136, %138 : vector<8x768xf32>
    %140 = vector.broadcast %0 : vector<1x768xf32> to vector<8x768xf32>
    %141 = arith.mulf %139, %140 : vector<8x768xf32>
    %142 = arith.addf %137, %141 : vector<8x768xf32>
    %c0_141 = arith.constant 0 : index
    %c19_142 = arith.constant 19 : index
    %143 = vector.load %arg11[%c0_141, %c19_142] : memref<8x806xf32, #tpu.memory_space<vmem>>, vector<8x768xf32>
    tpu.vector_store %arg11[%c0_141, %c19_142], %142 {strides = array<i32>} : memref<8x806xf32, #tpu.memory_space<vmem>>, vector<8x768xf32>,
    %c0_143 = arith.constant 0 : index
    %c0_144 = arith.constant 0 : index
    %144 = vector.load %arg11[%c0_143, %c0_144] : memref<8x806xf32, #tpu.memory_space<vmem>>, vector<8x768xf32>
    %c0_145 = arith.constant 0 : index
    %c0_146 = arith.constant 0 : index
    %145 = vector.load %arg12[%c0_145, %c0_146] : memref<72x768xf32, #tpu.memory_space<vmem>>, vector<8x768xf32>
    tpu.vector_store %arg12[%c0_145, %c0_146], %144 {strides = array<i32>} : memref<72x768xf32, #tpu.memory_space<vmem>>, vector<8x768xf32>,
    %c0_147 = arith.constant 0 : index
    %c1_148 = arith.constant 1 : index
    %146 = vector.load %arg11[%c0_147, %c1_148] : memref<8x806xf32, #tpu.memory_space<vmem>>, vector<8x768xf32>
    %c8_149 = arith.constant 8 : index
    %c0_150 = arith.constant 0 : index
    %147 = vector.load %arg12[%c8_149, %c0_150] : memref<72x768xf32, #tpu.memory_space<vmem>>, vector<8x768xf32>
    tpu.vector_store %arg12[%c8_149, %c0_150], %146 {strides = array<i32>} : memref<72x768xf32, #tpu.memory_space<vmem>>, vector<8x768xf32>,
    %c0_151 = arith.constant 0 : index
    %c2_152 = arith.constant 2 : index
    %148 = vector.load %arg11[%c0_151, %c2_152] : memref<8x806xf32, #tpu.memory_space<vmem>>, vector<8x768xf32>
    %c16_153 = arith.constant 16 : index
    %c0_154 = arith.constant 0 : index
    %149 = vector.load %arg12[%c16_153, %c0_154] : memref<72x768xf32, #tpu.memory_space<vmem>>, vector<8x768xf32>
    tpu.vector_store %arg12[%c16_153, %c0_154], %148 {strides = array<i32>} : memref<72x768xf32, #tpu.memory_space<vmem>>, vector<8x768xf32>,
    %c0_155 = arith.constant 0 : index
    %c18_156 = arith.constant 18 : index
    %150 = vector.load %arg11[%c0_155, %c18_156] : memref<8x806xf32, #tpu.memory_space<vmem>>, vector<8x768xf32>
    %c24_157 = arith.constant 24 : index
    %c0_158 = arith.constant 0 : index
    %151 = vector.load %arg12[%c24_157, %c0_158] : memref<72x768xf32, #tpu.memory_space<vmem>>, vector<8x768xf32>
    tpu.vector_store %arg12[%c24_157, %c0_158], %150 {strides = array<i32>} : memref<72x768xf32, #tpu.memory_space<vmem>>, vector<8x768xf32>,
    %c0_159 = arith.constant 0 : index
    %c19_160 = arith.constant 19 : index
    %152 = vector.load %arg11[%c0_159, %c19_160] : memref<8x806xf32, #tpu.memory_space<vmem>>, vector<8x768xf32>
    %c32_161 = arith.constant 32 : index
    %c0_162 = arith.constant 0 : index
    %153 = vector.load %arg12[%c32_161, %c0_162] : memref<72x768xf32, #tpu.memory_space<vmem>>, vector<8x768xf32>
    tpu.vector_store %arg12[%c32_161, %c0_162], %152 {strides = array<i32>} : memref<72x768xf32, #tpu.memory_space<vmem>>, vector<8x768xf32>,
    %c0_163 = arith.constant 0 : index
    %c20_164 = arith.constant 20 : index
    %154 = vector.load %arg11[%c0_163, %c20_164] : memref<8x806xf32, #tpu.memory_space<vmem>>, vector<8x768xf32>
    %c40_165 = arith.constant 40 : index
    %c0_166 = arith.constant 0 : index
    %155 = vector.load %arg12[%c40_165, %c0_166] : memref<72x768xf32, #tpu.memory_space<vmem>>, vector<8x768xf32>
    tpu.vector_store %arg12[%c40_165, %c0_166], %154 {strides = array<i32>} : memref<72x768xf32, #tpu.memory_space<vmem>>, vector<8x768xf32>,
    %c0_167 = arith.constant 0 : index
    %c36_168 = arith.constant 36 : index
    %156 = vector.load %arg11[%c0_167, %c36_168] : memref<8x806xf32, #tpu.memory_space<vmem>>, vector<8x768xf32>
    %c48_169 = arith.constant 48 : index
    %c0_170 = arith.constant 0 : index
    %157 = vector.load %arg12[%c48_169, %c0_170] : memref<72x768xf32, #tpu.memory_space<vmem>>, vector<8x768xf32>
    tpu.vector_store %arg12[%c48_169, %c0_170], %156 {strides = array<i32>} : memref<72x768xf32, #tpu.memory_space<vmem>>, vector<8x768xf32>,
    %c0_171 = arith.constant 0 : index
    %c37_172 = arith.constant 37 : index
    %158 = vector.load %arg11[%c0_171, %c37_172] : memref<8x806xf32, #tpu.memory_space<vmem>>, vector<8x768xf32>
    %c56_173 = arith.constant 56 : index
    %c0_174 = arith.constant 0 : index
    %159 = vector.load %arg12[%c56_173, %c0_174] : memref<72x768xf32, #tpu.memory_space<vmem>>, vector<8x768xf32>
    tpu.vector_store %arg12[%c56_173, %c0_174], %158 {strides = array<i32>} : memref<72x768xf32, #tpu.memory_space<vmem>>, vector<8x768xf32>,
    %c0_175 = arith.constant 0 : index
    %c38_176 = arith.constant 38 : index
    %160 = vector.load %arg11[%c0_175, %c38_176] : memref<8x806xf32, #tpu.memory_space<vmem>>, vector<8x768xf32>
    %c64_177 = arith.constant 64 : index
    %c0_178 = arith.constant 0 : index
    %161 = vector.load %arg12[%c64_177, %c0_178] : memref<72x768xf32, #tpu.memory_space<vmem>>, vector<8x768xf32>
    tpu.vector_store %arg12[%c64_177, %c0_178], %160 {strides = array<i32>} : memref<72x768xf32, #tpu.memory_space<vmem>>, vector<8x768xf32>,
    %c0_179 = arith.constant 0 : index
    %c0_180 = arith.constant 0 : index
    %162 = vector.load %arg4[%c0_179, %c0_180] : memref<8x72xf32, #tpu.memory_space<vmem>>, vector<8x72xf32>
    %c0_181 = arith.constant 0 : index
    %c0_182 = arith.constant 0 : index
    %163 = vector.load %arg12[%c0_181, %c0_182] : memref<72x768xf32, #tpu.memory_space<vmem>>, vector<72x768xf32>
    %cst_183 = arith.constant dense<0.000000e+00> : vector<8x768xf32>
    %164 = tpu.matmul %162, %163, %cst_183 {dimension_numbers = #tpu.dot_dimension_numbers<[1], [0], [0], [1], [0, 0, 1, 1], [], []>} : vector<8x72xf32>, vector<72x768xf32>, vector<8x768xf32> -> vector<8x768xf32>
    %c0_184 = arith.constant 0 : index
    %c0_185 = arith.constant 0 : index
    %165 = vector.load %arg5[%c0_184, %c0_185] : memref<8x1xf32, #tpu.memory_space<vmem>>, vector<8x1xf32>
    %166 = vector.broadcast %165 : vector<8x1xf32> to vector<8x768xf32>
    %167 = arith.addf %164, %166 : vector<8x768xf32>
    %168 = vector.broadcast %0 : vector<1x768xf32> to vector<8x768xf32>
    %169 = arith.mulf %167, %168 : vector<8x768xf32>
    %cst_186 = arith.constant dense<0.000000e+00> : vector<8xf32>
    %170 = vector.multi_reduction <add>, %169, %cst_186 [1] : vector<8x768xf32> to vector<8xf32>
    %171 = vector.shape_cast %170 : vector<8xf32> to vector<8x1xf32>
    %172 = arith.mulf %169, %167 : vector<8x768xf32>
    %cst_187 = arith.constant dense<0.000000e+00> : vector<8xf32>
    %173 = vector.multi_reduction <add>, %172, %cst_187 [1] : vector<8x768xf32> to vector<8xf32>
    %174 = vector.shape_cast %173 : vector<8xf32> to vector<8x1xf32>
    %cst_188 = arith.constant 0.001953125 : f32
    %175 = vector.broadcast %cst_188 : f32 to vector<8x1xf32>
    %176 = arith.mulf %171, %175 : vector<8x1xf32>
    %cst_189 = arith.constant 0.001953125 : f32
    %177 = vector.broadcast %cst_189 : f32 to vector<8x1xf32>
    %178 = arith.mulf %174, %177 : vector<8x1xf32>
    %179 = arith.mulf %176, %176 : vector<8x1xf32>
    %180 = arith.subf %178, %179 : vector<8x1xf32>
    %181 = vector.broadcast %176 : vector<8x1xf32> to vector<8x768xf32>
    %182 = arith.subf %167, %181 : vector<8x768xf32>
    %cst_190 = arith.constant 9.99999974E-6 : f32
    %183 = vector.broadcast %cst_190 : f32 to vector<8x1xf32>
    %184 = arith.addf %180, %183 : vector<8x1xf32>
    %185 = math.rsqrt %184 : vector<8x1xf32>
    %186 = vector.broadcast %185 : vector<8x1xf32> to vector<8x768xf32>
    %187 = arith.mulf %182, %186 : vector<8x768xf32>
    %188 = vector.broadcast %1 : vector<8x1xf32> to vector<8x768xf32>
    %189 = arith.mulf %187, %188 : vector<8x768xf32>
    %190 = vector.broadcast %2 : vector<8x1xf32> to vector<8x768xf32>
    %191 = arith.addf %189, %190 : vector<8x768xf32>
    %c0_191 = arith.constant 0 : index
    %c19_192 = arith.constant 19 : index
    %192 = vector.load %arg11[%c0_191, %c19_192] : memref<8x806xf32, #tpu.memory_space<vmem>>, vector<8x768xf32>
    %cst_193 = arith.constant 0.000000e+00 : f32
    %193 = vector.broadcast %cst_193 : f32 to vector<8x768xf32>
    %194 = arith.maximumf %191, %193 : vector<8x768xf32>
    %195 = vector.broadcast %0 : vector<1x768xf32> to vector<8x768xf32>
    %196 = arith.mulf %194, %195 : vector<8x768xf32>
    %197 = arith.addf %192, %196 : vector<8x768xf32>
    %c0_194 = arith.constant 0 : index
    %c19_195 = arith.constant 19 : index
    %198 = vector.load %arg11[%c0_194, %c19_195] : memref<8x806xf32, #tpu.memory_space<vmem>>, vector<8x768xf32>
    tpu.vector_store %arg11[%c0_194, %c19_195], %197 {strides = array<i32>} : memref<8x806xf32, #tpu.memory_space<vmem>>, vector<8x768xf32>,
    %c0_196 = arith.constant 0 : index
    %c0_197 = arith.constant 0 : index
    %199 = vector.load %arg11[%c0_196, %c0_197] : memref<8x806xf32, #tpu.memory_space<vmem>>, vector<8x768xf32>
    %c0_198 = arith.constant 0 : index
    %c0_199 = arith.constant 0 : index
    %200 = vector.load %arg12[%c0_198, %c0_199] : memref<72x768xf32, #tpu.memory_space<vmem>>, vector<8x768xf32>
    tpu.vector_store %arg12[%c0_198, %c0_199], %199 {strides = array<i32>} : memref<72x768xf32, #tpu.memory_space<vmem>>, vector<8x768xf32>,
    %c0_200 = arith.constant 0 : index
    %c1_201 = arith.constant 1 : index
    %201 = vector.load %arg11[%c0_200, %c1_201] : memref<8x806xf32, #tpu.memory_space<vmem>>, vector<8x768xf32>
    %c8_202 = arith.constant 8 : index
    %c0_203 = arith.constant 0 : index
    %202 = vector.load %arg12[%c8_202, %c0_203] : memref<72x768xf32, #tpu.memory_space<vmem>>, vector<8x768xf32>
    tpu.vector_store %arg12[%c8_202, %c0_203], %201 {strides = array<i32>} : memref<72x768xf32, #tpu.memory_space<vmem>>, vector<8x768xf32>,
    %c0_204 = arith.constant 0 : index
    %c2_205 = arith.constant 2 : index
    %203 = vector.load %arg11[%c0_204, %c2_205] : memref<8x806xf32, #tpu.memory_space<vmem>>, vector<8x768xf32>
    %c16_206 = arith.constant 16 : index
    %c0_207 = arith.constant 0 : index
    %204 = vector.load %arg12[%c16_206, %c0_207] : memref<72x768xf32, #tpu.memory_space<vmem>>, vector<8x768xf32>
    tpu.vector_store %arg12[%c16_206, %c0_207], %203 {strides = array<i32>} : memref<72x768xf32, #tpu.memory_space<vmem>>, vector<8x768xf32>,
    %c0_208 = arith.constant 0 : index
    %c18_209 = arith.constant 18 : index
    %205 = vector.load %arg11[%c0_208, %c18_209] : memref<8x806xf32, #tpu.memory_space<vmem>>, vector<8x768xf32>
    %c24_210 = arith.constant 24 : index
    %c0_211 = arith.constant 0 : index
    %206 = vector.load %arg12[%c24_210, %c0_211] : memref<72x768xf32, #tpu.memory_space<vmem>>, vector<8x768xf32>
    tpu.vector_store %arg12[%c24_210, %c0_211], %205 {strides = array<i32>} : memref<72x768xf32, #tpu.memory_space<vmem>>, vector<8x768xf32>,
    %c0_212 = arith.constant 0 : index
    %c19_213 = arith.constant 19 : index
    %207 = vector.load %arg11[%c0_212, %c19_213] : memref<8x806xf32, #tpu.memory_space<vmem>>, vector<8x768xf32>
    %c32_214 = arith.constant 32 : index
    %c0_215 = arith.constant 0 : index
    %208 = vector.load %arg12[%c32_214, %c0_215] : memref<72x768xf32, #tpu.memory_space<vmem>>, vector<8x768xf32>
    tpu.vector_store %arg12[%c32_214, %c0_215], %207 {strides = array<i32>} : memref<72x768xf32, #tpu.memory_space<vmem>>, vector<8x768xf32>,
    %c0_216 = arith.constant 0 : index
    %c20_217 = arith.constant 20 : index
    %209 = vector.load %arg11[%c0_216, %c20_217] : memref<8x806xf32, #tpu.memory_space<vmem>>, vector<8x768xf32>
    %c40_218 = arith.constant 40 : index
    %c0_219 = arith.constant 0 : index
    %210 = vector.load %arg12[%c40_218, %c0_219] : memref<72x768xf32, #tpu.memory_space<vmem>>, vector<8x768xf32>
    tpu.vector_store %arg12[%c40_218, %c0_219], %209 {strides = array<i32>} : memref<72x768xf32, #tpu.memory_space<vmem>>, vector<8x768xf32>,
    %c0_220 = arith.constant 0 : index
    %c36_221 = arith.constant 36 : index
    %211 = vector.load %arg11[%c0_220, %c36_221] : memref<8x806xf32, #tpu.memory_space<vmem>>, vector<8x768xf32>
    %c48_222 = arith.constant 48 : index
    %c0_223 = arith.constant 0 : index
    %212 = vector.load %arg12[%c48_222, %c0_223] : memref<72x768xf32, #tpu.memory_space<vmem>>, vector<8x768xf32>
    tpu.vector_store %arg12[%c48_222, %c0_223], %211 {strides = array<i32>} : memref<72x768xf32, #tpu.memory_space<vmem>>, vector<8x768xf32>,
    %c0_224 = arith.constant 0 : index
    %c37_225 = arith.constant 37 : index
    %213 = vector.load %arg11[%c0_224, %c37_225] : memref<8x806xf32, #tpu.memory_space<vmem>>, vector<8x768xf32>
    %c56_226 = arith.constant 56 : index
    %c0_227 = arith.constant 0 : index
    %214 = vector.load %arg12[%c56_226, %c0_227] : memref<72x768xf32, #tpu.memory_space<vmem>>, vector<8x768xf32>
    tpu.vector_store %arg12[%c56_226, %c0_227], %213 {strides = array<i32>} : memref<72x768xf32, #tpu.memory_space<vmem>>, vector<8x768xf32>,
    %c0_228 = arith.constant 0 : index
    %c38_229 = arith.constant 38 : index
    %215 = vector.load %arg11[%c0_228, %c38_229] : memref<8x806xf32, #tpu.memory_space<vmem>>, vector<8x768xf32>
    %c64_230 = arith.constant 64 : index
    %c0_231 = arith.constant 0 : index
    %216 = vector.load %arg12[%c64_230, %c0_231] : memref<72x768xf32, #tpu.memory_space<vmem>>, vector<8x768xf32>
    tpu.vector_store %arg12[%c64_230, %c0_231], %215 {strides = array<i32>} : memref<72x768xf32, #tpu.memory_space<vmem>>, vector<8x768xf32>,
    %c0_232 = arith.constant 0 : index
    %c0_233 = arith.constant 0 : index
    %217 = vector.load %arg8[%c0_232, %c0_233] : memref<8x72xf32, #tpu.memory_space<vmem>>, vector<8x72xf32>
    %c0_234 = arith.constant 0 : index
    %c0_235 = arith.constant 0 : index
    %218 = vector.load %arg12[%c0_234, %c0_235] : memref<72x768xf32, #tpu.memory_space<vmem>>, vector<72x768xf32>
    %cst_236 = arith.constant dense<0.000000e+00> : vector<8x768xf32>
    %219 = tpu.matmul %217, %218, %cst_236 {dimension_numbers = #tpu.dot_dimension_numbers<[1], [0], [0], [1], [0, 0, 1, 1], [], []>} : vector<8x72xf32>, vector<72x768xf32>, vector<8x768xf32> -> vector<8x768xf32>
    %c0_237 = arith.constant 0 : index
    %c0_238 = arith.constant 0 : index
    %220 = vector.load %arg9[%c0_237, %c0_238] : memref<8x1xf32, #tpu.memory_space<vmem>>, vector<8x1xf32>
    %221 = vector.broadcast %220 : vector<8x1xf32> to vector<8x768xf32>
    %222 = arith.addf %219, %221 : vector<8x768xf32>
    %223 = arith.negf %222 : vector<8x768xf32>
    %224 = math.exp %223 : vector<8x768xf32>
    %cst_239 = arith.constant 1.000000e+00 : f32
    %225 = vector.broadcast %cst_239 : f32 to vector<8x768xf32>
    %226 = arith.addf %225, %224 : vector<8x768xf32>
    %227 = arith.divf %225, %226 : vector<8x768xf32>
    %c0_240 = arith.constant 0 : index
    %c19_241 = arith.constant 19 : index
    %228 = vector.load %arg0[%c0_240, %c19_241] : memref<8x806xf32, #tpu.memory_space<vmem>>, vector<8x768xf32>
    %229 = arith.addf %228, %227 : vector<8x768xf32>
    %cst_242 = arith.constant 9.99999974E-5 : f32
    %cst_243 = arith.constant 1.000000e+00 : f32
    %230 = vector.broadcast %cst_242 : f32 to vector<8x768xf32>
    %231 = arith.maximumf %230, %229 : vector<8x768xf32>
    %232 = vector.broadcast %cst_243 : f32 to vector<8x768xf32>
    %233 = arith.minimumf %232, %231 : vector<8x768xf32>
    %c0_244 = arith.constant 0 : index
    %c0_245 = arith.constant 0 : index
    %234 = vector.load %arg10[%c0_244, %c0_245] : memref<8x768xf32, #tpu.memory_space<vmem>>, vector<8x768xf32>
    tpu.vector_store %arg10[%c0_244, %c0_245], %233 {strides = array<i32>} : memref<8x768xf32, #tpu.memory_space<vmem>>, vector<8x768xf32>,
    return
  }
}

</mosaic_0001>

<bundles_post_ra>
// kernel: tpu_custom_call.1
= control target key start
LH: loop header
LB: loop body
LE: loop exit
PB: predicated region body
PF: predicated region fallthrough
CT: control target
= control target key end

     0   :  { %15 = vsyncpa [#allocation5], 0  ;;  %s5656_s0 = inlined_call_operand.hbm [shape: f32[8,806], index: 0, kind: input, shape index: {}]   ;;  %s5657_s1 = inlined_call_operand.vmem [shape: f32[1,768], index: 1, kind: input, shape index: {}]   ;;  %s5658_s2 = inlined_call_operand.vmem [shape: f32[8,72], index: 2, kind: input, shape index: {}]   ;;  %s5659_s3 = inlined_call_operand.vmem [shape: f32[8,1], index: 3, kind: input, shape index: {}]   ;;  %s5660_s4 = inlined_call_operand.vmem [shape: f32[8,72], index: 4, kind: input, shape index: {}]   ;;  %s5661_s5 = inlined_call_operand.vmem [shape: f32[8,1], index: 5, kind: input, shape index: {}]   ;;  %s5662_s6 = inlined_call_operand.vmem [shape: f32[8,1], index: 6, kind: input, shape index: {}]   ;;  %s5663_s7 = inlined_call_operand.vmem [shape: f32[8,1], index: 7, kind: input, shape index: {}]   ;;  %s5664_s8 = inlined_call_operand.vmem [shape: f32[8,72], index: 8, kind: input, shape index: {}]   ;;  %s5665_s9 = inlined_call_operand.vmem [shape: f32[8,1], index: 9, kind: input, shape index: {}]   ;;  %s5666_s10 = inlined_call_operand.hbm [shape: f32[8,768], index: 10, kind: output, shape index: {}]  }
   0x1   :  { %16 = vsyncpa [#allocation6], 0  ;;  %s22_s15 = sshll.u32 %s5656_s0, 4  ;;  %s4310_s16 = smov [#allocation4]   ;;  %s23_s15 = int_to_ptr.hbm [resolvable:$true] %s22_s15 }
   0x2   :  { %s24_s17 = sshll.u32 %s4310_s16, 4  ;;  %s25_s17 = int_to_ptr.vmem [resolvable:$true] %s24_s17 }
   0x3   :  { %27 = dma.hbm_to_vmem [thread:$0]  %s23_s15, 896, %s25_s17, [#allocation5]  }
   0x4   :  { %4306 = dma.done.wait [#allocation5], 896  }
   0x5   :  { %4307 = vsyncadd [#allocation5], 4294966400  ;;  %v4381_v0 = vld [vmem:[#allocation4 + $0x10] sm:$0xff]  ;;  %v4383_v1 = vld [vmem:[#allocation4 + $0x18] sm:$0xff]  ;;  %s4311_s18 = smov 90   ;;  %s4312_s19 = smov 92  }
   0x6   :  { %v3625_v2 = vpack.i.bf16 %v4383_v1, %v4381_v0  ;;  %s4313_s0 = smov 108   ;;  %v4390_v3 = vld [vmem:[#allocation4] sm:$0xff]  ;;  %v4392_v4 = vld [vmem:[#allocation4 + $0x8] sm:$0xff]  ;;  %s4314_s20 = smov 91   ;;  %v408_v9 = vld [vmem:[#allocation4 + $0x30] sm:$0xff]  ;;  %vm430_vm0 = vcmask 736256  }
   0x7   :  { %v3640_v5 = vpack.i.bf16 %v4392_v4, %v4390_v3  ;;  %v4399_v6 = vld [vmem:[#allocation4 + $0x20] sm:$0xff]  ;;  %v4401_v7 = vld [vmem:[#allocation4 + $0x28] sm:$0xff]  ;;  %s4315_s21 = smov 109   ;;  %s4316_s22 = smov 110   ;;  %vm383_vm1 = vcmask 744448   ;;  %vm336_vm2 = vcmask 752640  }
   0x8   :  { %3626 = vrot.lane.b32.xlu0 %v3625_v2, %s4311_s18  ;;  %3636 = vrot.lane.b32.xlu1 %v3625_v2, %s4312_s19  ;;  %v3655_v8 = vpack.i.bf16 %v4401_v7, %v4399_v6  ;;  %s4317_s23 = smov 126   ;;  %s4318_s24 = smov 127   ;;  %v3740_v10 = vpack.i.bf16 %v408_v9, %v4401_v7  ;;  %vm289_vm3 = vcmask 883712   ;;  %vm242_vm4 = vcmask 891904  }
   0x9   :  { %3646 = vrot.lane.b32.xlu2 %v3625_v2, %s4313_s0  ;;  %vm195_vm5 = vcmask 900096   ;;  %vm148_vm6 = vcmask 1031168   ;;  %vm101_vm7 = vcmask 1039360   ;;  %vm510_vm8 = vcmask 588800   ;;  %s4320_s29 = smov 19  }
   0xa   :  { %vm59_vm9 = vcmask 310272   ;;  %vm677_vm10 = vcmask 154624   ;;  %vm690_vm11 = vcmask 1047704  }
  0x10   :  { %3631 = vrot.lane.b32.xlu0 %v3625_v2, %s4314_s20  ;;  %3641 = vrot.lane.b32.xlu1 %v3640_v5, %s4311_s18 }
  0x11   :  { %3651 = vrot.lane.b32.xlu2 %v3640_v5, %s4314_s20 }
  0x18   :  { %3656 = vrot.lane.b32.xlu0 %v3655_v8, %s4311_s18  ;;  %3661 = vrot.lane.b32.xlu1 %v3625_v2, %s4315_s21 }
  0x19   :  { %3666 = vrot.lane.b32.xlu2 %v3640_v5, %s4312_s19 }
  0x20   :  { %3671 = vrot.lane.b32.xlu0 %v3655_v8, %s4314_s20  ;;  %3676 = vrot.lane.b32.xlu1 %v3625_v2, %s4316_s22 }
  0x21   :  { %3681 = vrot.lane.b32.xlu2 %v3640_v5, %s4313_s0 }
  0x28   :  { %3686 = vrot.lane.b32.xlu0 %v3655_v8, %s4312_s19  ;;  %3691 = vrot.lane.b32.xlu1 %v3625_v2, %s4317_s23 }
  0x29   :  { %3696 = vrot.lane.b32.xlu2 %v3640_v5, %s4315_s21 }
  0x30   :  { %3701 = vrot.lane.b32.xlu0 %v3655_v8, %s4313_s0  ;;  %428 = vrot.lane.b32.xlu1 %v408_v9, %s4311_s18 }
  0x31   :  { %3706 = vrot.lane.b32.xlu2 %v3625_v2, %s4318_s24 }
  0x38   :  { %3711 = vrot.lane.b32.xlu0 %v3640_v5, %s4316_s22  ;;  %3716 = vrot.lane.b32.xlu1 %v3655_v8, %s4315_s21 }
  0x39   :  { %381 = vrot.lane.b32.xlu2 %v408_v9, %s4314_s20 }
  0x40   :  { %3726 = vrot.lane.b32.xlu1 %v3655_v8, %s4316_s22  ;;  %3721 = vrot.lane.b32.xlu0 %v3640_v5, %s4317_s23 }
  0x41   :  { %334 = vrot.lane.b32.xlu2 %v408_v9, %s4312_s19 }
  0x48   :  { %3736 = vrot.lane.b32.xlu1 %v3655_v8, %s4317_s23  ;;  %3731 = vrot.lane.b32.xlu0 %v3640_v5, %s4318_s24 }
  0x49   :  { %287 = vrot.lane.b32.xlu2 %v408_v9, %s4313_s0 }
  0x50   :  { %95 = vrot.lane.b32.xlu0 %v4399_v6, %s4318_s24  ;;  %240 = vrot.lane.b32.xlu1 %v408_v9, %s4315_s21 }
  0x51   :  { %193 = vrot.lane.b32.xlu2 %v408_v9, %s4316_s22 }
  0x58   :  { %3741 = vrot.lane.b32.xlu1 %v3740_v10, %s4318_s24  ;;  %146 = vrot.lane.b32.xlu0 %v408_v9, %s4317_s23 }
  0x63   :  { %v4433_v11 = vpop.permute.xlu2 %3646 }
  0x64   :  { %v3649_v20 = vunpack.i.h.bf16 %v4433_v11  ;;  %v3648_v21 = vunpack.i.l.bf16 %v4433_v11 }
  0x66   :  { %v292_v44 = vsel %vm289_vm3, %v3648_v21, %v3649_v20 }
  0x6b   :  { %v3652_v12 = vpop.permute.xlu2 %3651 }
  0x6c   :  { %v3654_v24 = vunpack.i.h.bf16 %v3652_v12  ;;  %v3653_v25 = vunpack.i.l.bf16 %v3652_v12 }
  0x6e   :  { %v384_v40 = vsel %vm383_vm1, %v3653_v25, %v3654_v24 }
  0x73   :  { %v3667_v13 = vpop.permute.xlu2 %3666 }
  0x74   :  { %v3669_v26 = vunpack.i.h.bf16 %v3667_v13  ;;  %v3668_v33 = vunpack.i.l.bf16 %v3667_v13 }
  0x76   :  { %v337_v47 = vsel %vm336_vm2, %v3668_v33, %v3669_v26 }
  0x7a   :  { %v3627_v14 = vpop.permute.xlu0 %3626  ;;  %v4435_v15 = vpop.permute.xlu1 %3636 }
  0x7b   :  { %v3629_v16 = vunpack.i.h.bf16 %v3627_v14  ;;  %v3628_v17 = vunpack.i.l.bf16 %v3627_v14  ;;  %v3682_v18 = vpop.permute.xlu2 %3681  ;;  %v3639_v22 = vunpack.i.h.bf16 %v4435_v15  ;;  %v3638_v23 = vunpack.i.l.bf16 %v4435_v15 }
  0x7c   :  { %v3684_v34 = vunpack.i.h.bf16 %v3682_v18  ;;  %v3683_v39 = vunpack.i.l.bf16 %v3682_v18 }
  0x7d   :  { %v433_v19 = vsel %vm430_vm0, %v3628_v17, %v3629_v16  ;;  %v339_v37 = vsel %vm336_vm2, %v3638_v23, %v3639_v22  ;;  %v338_v43 = vsel %vm336_vm2, %v3669_v26, %v3638_v23  ;;  %v4496_v23 = vld [vmem:[%s5658_s2] sm:$0xff] }
  0x7e   :  { %561 = vmatpush.msra.mxu2 %v433_v19  ;;  %v291_v48 = vsel %vm289_vm3, %v3684_v34, %v3648_v21  ;;  %v290_v51 = vsel %vm289_vm3, %v3683_v39, %v3684_v34 }
  0x82   :  { %v3632_v27 = vpop.permute.xlu0 %3631  ;;  %v3642_v28 = vpop.permute.xlu1 %3641 }
  0x83   :  { %v3634_v29 = vunpack.i.h.bf16 %v3632_v27  ;;  %v3633_v30 = vunpack.i.l.bf16 %v3632_v27  ;;  %v3644_v31 = vunpack.i.h.bf16 %v3642_v28  ;;  %v3643_v32 = vunpack.i.l.bf16 %v3642_v28  ;;  %v3697_v41 = vpop.permute.xlu2 %3696 }
  0x84   :  { %v3699_v45 = vunpack.i.h.bf16 %v3697_v41  ;;  %v3698_v46 = vunpack.i.l.bf16 %v3697_v41 }
  0x85   :  { %v432_v35 = vsel %vm430_vm0, %v3644_v31, %v3628_v17  ;;  %v386_v36 = vsel %vm383_vm1, %v3633_v30, %v3634_v29  ;;  %v431_v38 = vsel %vm430_vm0, %v3643_v32, %v3644_v31  ;;  %v385_v42 = vsel %vm383_vm1, %v3654_v24, %v3633_v30 }
  0x86   :  { %541 = vmatpush.msra.mxu1 %v432_v35  ;;  %562 = vmatpush.msra.mxu2 %v386_v36  ;;  %v243_v55 = vsel %vm242_vm4, %v3698_v46, %v3699_v45 }
  0x87   :  { %521 = vmatpush.msra.mxu0 %v431_v38 }
  0x88   :  { %542 = vmatpush.msra.mxu1 %v385_v42  ;;  %563 = vmatpush.msra.mxu2 %v339_v37  ;;  %v504_v37 = vld [vmem:[%s5659_s3] sm:$0xff]  ;;  %v4319_v42 = vmov 0  }
  0x89   :  { %522 = vmatpush.msra.mxu0 %v384_v40  ;;  %3745 = vset.pattern.permute.xlu2 %v4319_v42 }
  0x8a   :  { %v4456_v49 = vpop.permute.xlu0 %3656  ;;  %v4458_v50 = vpop.permute.xlu1 %3661  ;;  %543 = vmatpush.msra.mxu1 %v338_v43  ;;  %564 = vmatpush.msra.mxu2 %v292_v44 }
  0x8b   :  { %v3658_v52 = vunpack.i.l.bf16 %v4456_v49  ;;  %v3664_v53 = vunpack.i.h.bf16 %v4458_v50  ;;  %v3663_v54 = vunpack.i.l.bf16 %v4458_v50  ;;  %523 = vmatpush.msra.mxu0 %v337_v47  ;;  %v4477_v8 = vpop.permute.xlu2 %3706  ;;  %507 = vperm.xlu2 %3745, %v504_v37  }
  0x8c   :  { %544 = vmatpush.msra.mxu1 %v291_v48  ;;  %v3709_v9 = vunpack.i.h.bf16 %v4477_v8  ;;  %v3708_v10 = vunpack.i.l.bf16 %v4477_v8  ;;  %3986 = vset.pattern.permute.xlu0 %v4319_v42  ;;  %v3659_v48 = vunpack.i.h.bf16 %v4456_v49 }
  0x8d   :  { %v434_v56 = vsel %vm430_vm0, %v3629_v16, %v3658_v52  ;;  %v244_v57 = vsel %vm242_vm4, %v3699_v45, %v3663_v54  ;;  %v245_v58 = vsel %vm242_vm4, %v3663_v54, %v3664_v53  ;;  %524 = vmatpush.msra.mxu0 %v290_v51  ;;  %4107 = vset.pattern.permute.xlu1 %v4319_v42 }
  0x8e   :  { %581 = vmatpush.msra.mxu3 %v434_v56  ;;  %545 = vmatpush.msra.mxu1 %v244_v57  ;;  %v104_v21 = vsel %vm101_vm7, %v3708_v10, %v3709_v9  ;;  %v435_v57 = vsel %vm430_vm0, %v3658_v52, %v3659_v48 }
  0x8f   :  { %565 = vmatpush.msra.mxu2 %v245_v58  ;;  %525 = vmatpush.msra.mxu0 %v243_v55 }
  0x92   :  { %v4470_v59 = vpop.permute.xlu0 %3671  ;;  %v3677_v60 = vpop.permute.xlu1 %3676 }
  0x93   :  { %v3673_v61 = vunpack.i.l.bf16 %v4470_v59  ;;  %v3679_v62 = vunpack.i.h.bf16 %v3677_v60  ;;  %v3678_v63 = vunpack.i.l.bf16 %v3677_v60  ;;  %v382_v28 = vpop.permute.xlu2 %381  ;;  %v3674_v54 = vunpack.i.h.bf16 %v4470_v59 }
  0x95   :  { %v387_v2 = vsel %vm383_vm1, %v3634_v29, %v3673_v61  ;;  %v198_v5 = vsel %vm195_vm5, %v3678_v63, %v3679_v62 }
  0x96   :  { %582 = vmatpush.msra.mxu3 %v387_v2  ;;  %566 = vmatpush.msra.mxu2 %v198_v5  ;;  %v389_v2 = vsel %vm383_vm1, %v3674_v54, %v382_v28 }
  0x9a   :  { %v4481_v12 = vpop.permute.xlu0 %3686  ;;  %v3692_v13 = vpop.permute.xlu1 %3691 }
  0x9b   :  { %v3688_v14 = vunpack.i.l.bf16 %v4481_v12  ;;  %v3694_v16 = vunpack.i.h.bf16 %v3692_v13  ;;  %v3693_v17 = vunpack.i.l.bf16 %v3692_v13  ;;  %v335_v38 = vpop.permute.xlu2 %334  ;;  %v3689_v56 = vunpack.i.h.bf16 %v4481_v12 }
  0x9d   :  { %v340_v18 = vsel %vm336_vm2, %v3639_v22, %v3688_v14  ;;  %v151_v19 = vsel %vm148_vm6, %v3693_v17, %v3694_v16  ;;  %v341_v59 = vsel %vm336_vm2, %v3688_v14, %v3689_v56 }
  0x9e   :  { %583 = vmatpush.msra.mxu3 %v340_v18  ;;  %567 = vmatpush.msra.mxu2 %v151_v19 }
  0xa0   :  { %568 = vmatpush.msra.mxu2 %v104_v21 }
  0xa2   :  { %v4498_v24 = vpop.permute.xlu0 %3701  ;;  %v429_v15 = vpop.permute.xlu1 %428  ;;  %569 = vmatpush.msra.mxu2 %v4381_v0 }
  0xa3   :  { %v3703_v22 = vunpack.i.l.bf16 %v4498_v24  ;;  %3578 = vmatmul.msk.f32.vlgmr.msra.gmra.mxu2 %vm510_vm8, %v4496_v23  ;;  %v288_v55 = vpop.permute.xlu2 %287  ;;  %v436_v58 = vsel %vm430_vm0, %v3659_v48, %v429_v15 }
  0xa5   :  { %v293_v25 = vsel %vm289_vm3, %v3649_v20, %v3703_v22 }
  0xa6   :  { %584 = vmatpush.msra.mxu3 %v293_v25 }
  0xaa   :  { %v3712_v26 = vpop.permute.xlu0 %3711  ;;  %v4509_v27 = vpop.permute.xlu1 %3716 }
  0xab   :  { %v3714_v29 = vunpack.i.h.bf16 %v3712_v26  ;;  %v3713_v30 = vunpack.i.l.bf16 %v3712_v26  ;;  %v3718_v0 = vunpack.i.l.bf16 %v4509_v27  ;;  %v50_v26 = vld [vmem:[%s5657_s1] sm:$0x3f] }
  0xad   :  { %v196_v31 = vsel %vm195_vm5, %v3713_v30, %v3714_v29  ;;  %v197_v32 = vsel %vm195_vm5, %v3714_v29, %v3678_v63  ;;  %v246_v33 = vsel %vm242_vm4, %v3664_v53, %v3718_v0  ;;  %v3719_v63 = vunpack.i.h.bf16 %v4509_v27 }
  0xae   :  { %526 = vmatpush.msra.mxu0 %v196_v31  ;;  %546 = vmatpush.msra.mxu1 %v197_v32  ;;  %v4586_v29 = vperm.slane %v50_v26, 2  ;;  %v4590_v32 = vperm.slane %v50_v26, 0 }
  0xaf   :  { %585 = vmatpush.msra.mxu3 %v246_v33  ;;  %v4592_v33 = vperm.slane %v50_v26, 1 }
  0xb2   :  { %v4517_v11 = vpop.permute.xlu1 %3726  ;;  %v3722_v20 = vpop.permute.xlu0 %3721 }
  0xb3   :  { %v3728_v34 = vunpack.i.l.bf16 %v4517_v11  ;;  %v3724_v35 = vunpack.i.h.bf16 %v3722_v20  ;;  %v3723_v36 = vunpack.i.l.bf16 %v3722_v20  ;;  %v3729_v52 = vunpack.i.h.bf16 %v4517_v11 }
  0xb5   :  { %v149_v39 = vsel %vm148_vm6, %v3723_v36, %v3724_v35  ;;  %v150_v40 = vsel %vm148_vm6, %v3724_v35, %v3693_v17  ;;  %v199_v41 = vsel %vm195_vm5, %v3679_v62, %v3728_v34  ;;  %v3704_v62 = vunpack.i.h.bf16 %v4498_v24 }
  0xb6   :  { %527 = vmatpush.msra.mxu0 %v149_v39  ;;  %547 = vmatpush.msra.mxu1 %v150_v40 }
  0xb7   :  { %586 = vmatpush.msra.mxu3 %v199_v41  ;;  %v294_v8 = vsel %vm289_vm3, %v3703_v22, %v3704_v62  ;;  %v295_v12 = vsel %vm289_vm3, %v3704_v62, %v288_v55 }
  0xba   :  { %v3737_v43 = vpop.permute.xlu1 %3736  ;;  %v3732_v44 = vpop.permute.xlu0 %3731 }
  0xbb   :  { %v3738_v45 = vunpack.i.l.bf16 %v3737_v43  ;;  %v3734_v46 = vunpack.i.h.bf16 %v3732_v44  ;;  %v3733_v47 = vunpack.i.l.bf16 %v3732_v44  ;;  %v3739_v5 = vunpack.i.h.bf16 %v3737_v43 }
  0xbc   :  { %v4601_v43 = vperm.slane %v50_v26, 4 }
  0xbd   :  { %v102_v50 = vsel %vm101_vm7, %v3733_v47, %v3734_v46  ;;  %v103_v51 = vsel %vm101_vm7, %v3734_v46, %v3708_v10  ;;  %v152_v53 = vsel %vm148_vm6, %v3694_v16, %v3738_v45  ;;  %v247_v10 = vsel %vm242_vm4, %v3718_v0, %v3719_v63 }
  0xbe   :  { %528 = vmatpush.msra.mxu0 %v102_v50  ;;  %548 = vmatpush.msra.mxu1 %v103_v51  ;;  %v153_v21 = vsel %vm148_vm6, %v3738_v45, %v3739_v5  ;;  %v4603_v46 = vperm.slane %v50_v26, 5 }
  0xbf   :  { %587 = vmatpush.msra.mxu3 %v152_v53  ;;  %v4321_v53 = vmov 0.0  }
  0xc0   :  { %529 = vmatpush.msra.mxu0 %v4390_v3  ;;  %549 = vmatpush.msra.mxu1 %v4392_v4  ;;  %v388_v4 = vsel %vm383_vm1, %v3673_v61, %v3674_v54  ;;  %v342_v61 = vsel %vm336_vm2, %v3689_v56, %v335_v38  ;;  %v4598_v38 = vperm.slane %v50_v26, 3  ;;  %60 = vst.msk [vmem:[#allocation2 + $0x30] sm:$0xff] %vm59_vm9, %v4321_v53 }
  0xc1   :  { %3576 = vmatmul.msk.f32.vlgmr.msra.gmra.mxu0 %vm510_vm8, %v4496_v23  ;;  %3577 = vmatmul.msk.f32.vlgmr.msra.gmra.mxu1 %vm510_vm8, %v4496_v23  ;;  %53 = vst [vmem:[#allocation2] sm:$0xff] %v4321_v53 }
  0xc2   :  { %601 = vmatpush.msrb.mxu0 %v435_v57  ;;  %621 = vmatpush.msrb.mxu1 %v436_v58  ;;  %v96_v60 = vpop.permute.xlu0 %95  ;;  %v241_v3 = vpop.permute.xlu1 %240 }
  0xc3   :  { %v105_v49 = vsel %vm101_vm7, %v3709_v9, %v96_v60  ;;  %v194_v9 = vpop.permute.xlu2 %193  ;;  %v248_v13 = vsel %vm242_vm4, %v3719_v63, %v241_v3 }
  0xc4   :  { %602 = vmatpush.msrb.mxu0 %v388_v4  ;;  %622 = vmatpush.msrb.mxu1 %v389_v2  ;;  %v201_v17 = vsel %vm195_vm5, %v3729_v52, %v194_v9  ;;  %v51_v9 = vld [vmem:[%s5662_s6] sm:$0xff] }
  0xc5   :  { %588 = vmatpush.msra.mxu3 %v105_v49 }
  0xc6   :  { %603 = vmatpush.msrb.mxu0 %v341_v59  ;;  %623 = vmatpush.msrb.mxu1 %v342_v61 }
  0xc7   :  { %589 = vmatpush.msra.mxu3 %v4383_v1  ;;  %v200_v1 = vsel %vm195_vm5, %v3728_v34, %v3729_v52 }
  0xc8   :  { %3579 = vmatmul.msk.f32.vlgmr.msra.gmra.mxu3 %vm510_vm8, %v4496_v23  ;;  %604 = vmatpush.msrb.mxu0 %v294_v8  ;;  %v1133_v8 = vld [vmem:[%s5661_s5] sm:$0xff] }
  0xc9   :  { %624 = vmatpush.msrb.mxu1 %v295_v12  ;;  %v52_v12 = vld [vmem:[%s5663_s7] sm:$0xff] }
  0xca   :  { %605 = vmatpush.msrb.mxu0 %v247_v10  ;;  %v3742_v14 = vpop.permute.xlu1 %3741  ;;  %v147_v16 = vpop.permute.xlu0 %146 }
  0xcb   :  { %625 = vmatpush.msrb.mxu1 %v248_v13  ;;  %v3744_v18 = vunpack.i.h.bf16 %v3742_v14  ;;  %v3743_v19 = vunpack.i.l.bf16 %v3742_v14  ;;  %v154_v24 = vsel %vm148_vm6, %v3739_v5, %v147_v16 }
  0xcc   :  { %606 = vmatpush.msrb.mxu0 %v200_v1 }
  0xcd   :  { %626 = vmatpush.msrb.mxu1 %v201_v17  ;;  %v106_v15 = vsel %vm101_vm7, %v96_v60, %v3743_v19  ;;  %v107_v22 = vsel %vm101_vm7, %v3743_v19, %v3744_v18 }
  0xce   :  { %607 = vmatpush.msrb.mxu0 %v153_v21 }
  0xcf   :  { %627 = vmatpush.msrb.mxu1 %v154_v24 }
  0xd0   :  { %608 = vmatpush.msrb.mxu0 %v106_v15 }
  0xd1   :  { %628 = vmatpush.msrb.mxu1 %v107_v22 }
  0xd2   :  { %609 = vmatpush.msrb.mxu0 %v4399_v6 }
  0xd3   :  { %629 = vmatpush.msrb.mxu1 %v4401_v7  ;;  %3580 = vmatmul.msk.f32.vlgmr.msrb.gmra.mxu0 %vm510_vm8, %v4496_v23 }
  0xd4   :  { %3581 = vmatmul.msk.f32.vlgmr.msrb.gmra.mxu1 %vm510_vm8, %v4496_v23 }
  0xe5   :  { %v508_v25 = vpop.permute.xlu2 %507 }
 0x126   :  { %v571_v27 = vpop.f32.mrf.mxu2 }
 0x127   :  { %v572_v28 = vadd.f32 %v571_v27, %v508_v25 }
 0x129   :  { %v636_v30 = vmax.f32 %v572_v28, 0.0 }
 0x12b   :  { %v655_v6 = vmul.f32 %v4586_v29, %v636_v30 }
 0x12d   :  { %669 = vrot.lane.b32.xlu2 %v655_v6, %s4320_s29 }
 0x13e   :  { %v531_v7 = vpop.f32.mrf.mxu0  ;;  %v551_v0 = vpop.f32.mrf.mxu1 }
 0x13f   :  { %v532_v31 = vadd.f32 %v531_v7, %v508_v25  ;;  %v552_v23 = vadd.f32 %v551_v0, %v508_v25 }
 0x141   :  { %v634_v11 = vmax.f32 %v532_v31, 0.0  ;;  %v635_v20 = vmax.f32 %v552_v23, 0.0 }
 0x143   :  { %v653_v34 = vmul.f32 %v4590_v32, %v634_v11  ;;  %v654_v35 = vmul.f32 %v4592_v33, %v635_v20 }
 0x145   :  { %667 = vrot.lane.b32.xlu1 %v654_v35, %s4320_s29  ;;  %665 = vrot.lane.b32.xlu0 %v653_v34, %s4320_s29 }
 0x14b   :  { %v591_v36 = vpop.f32.mrf.mxu3 }
 0x14c   :  { %v592_v37 = vadd.f32 %v591_v36, %v508_v25 }
 0x14e   :  { %v637_v39 = vmax.f32 %v592_v37, 0.0 }
 0x150   :  { %v656_v40 = vmul.f32 %v4598_v38, %v637_v39  ;;  %v611_v41 = vpop.f32.mrf.mxu0 }
 0x151   :  { %v612_v42 = vadd.f32 %v611_v41, %v508_v25  ;;  %v631_v44 = vpop.f32.mrf.mxu1 }
 0x152   :  { %v632_v45 = vadd.f32 %v631_v44, %v508_v25  ;;  %671 = vrot.lane.b32.xlu0 %v656_v40, %s4320_s29 }
 0x153   :  { %v638_v47 = vmax.f32 %v612_v42, 0.0 }
 0x154   :  { %v639_v48 = vmax.f32 %v632_v45, 0.0 }
 0x155   :  { %v657_v50 = vmul.f32 %v4601_v43, %v638_v47 }
 0x156   :  { %v658_v51 = vmul.f32 %v4603_v46, %v639_v48 }
 0x157   :  { %673 = vrot.lane.b32.xlu1 %v657_v50, %s4320_s29 }
 0x158   :  { %675 = vrot.lane.b32.xlu2 %v658_v51, %s4320_s29 }
 0x187   :  { %v670_v54 = vpop.permute.xlu2 %669 }
 0x1b2   :  { %v676_v55 = vpop.permute.xlu2 %675 }
 0x1b3   :  { %697 = vst.msk [vmem:[#allocation2 + $0x30] sm:$0xff] %vm677_vm10, %v676_v55 }
 0x1b7   :  { %v666_v56 = vpop.permute.xlu0 %665  ;;  %v668_v57 = vpop.permute.xlu1 %667 }
 0x1b8   :  { %691 = vst.msk [vmem:[#allocation2] sm:$0xff] %vm690_vm11, %v666_v56  ;;  %v4613_v58 = vsel %vm677_vm10, %v666_v56, %v668_v57  ;;  %v4641_v49 = vsel %vm677_vm10, %v668_v57, %v670_v54 }
 0x1ba   :  { %v4626_v4 = vld [vmem:[#allocation2 + $0x30] sm:$0xff] }
 0x1bf   :  { %v4615_v60 = vld [vmem:[#allocation2] sm:$0xff] }
 0x1c0   :  { %v3746_v3 = vpack.i.bf16 %v4613_v58, %v4615_v60 }
 0x1c2   :  { %3747 = vrot.lane.b32.xlu0 %v3746_v3, %s4311_s18  ;;  %3752 = vrot.lane.b32.xlu1 %v3746_v3, %s4314_s20 }
 0x1c3   :  { %3762 = vrot.lane.b32.xlu2 %v3746_v3, %s4313_s0 }
 0x1c4   :  { %v672_v63 = vpop.permute.xlu0 %671 }
 0x1c5   :  { %v4657_v61 = vsel %vm677_vm10, %v670_v54, %v672_v63  ;;  %v4728_v54 = vld [vmem:[%s5660_s4] sm:$0xff] }
 0x1c9   :  { %v674_v62 = vpop.permute.xlu1 %673 }
 0x1ca   :  { %3757 = vrot.lane.b32.xlu0 %v3746_v3, %s4312_s19  ;;  %3767 = vrot.lane.b32.xlu1 %v3746_v3, %s4315_s21  ;;  %v4638_v2 = vsel %vm677_vm10, %v672_v63, %v674_v62  ;;  %v4654_v59 = vsel %vm677_vm10, %v674_v62, %v676_v55 }
 0x1cb   :  { %3777 = vrot.lane.b32.xlu2 %v3746_v3, %s4317_s23  ;;  %v3786_v52 = vpack.i.bf16 %v4638_v2, %v4641_v49  ;;  %v3806_v5 = vpack.i.bf16 %v4657_v61, %v4654_v59 }
 0x1d2   :  { %3772 = vrot.lane.b32.xlu1 %v3746_v3, %s4316_s22  ;;  %3782 = vrot.lane.b32.xlu0 %v3746_v3, %s4318_s24 }
 0x1d3   :  { %1012 = vrot.lane.b32.xlu2 %v4626_v4, %s4314_s20 }
 0x1da   :  { %1058 = vrot.lane.b32.xlu1 %v4626_v4, %s4311_s18  ;;  %966 = vrot.lane.b32.xlu0 %v4626_v4, %s4312_s19 }
 0x1db   :  { %874 = vrot.lane.b32.xlu2 %v4626_v4, %s4315_s21 }
 0x1e2   :  { %828 = vrot.lane.b32.xlu1 %v4626_v4, %s4316_s22  ;;  %920 = vrot.lane.b32.xlu0 %v4626_v4, %s4313_s0 }
 0x1e3   :  { %3787 = vrot.lane.b32.xlu2 %v3786_v52, %s4311_s18 }
 0x1ea   :  { %3792 = vrot.lane.b32.xlu1 %v3786_v52, %s4314_s20  ;;  %3797 = vrot.lane.b32.xlu0 %v3786_v52, %s4312_s19 }
 0x1eb   :  { %3802 = vrot.lane.b32.xlu2 %v3786_v52, %s4313_s0 }
 0x1f2   :  { %3807 = vrot.lane.b32.xlu0 %v3806_v5, %s4311_s18  ;;  %3827 = vrot.lane.b32.xlu1 %v3806_v5, %s4312_s19 }
 0x1f3   :  { %3812 = vrot.lane.b32.xlu2 %v3786_v52, %s4315_s21 }
 0x1fa   :  { %3817 = vrot.lane.b32.xlu0 %v3806_v5, %s4314_s20  ;;  %3832 = vrot.lane.b32.xlu1 %v3786_v52, %s4317_s23 }
 0x1fb   :  { %3837 = vrot.lane.b32.xlu2 %v3806_v5, %s4313_s0 }
 0x202   :  { %3822 = vrot.lane.b32.xlu0 %v3786_v52, %s4316_s22  ;;  %3842 = vrot.lane.b32.xlu1 %v3786_v52, %s4318_s24 }
 0x203   :  { %3847 = vrot.lane.b32.xlu2 %v3806_v5, %s4315_s21 }
 0x20a   :  { %3852 = vrot.lane.b32.xlu1 %v3806_v5, %s4316_s22  ;;  %3857 = vrot.lane.b32.xlu0 %v3806_v5, %s4317_s23 }
 0x20b   :  { %3862 = vrot.lane.b32.xlu2 %v3806_v5, %s4318_s24 }
 0x212   :  { %736 = vrot.lane.b32.xlu1 %v4626_v4, %s4318_s24  ;;  %782 = vrot.lane.b32.xlu0 %v4626_v4, %s4317_s23 }
 0x213   :  { %1136 = vperm.xlu2 %3745, %v1133_v8  }
 0x21b   :  { %1317 = vperm.xlu2 %3745, %v51_v9  }
 0x21d   :  { %v4683_v10 = vpop.permute.xlu2 %3762 }
 0x21e   :  { %v3765_v27 = vunpack.i.h.bf16 %v4683_v10  ;;  %v3764_v28 = vunpack.i.l.bf16 %v4683_v10 }
 0x220   :  { %v922_v34 = vsel %vm289_vm3, %v3764_v28, %v3765_v27 }
 0x223   :  { %1328 = vperm.xlu2 %3745, %v52_v12  }
 0x225   :  { %v4688_v13 = vpop.permute.xlu2 %3777 }
 0x226   :  { %v3780_v39 = vunpack.i.h.bf16 %v4688_v13  ;;  %v3779_v40 = vunpack.i.l.bf16 %v4688_v13 }
 0x228   :  { %v784_v48 = vsel %vm148_vm6, %v3779_v40, %v3780_v39 }
 0x22d   :  { %v4690_v1 = vpop.permute.xlu2 %1012 }
 0x234   :  { %v3753_v14 = vpop.permute.xlu1 %3752  ;;  %v3748_v16 = vpop.permute.xlu0 %3747 }
 0x235   :  { %v3755_v17 = vunpack.i.h.bf16 %v3753_v14  ;;  %v3754_v18 = vunpack.i.l.bf16 %v3753_v14  ;;  %v4692_v19 = vpop.permute.xlu2 %874  ;;  %v3750_v21 = vunpack.i.h.bf16 %v3748_v16  ;;  %v3749_v24 = vunpack.i.l.bf16 %v3748_v16 }
 0x237   :  { %v1060_v15 = vsel %vm430_vm0, %v3749_v24, %v3750_v21  ;;  %v1014_v22 = vsel %vm383_vm1, %v3754_v18, %v3755_v17 }
 0x238   :  { %1149 = vmatpush.msrb.mxu2 %v1060_v15 }
 0x23a   :  { %1150 = vmatpush.msrb.mxu2 %v1014_v22 }
 0x23c   :  { %v3768_v25 = vpop.permute.xlu1 %3767  ;;  %v3758_v26 = vpop.permute.xlu0 %3757 }
 0x23d   :  { %v3788_v30 = vpop.permute.xlu2 %3787  ;;  %v3760_v6 = vunpack.i.h.bf16 %v3758_v26  ;;  %v3759_v7 = vunpack.i.l.bf16 %v3758_v26  ;;  %v3770_v31 = vunpack.i.h.bf16 %v3768_v25  ;;  %v3769_v23 = vunpack.i.l.bf16 %v3768_v25 }
 0x23e   :  { %v3789_v0 = vunpack.i.l.bf16 %v3788_v30  ;;  %v3790_v24 = vunpack.i.h.bf16 %v3788_v30 }
 0x23f   :  { %v968_v11 = vsel %vm336_vm2, %v3759_v7, %v3760_v6  ;;  %v876_v35 = vsel %vm242_vm4, %v3769_v23, %v3770_v31 }
 0x240   :  { %1151 = vmatpush.msrb.mxu2 %v968_v11  ;;  %v1061_v20 = vsel %vm430_vm0, %v3750_v21, %v3789_v0 }
 0x241   :  { %1169 = vmatpush.msrb.mxu3 %v1061_v20 }
 0x242   :  { %1152 = vmatpush.msrb.mxu2 %v922_v34 }
 0x244   :  { %v4702_v36 = vpop.permute.xlu1 %3772  ;;  %v4704_v37 = vpop.permute.xlu0 %3782  ;;  %1153 = vmatpush.msrb.mxu2 %v876_v35 }
 0x245   :  { %v3775_v41 = vunpack.i.h.bf16 %v4702_v36  ;;  %v3774_v42 = vunpack.i.l.bf16 %v4702_v36  ;;  %v3785_v44 = vunpack.i.h.bf16 %v4704_v37  ;;  %v3784_v45 = vunpack.i.l.bf16 %v4704_v37  ;;  %v4731_v55 = vpop.permute.xlu2 %3802 }
 0x246   :  { %v3804_v8 = vunpack.i.l.bf16 %v4731_v55 }
 0x247   :  { %v830_v47 = vsel %vm195_vm5, %v3774_v42, %v3775_v41  ;;  %v738_v50 = vsel %vm101_vm7, %v3784_v45, %v3785_v44 }
 0x248   :  { %1154 = vmatpush.msrb.mxu2 %v830_v47  ;;  %v923_v16 = vsel %vm289_vm3, %v3765_v27, %v3804_v8  ;;  %v3805_v47 = vunpack.i.h.bf16 %v4731_v55 }
 0x24a   :  { %1155 = vmatpush.msrb.mxu2 %v784_v48 }
 0x24c   :  { %v4721_v51 = vpop.permute.xlu1 %1058  ;;  %v4723_v53 = vpop.permute.xlu0 %966  ;;  %1156 = vmatpush.msrb.mxu2 %v738_v50 }
 0x24d   :  { %v4739_v3 = vpop.permute.xlu2 %3812 }
 0x24e   :  { %1157 = vmatpush.msrb.mxu2 %v4615_v60  ;;  %v3814_v10 = vunpack.i.l.bf16 %v4739_v3 }
 0x24f   :  { %3582 = vmatmul.msk.f32.vlgmr.msrb.gmra.mxu2 %vm510_vm8, %v4728_v54 }
 0x250   :  { %v877_v22 = vsel %vm242_vm4, %v3770_v31, %v3814_v10 }
 0x254   :  { %v4735_v56 = vpop.permute.xlu1 %828  ;;  %v4737_v57 = vpop.permute.xlu0 %920 }
 0x255   :  { %v4745_v14 = vpop.permute.xlu2 %3837 }
 0x256   :  { %v3840_v23 = vunpack.i.h.bf16 %v4745_v14  ;;  %v3839_v45 = vunpack.i.l.bf16 %v4745_v14 }
 0x258   :  { %v924_v55 = vsel %vm289_vm3, %v3804_v8, %v3840_v23 }
 0x25c   :  { %v3793_v62 = vpop.permute.xlu1 %3792  ;;  %v3798_v63 = vpop.permute.xlu0 %3797 }
 0x25d   :  { %v3794_v52 = vunpack.i.l.bf16 %v3793_v62  ;;  %v3799_v5 = vunpack.i.l.bf16 %v3798_v63  ;;  %v4768_v11 = vpop.permute.xlu2 %3847  ;;  %v3800_v34 = vunpack.i.h.bf16 %v3798_v63 }
 0x25e   :  { %v3850_v48 = vunpack.i.h.bf16 %v4768_v11  ;;  %v3849_v63 = vunpack.i.l.bf16 %v4768_v11 }
 0x25f   :  { %v1015_v9 = vsel %vm383_vm1, %v3755_v17, %v3794_v52  ;;  %v969_v12 = vsel %vm336_vm2, %v3760_v6, %v3799_v5  ;;  %v3795_v6 = vunpack.i.h.bf16 %v3793_v62 }
 0x260   :  { %1170 = vmatpush.msrb.mxu3 %v1015_v9  ;;  %v3815_v9 = vunpack.i.h.bf16 %v4739_v3 }
 0x262   :  { %1171 = vmatpush.msrb.mxu3 %v969_v12  ;;  %v925_v12 = vsel %vm289_vm3, %v3840_v23, %v3805_v47  ;;  %v879_v3 = vsel %vm242_vm4, %v3850_v48, %v3815_v9  ;;  %v880_v8 = vsel %vm242_vm4, %v3815_v9, %v3849_v63 }
 0x264   :  { %v4748_v18 = vpop.permute.xlu1 %3827  ;;  %v4750_v21 = vpop.permute.xlu0 %3807  ;;  %1172 = vmatpush.msrb.mxu3 %v923_v16 }
 0x265   :  { %v3810_v15 = vunpack.i.h.bf16 %v4750_v21  ;;  %v3809_v17 = vunpack.i.l.bf16 %v4750_v21  ;;  %v3830_v7 = vunpack.i.h.bf16 %v4748_v18  ;;  %v3829_v20 = vunpack.i.l.bf16 %v4748_v18  ;;  %v3863_v36 = vpop.permute.xlu2 %3862 }
 0x266   :  { %1173 = vmatpush.msrb.mxu3 %v877_v22 }
 0x267   :  { %v1062_v25 = vsel %vm430_vm0, %v3789_v0, %v3810_v15  ;;  %v1063_v26 = vsel %vm430_vm0, %v3810_v15, %v3790_v24  ;;  %v1064_v27 = vsel %vm430_vm0, %v3790_v24, %v3809_v17  ;;  %v970_v50 = vsel %vm336_vm2, %v3799_v5, %v3830_v7 }
 0x268   :  { %1189 = vmatpush.msra.mxu0 %v1062_v25  ;;  %1209 = vmatpush.msra.mxu1 %v1063_v26  ;;  %v971_v62 = vsel %vm336_vm2, %v3830_v7, %v3800_v34  ;;  %v926_v5 = vsel %vm289_vm3, %v3805_v47, %v3839_v45  ;;  %v878_v25 = vsel %vm242_vm4, %v3814_v10, %v3850_v48  ;;  %v3865_v48 = vunpack.i.h.bf16 %v3863_v36 }
 0x269   :  { %1229 = vmatpush.msra.mxu2 %v1064_v27  ;;  %v1065_v13 = vsel %vm430_vm0, %v3809_v17, %v4721_v51  ;;  %v3864_v17 = vunpack.i.l.bf16 %v3863_v36 }
 0x26c   :  { %v4760_v28 = vpop.permute.xlu1 %3832  ;;  %v4762_v30 = vpop.permute.xlu0 %3817 }
 0x26d   :  { %v3820_v31 = vunpack.i.h.bf16 %v4762_v30  ;;  %v3819_v0 = vunpack.i.l.bf16 %v4762_v30  ;;  %v3834_v15 = vunpack.i.l.bf16 %v4760_v28  ;;  %v1137_v11 = vpop.permute.xlu2 %1136 }
 0x26f   :  { %v1016_v35 = vsel %vm383_vm1, %v3794_v52, %v3820_v31  ;;  %v1017_v40 = vsel %vm383_vm1, %v3820_v31, %v3795_v6  ;;  %v1018_v42 = vsel %vm383_vm1, %v3795_v6, %v3819_v0  ;;  %v972_v52 = vsel %vm336_vm2, %v3800_v34, %v3829_v20 }
 0x270   :  { %1190 = vmatpush.msra.mxu0 %v1016_v35  ;;  %1210 = vmatpush.msra.mxu1 %v1017_v40  ;;  %v785_v6 = vsel %vm148_vm6, %v3780_v39, %v3834_v15  ;;  %v1019_v21 = vsel %vm383_vm1, %v3819_v0, %v4690_v1 }
 0x271   :  { %1230 = vmatpush.msra.mxu2 %v1018_v42 }
 0x272   :  { %1191 = vmatpush.msra.mxu0 %v970_v50  ;;  %1211 = vmatpush.msra.mxu1 %v971_v62  ;;  %v973_v62 = vsel %vm336_vm2, %v3829_v20, %v4723_v53  ;;  %v881_v53 = vsel %vm242_vm4, %v3849_v63, %v4692_v19 }
 0x273   :  { %1231 = vmatpush.msra.mxu2 %v972_v52  ;;  %v927_v52 = vsel %vm289_vm3, %v3839_v45, %v4737_v57 }
 0x274   :  { %v3843_v16 = vpop.permute.xlu1 %3842  ;;  %v3823_v24 = vpop.permute.xlu0 %3822  ;;  %1192 = vmatpush.msra.mxu0 %v924_v55  ;;  %1212 = vmatpush.msra.mxu1 %v925_v12 }
 0x275   :  { %v3824_v22 = vunpack.i.l.bf16 %v3823_v24  ;;  %1232 = vmatpush.msra.mxu2 %v926_v5  ;;  %v3844_v26 = vunpack.i.l.bf16 %v3843_v16  ;;  %v3825_v23 = vunpack.i.h.bf16 %v3823_v24  ;;  %v3845_v47 = vunpack.i.h.bf16 %v3843_v16 }
 0x276   :  { %1193 = vmatpush.msra.mxu0 %v878_v25  ;;  %1213 = vmatpush.msra.mxu1 %v879_v3 }
 0x277   :  { %1233 = vmatpush.msra.mxu2 %v880_v8  ;;  %v831_v27 = vsel %vm195_vm5, %v3775_v41, %v3824_v22  ;;  %v739_v10 = vsel %vm101_vm7, %v3785_v44, %v3844_v26  ;;  %v3835_v44 = vunpack.i.h.bf16 %v4760_v28  ;;  %v740_v30 = vsel %vm101_vm7, %v3844_v26, %v3865_v48 }
 0x278   :  { %1174 = vmatpush.msrb.mxu3 %v831_v27  ;;  %v741_v1 = vsel %vm101_vm7, %v3865_v48, %v3845_v47  ;;  %v742_v0 = vsel %vm101_vm7, %v3845_v47, %v3864_v17 }
 0x27a   :  { %1175 = vmatpush.msrb.mxu3 %v785_v6 }
 0x27c   :  { %v3853_v7 = vpop.permute.xlu1 %3852  ;;  %v3858_v31 = vpop.permute.xlu0 %3857  ;;  %1176 = vmatpush.msrb.mxu3 %v739_v10 }
 0x27d   :  { %v3855_v34 = vunpack.i.h.bf16 %v3853_v7  ;;  %v3854_v35 = vunpack.i.l.bf16 %v3853_v7  ;;  %v3860_v40 = vunpack.i.h.bf16 %v3858_v31  ;;  %v3859_v42 = vunpack.i.l.bf16 %v3858_v31 }
 0x27e   :  { %1177 = vmatpush.msrb.mxu3 %v4613_v58 }
 0x27f   :  { %3583 = vmatmul.msk.f32.vlgmr.msrb.gmra.mxu3 %vm510_vm8, %v4728_v54  ;;  %v832_v37 = vsel %vm195_vm5, %v3824_v22, %v3855_v34  ;;  %v833_v39 = vsel %vm195_vm5, %v3855_v34, %v3825_v23  ;;  %v834_v41 = vsel %vm195_vm5, %v3825_v23, %v3854_v35  ;;  %v786_v51 = vsel %vm148_vm6, %v3834_v15, %v3860_v40 }
 0x280   :  { %1249 = vmatpush.msra.mxu3 %v1065_v13  ;;  %1194 = vmatpush.msra.mxu0 %v832_v37  ;;  %v787_v50 = vsel %vm148_vm6, %v3860_v40, %v3835_v44  ;;  %v788_v28 = vsel %vm148_vm6, %v3835_v44, %v3859_v42  ;;  %v835_v57 = vsel %vm195_vm5, %v3854_v35, %v4735_v56 }
 0x281   :  { %1214 = vmatpush.msra.mxu1 %v833_v39  ;;  %1234 = vmatpush.msra.mxu2 %v834_v41 }
 0x282   :  { %1250 = vmatpush.msra.mxu3 %v1019_v21  ;;  %1195 = vmatpush.msra.mxu0 %v786_v51 }
 0x283   :  { %1215 = vmatpush.msra.mxu1 %v787_v50  ;;  %1235 = vmatpush.msra.mxu2 %v788_v28 }
 0x284   :  { %1251 = vmatpush.msra.mxu3 %v973_v62  ;;  %1196 = vmatpush.msra.mxu0 %v740_v30  ;;  %v783_v14 = vpop.permute.xlu0 %782  ;;  %v737_v18 = vpop.permute.xlu1 %736 }
 0x285   :  { %1216 = vmatpush.msra.mxu1 %v741_v1  ;;  %1236 = vmatpush.msra.mxu2 %v742_v0  ;;  %v789_v20 = vsel %vm148_vm6, %v3859_v42, %v783_v14  ;;  %v743_v45 = vsel %vm101_vm7, %v3864_v17, %v737_v18 }
 0x286   :  { %1252 = vmatpush.msra.mxu3 %v927_v52  ;;  %1197 = vmatpush.msra.mxu0 %v4641_v49 }
 0x287   :  { %1217 = vmatpush.msra.mxu1 %v4657_v61  ;;  %1237 = vmatpush.msra.mxu2 %v4638_v2 }
 0x288   :  { %3584 = vmatmul.msk.f32.vlgmr.msra.gmra.mxu0 %vm510_vm8, %v4728_v54  ;;  %3585 = vmatmul.msk.f32.vlgmr.msra.gmra.mxu1 %vm510_vm8, %v4728_v54 }
 0x289   :  { %3586 = vmatmul.msk.f32.vlgmr.msra.gmra.mxu2 %vm510_vm8, %v4728_v54  ;;  %1253 = vmatpush.msra.mxu3 %v881_v53  ;;  %v4869_v53 = vpop.permute.xlu2 %1317 }
 0x28b   :  { %1254 = vmatpush.msra.mxu3 %v835_v57 }
 0x28d   :  { %1255 = vmatpush.msra.mxu3 %v789_v20 }
 0x28f   :  { %1256 = vmatpush.msra.mxu3 %v743_v45 }
 0x291   :  { %1257 = vmatpush.msra.mxu3 %v4654_v59 }
 0x292   :  { %3587 = vmatmul.msk.f32.vlgmr.msra.gmra.mxu3 %vm510_vm8, %v4728_v54 }
 0x2d2   :  { %v1159_v63 = vpop.f32.mrf.mxu2 }
 0x2d3   :  { %v4855_v12 = vadd.f32 %v1159_v63, %v1137_v11 }
 0x2d5   :  { %v1262_v24 = vmul.f32 %v4855_v12, %v4590_v32 }
 0x2d7   :  { %v1275_v54 = vmul.f32 %v1262_v24, %v4855_v12 }
 0x302   :  { %v1179_v19 = vpop.f32.mrf.mxu3 }
 0x303   :  { %v1180_v9 = vadd.f32 %v1179_v19, %v1137_v11 }
 0x305   :  { %v1199_v55 = vpop.f32.mrf.mxu0  ;;  %v1263_v56 = vmul.f32 %v1180_v9, %v4592_v33  ;;  %v1219_v5 = vpop.f32.mrf.mxu1 }
 0x306   :  { %v1200_v16 = vadd.f32 %v1199_v55, %v1137_v11  ;;  %v4862_v8 = vadd.f32 %v1219_v5, %v1137_v11 }
 0x307   :  { %v1276_v15 = vmul.f32 %v1263_v56, %v1180_v9  ;;  %v1268_v3 = vadd.f32 %v1263_v56, %v1262_v24 }
 0x308   :  { %v1264_v22 = vmul.f32 %v1200_v16, %v4586_v29  ;;  %v1265_v7 = vmul.f32 %v4862_v8, %v4598_v38 }
 0x309   :  { %v1281_v27 = vadd.f32 %v1276_v15, %v1275_v54  ;;  %v4874_v54 = vpop.permute.xlu2 %1328 }
 0x30a   :  { %v1277_v6 = vmul.f32 %v1264_v22, %v1200_v16  ;;  %v1269_v10 = vadd.f32 %v1268_v3, %v1264_v22  ;;  %v1278_v35 = vmul.f32 %v1265_v7, %v4862_v8 }
 0x30c   :  { %v1239_v25 = vpop.f32.mrf.mxu2  ;;  %v1282_v23 = vadd.f32 %v1281_v27, %v1277_v6  ;;  %v1270_v42 = vadd.f32 %v1269_v10, %v1265_v7 }
 0x30d   :  { %v1240_v26 = vadd.f32 %v1239_v25, %v1137_v11 }
 0x30e   :  { %v1283_v39 = vadd.f32 %v1282_v23, %v1278_v35 }
 0x30f   :  { %v1266_v31 = vmul.f32 %v1240_v26, %v4601_v43 }
 0x311   :  { %v1279_v40 = vmul.f32 %v1266_v31, %v1240_v26  ;;  %v1271_v37 = vadd.f32 %v1270_v42, %v1266_v31 }
 0x313   :  { %v1284_v47 = vadd.f32 %v1283_v39, %v1279_v40 }
 0x315   :  { %v1259_v34 = vpop.f32.mrf.mxu3 }
 0x316   :  { %v1260_v36 = vadd.f32 %v1259_v34, %v1137_v11 }
 0x318   :  { %v1267_v13 = vmul.f32 %v1260_v36, %v4603_v46 }
 0x31a   :  { %v1272_v41 = vadd.f32 %v1271_v37, %v1267_v13  ;;  %v1280_v44 = vmul.f32 %v1267_v13, %v1260_v36 }
 0x31c   :  { %1273 = vadd.xlane.f32.xlu0 %v1272_v41  ;;  %v1285_v48 = vadd.f32 %v1284_v47, %v1280_v44 }
 0x31e   :  { %1286 = vadd.xlane.f32.xlu1 %v1285_v48 }
 0x38f   :  { %v1274_v21 = vpop.xlane.xlu0 %1273 }
 0x390   :  { %v1288_v51 = vmul.f32 0.001953125, %v1274_v21 }
 0x391   :  { %v1287_v17 = vpop.xlane.xlu1 %1286 }
 0x392   :  { %v1289_v50 = vmul.f32 0.001953125, %v1287_v17  ;;  %v1290_v28 = vmul.f32 %v1288_v51, %v1288_v51  ;;  %v1297_v20 = vsub.f32 %v1260_v36, %v1288_v51  ;;  %v1296_v45 = vsub.f32 %v1240_v26, %v1288_v51 }
 0x393   :  { %v1293_v19 = vsub.f32 %v1180_v9, %v1288_v51  ;;  %v1294_v63 = vsub.f32 %v1200_v16, %v1288_v51  ;;  %v1295_v7 = vsub.f32 %v4862_v8, %v1288_v51  ;;  %v1292_v8 = vsub.f32 %v4855_v12, %v1288_v51 }
 0x394   :  { %v1291_v62 = vsub.f32 %v1289_v50, %v1290_v28 }
 0x396   :  { %v1298_v30 = vadd.f32 1e-05, %v1291_v62 }
 0x398   :  { %4228 = vrsqrt.f32 %v1298_v30  ;;  %vm1305_vm13 = vweird.f32 %v1298_v30 }
 0x39e   :  { %v4229_v1 = vpop.eup %4228 }
 0x39f   :  { %v1300_v0 = vmul.f32 %v4229_v1, %v1298_v30  ;;  %vm1306_vm12 = vweird.f32 %v4229_v1 }
 0x3a0   :  { %vm1307_vm14 = vmor %vm1305_vm13, %vm1306_vm12 }
 0x3a1   :  { %v1301_v52 = vmul.f32 %v4229_v1, %v1300_v0 }
 0x3a3   :  { %v1302_v14 = vmul.f32 0.5, %v1301_v52 }
 0x3a5   :  { %v1303_v57 = vsub.f32 1.5, %v1302_v14 }
 0x3a7   :  { %v1304_v18 = vmul.f32 %v4229_v1, %v1303_v57 }
 0x3a9   :  { %v1308_v11 = vsel %vm1307_vm14, %v4229_v1, %v1304_v18 }
 0x3aa   :  { %v1314_v55 = vmul.f32 %v1308_v11, %v1297_v20  ;;  %v1313_v56 = vmul.f32 %v1308_v11, %v1296_v45  ;;  %v1310_v24 = vmul.f32 %v1308_v11, %v1293_v19  ;;  %v1311_v5 = vmul.f32 %v1308_v11, %v1294_v63 }
 0x3ab   :  { %v1312_v40 = vmul.f32 %v1308_v11, %v1295_v7  ;;  %v1309_v39 = vmul.f32 %v1308_v11, %v1292_v8 }
 0x3ac   :  { %v1325_v15 = vmul.f32 %v4869_v53, %v1314_v55  ;;  %v1324_v22 = vmul.f32 %v4869_v53, %v1313_v56  ;;  %v1321_v25 = vmul.f32 %v4869_v53, %v1310_v24  ;;  %v1322_v16 = vmul.f32 %v4869_v53, %v1311_v5 }
 0x3ad   :  { %v1323_v42 = vmul.f32 %v4869_v53, %v1312_v40  ;;  %v1320_v44 = vmul.f32 %v4869_v53, %v1309_v39 }
 0x3ae   :  { %v1336_v3 = vadd.f32 %v4874_v54, %v1325_v15  ;;  %v1335_v27 = vadd.f32 %v4874_v54, %v1324_v22  ;;  %v1332_v9 = vadd.f32 %v4874_v54, %v1321_v25  ;;  %v1333_v35 = vadd.f32 %v4874_v54, %v1322_v16 }
 0x3af   :  { %v1334_v37 = vadd.f32 %v4874_v54, %v1323_v42  ;;  %v1331_v48 = vadd.f32 %v4874_v54, %v1320_v44 }
 0x3b0   :  { %v1349_v26 = vmax.f32 %v1336_v3, 0.0  ;;  %v1348_v6 = vmax.f32 %v1335_v27, 0.0  ;;  %v1345_v10 = vmax.f32 %v1332_v9, 0.0  ;;  %v1346_v36 = vmax.f32 %v1333_v35, 0.0 }
 0x3b1   :  { %v1347_v41 = vmax.f32 %v1334_v37, 0.0  ;;  %v1344_v21 = vmax.f32 %v1331_v48, 0.0 }
 0x3b2   :  { %v1355_v31 = vmul.f32 %v1349_v26, %v4603_v46  ;;  %v1354_v23 = vmul.f32 %v1348_v6, %v4601_v43  ;;  %v1351_v34 = vmul.f32 %v1345_v10, %v4592_v33  ;;  %v1352_v13 = vmul.f32 %v1346_v36, %v4586_v29 }
 0x3b3   :  { %v1353_v47 = vmul.f32 %v1347_v41, %v4598_v38  ;;  %v1350_v17 = vmul.f32 %v1344_v21, %v4590_v32 }
 0x3b4   :  { %1372 = vrot.lane.b32.xlu1 %v1355_v31, %s4320_s29  ;;  %1370 = vrot.lane.b32.xlu0 %v1354_v23, %s4320_s29 }
 0x3b5   :  { %1364 = vrot.lane.b32.xlu2 %v1351_v34, %s4320_s29 }
 0x3bd   :  { %1366 = vrot.lane.b32.xlu2 %v1352_v13, %s4320_s29 }
 0x3c5   :  { %1368 = vrot.lane.b32.xlu2 %v1353_v47, %s4320_s29 }
 0x3cd   :  { %1362 = vrot.lane.b32.xlu2 %v1350_v17, %s4320_s29 }
 0x40f   :  { %v1365_v12 = vpop.permute.xlu2 %1364 }
 0x417   :  { %v1367_v51 = vpop.permute.xlu2 %1366 }
 0x41f   :  { %v1369_v50 = vpop.permute.xlu2 %1368 }
 0x420   :  { %v1376_v52 = vsel %vm677_vm10, %v1367_v51, %v1369_v50 }
 0x426   :  { %v1373_v28 = vpop.permute.xlu1 %1372 }
 0x427   :  { %v1392_v62 = vadd.f32 %v1373_v28, %v4626_v4  ;;  %v1363_v30 = vpop.permute.xlu2 %1362  ;;  %v1375_v4 = vsel %vm677_vm10, %v1365_v12, %v1367_v51 }
 0x428   :  { %v1386_v1 = vadd.f32 %v1363_v30, %v4615_v60  ;;  %v4914_v60 = vadd.f32 %v1376_v52, %v4657_v61  ;;  %v4917_v14 = vadd.f32 %v1375_v4, %v4641_v49  ;;  %v1374_v18 = vsel %vm677_vm10, %v1363_v30, %v1365_v12  ;;  %v1371_v49 = vpop.permute.xlu0 %1370 }
 0x429   :  { %1399 = vst.msk [vmem:[#allocation2 + $0x30] sm:$0xff] %vm677_vm10, %v1392_v62  ;;  %v4930_v61 = vadd.f32 %v1374_v18, %v4613_v58  ;;  %v1377_v19 = vsel %vm677_vm10, %v1369_v50, %v1371_v49  ;;  %v1378_v11 = vsel %vm677_vm10, %v1371_v49, %v1373_v28 }
 0x42a   :  { %1393 = vst.msk [vmem:[#allocation2] sm:$0xff] %vm690_vm11, %v1386_v1  ;;  %v3866_v57 = vpack.i.bf16 %v4914_v60, %v4917_v14  ;;  %v4940_v63 = vadd.f32 %v1377_v19, %v4638_v2  ;;  %v4943_v58 = vadd.f32 %v1378_v11, %v4654_v59 }
 0x42c   :  { %v3881_v55 = vpack.i.bf16 %v4943_v58, %v4940_v63 }
 0x430   :  { %v4903_v0 = vld [vmem:[#allocation2 + $0x30] sm:$0xff] }
 0x431   :  { %1760 = vrot.lane.b32.xlu1 %v4903_v0, %s4311_s18  ;;  %1714 = vrot.lane.b32.xlu0 %v4903_v0, %s4314_s20  ;;  %v4927_v20 = vld [vmem:[#allocation2] sm:$0xff]  ;;  %v3981_v2 = vpack.i.bf16 %v4903_v0, %v4943_v58 }
 0x432   :  { %1622 = vrot.lane.b32.xlu2 %v4903_v0, %s4313_s0  ;;  %v3876_v45 = vpack.i.bf16 %v4930_v61, %v4927_v20 }
 0x439   :  { %1576 = vrot.lane.b32.xlu1 %v4903_v0, %s4315_s21  ;;  %1668 = vrot.lane.b32.xlu0 %v4903_v0, %s4312_s19 }
 0x43a   :  { %3867 = vrot.lane.b32.xlu2 %v3866_v57, %s4311_s18 }
 0x441   :  { %3887 = vrot.lane.b32.xlu1 %v3866_v57, %s4312_s19  ;;  %3877 = vrot.lane.b32.xlu0 %v3876_v45, %s4311_s18 }
 0x442   :  { %3872 = vrot.lane.b32.xlu2 %v3866_v57, %s4314_s20 }
 0x449   :  { %3902 = vrot.lane.b32.xlu1 %v3866_v57, %s4313_s0  ;;  %3892 = vrot.lane.b32.xlu0 %v3876_v45, %s4314_s20 }
 0x44a   :  { %3882 = vrot.lane.b32.xlu2 %v3881_v55, %s4311_s18 }
 0x451   :  { %3917 = vrot.lane.b32.xlu1 %v3866_v57, %s4315_s21  ;;  %3907 = vrot.lane.b32.xlu0 %v3876_v45, %s4312_s19 }
 0x452   :  { %3897 = vrot.lane.b32.xlu2 %v3881_v55, %s4314_s20 }
 0x459   :  { %3932 = vrot.lane.b32.xlu1 %v3866_v57, %s4316_s22  ;;  %3922 = vrot.lane.b32.xlu0 %v3876_v45, %s4313_s0 }
 0x45a   :  { %3912 = vrot.lane.b32.xlu2 %v3881_v55, %s4312_s19 }
 0x461   :  { %3947 = vrot.lane.b32.xlu1 %v3866_v57, %s4317_s23  ;;  %3937 = vrot.lane.b32.xlu0 %v3876_v45, %s4315_s21 }
 0x462   :  { %3927 = vrot.lane.b32.xlu2 %v3881_v55, %s4313_s0 }
 0x469   :  { %3972 = vrot.lane.b32.xlu1 %v3881_v55, %s4317_s23  ;;  %3952 = vrot.lane.b32.xlu0 %v3876_v45, %s4316_s22 }
 0x46a   :  { %3942 = vrot.lane.b32.xlu2 %v3881_v55, %s4315_s21 }
 0x471   :  { %1434 = vrot.lane.b32.xlu1 %v4940_v63, %s4318_s24  ;;  %3962 = vrot.lane.b32.xlu0 %v3866_v57, %s4318_s24 }
 0x472   :  { %3957 = vrot.lane.b32.xlu2 %v3881_v55, %s4316_s22 }
 0x479   :  { %1484 = vrot.lane.b32.xlu1 %v4903_v0, %s4317_s23  ;;  %1530 = vrot.lane.b32.xlu0 %v4903_v0, %s4316_s22 }
 0x47a   :  { %3967 = vrot.lane.b32.xlu2 %v3876_v45, %s4317_s23 }
 0x482   :  { %3977 = vrot.lane.b32.xlu2 %v3876_v45, %s4318_s24 }
 0x48a   :  { %3982 = vrot.lane.b32.xlu2 %v3981_v2, %s4318_s24 }
 0x48c   :  { %v4975_v59 = vpop.permute.xlu2 %1622 }
 0x494   :  { %v3868_v56 = vpop.permute.xlu2 %3867 }
 0x495   :  { %v3870_v24 = vunpack.i.h.bf16 %v3868_v56  ;;  %v3869_v5 = vunpack.i.l.bf16 %v3868_v56 }
 0x497   :  { %v1764_v15 = vsel %vm430_vm0, %v3869_v5, %v3870_v24 }
 0x498   :  { %1891 = vmatpush.msrb.mxu2 %v1764_v15 }
 0x49c   :  { %v3873_v22 = vpop.permute.xlu2 %3872 }
 0x49d   :  { %v3875_v25 = vunpack.i.h.bf16 %v3873_v22  ;;  %v3874_v3 = vunpack.i.l.bf16 %v3873_v22 }
 0x49f   :  { %v1718_v27 = vsel %vm383_vm1, %v3874_v3, %v3875_v25 }
 0x4a0   :  { %1892 = vmatpush.msrb.mxu2 %v1718_v27 }
 0x4a3   :  { %v4979_v9 = vpop.permute.xlu1 %1760  ;;  %v4981_v16 = vpop.permute.xlu0 %1714 }
 0x4a4   :  { %v4983_v26 = vpop.permute.xlu2 %3882 }
 0x4a5   :  { %v3884_v6 = vunpack.i.l.bf16 %v4983_v26 }
 0x4a7   :  { %v1765_v10 = vsel %vm430_vm0, %v3870_v24, %v3884_v6 }
 0x4a8   :  { %1911 = vmatpush.msrb.mxu3 %v1765_v10 }
 0x4ab   :  { %v4989_v7 = vpop.permute.xlu1 %1576  ;;  %v4991_v31 = vpop.permute.xlu0 %1668 }
 0x4ac   :  { %v4993_v23 = vpop.permute.xlu2 %3897 }
 0x4ad   :  { %v3899_v34 = vunpack.i.l.bf16 %v4993_v23 }
 0x4af   :  { %v1719_v35 = vsel %vm383_vm1, %v3875_v25, %v3899_v34 }
 0x4b0   :  { %1912 = vmatpush.msrb.mxu3 %v1719_v35 }
 0x4b3   :  { %v3888_v40 = vpop.permute.xlu1 %3887  ;;  %v3878_v36 = vpop.permute.xlu0 %3877 }
 0x4b4   :  { %v3890_v42 = vunpack.i.h.bf16 %v3888_v40  ;;  %v3889_v8 = vunpack.i.l.bf16 %v3888_v40  ;;  %v3880_v13 = vunpack.i.h.bf16 %v3878_v36  ;;  %v3879_v37 = vunpack.i.l.bf16 %v3878_v36  ;;  %v4999_v39 = vpop.permute.xlu2 %3912 }
 0x4b5   :  { %v3914_v41 = vunpack.i.l.bf16 %v4999_v39 }
 0x4b6   :  { %v1762_v44 = vsel %vm430_vm0, %v3879_v37, %v3880_v13  ;;  %v1763_v47 = vsel %vm430_vm0, %v3880_v13, %v3869_v5  ;;  %v1672_v48 = vsel %vm336_vm2, %v3889_v8, %v3890_v42 }
 0x4b7   :  { %1851 = vmatpush.msrb.mxu0 %v1762_v44  ;;  %1871 = vmatpush.msrb.mxu1 %v1763_v47  ;;  %v1673_v21 = vsel %vm336_vm2, %v3890_v42, %v3914_v41 }
 0x4b8   :  { %1893 = vmatpush.msrb.mxu2 %v1672_v48  ;;  %1913 = vmatpush.msrb.mxu3 %v1673_v21 }
 0x4bb   :  { %v3903_v17 = vpop.permute.xlu1 %3902  ;;  %v3893_v12 = vpop.permute.xlu0 %3892 }
 0x4bc   :  { %v3905_v51 = vunpack.i.h.bf16 %v3903_v17  ;;  %v3904_v50 = vunpack.i.l.bf16 %v3903_v17  ;;  %v3895_v28 = vunpack.i.h.bf16 %v3893_v12  ;;  %v3894_v62 = vunpack.i.l.bf16 %v3893_v12  ;;  %v5008_v30 = vpop.permute.xlu2 %3927 }
 0x4bd   :  { %v3929_v1 = vunpack.i.l.bf16 %v5008_v30 }
 0x4be   :  { %v1716_v52 = vsel %vm383_vm1, %v3894_v62, %v3895_v28  ;;  %v1717_v4 = vsel %vm383_vm1, %v3895_v28, %v3874_v3  ;;  %v1626_v57 = vsel %vm289_vm3, %v3904_v50, %v3905_v51 }
 0x4bf   :  { %1852 = vmatpush.msrb.mxu0 %v1716_v52  ;;  %1872 = vmatpush.msrb.mxu1 %v1717_v4  ;;  %v1627_v18 = vsel %vm289_vm3, %v3905_v51, %v3929_v1 }
 0x4c0   :  { %1894 = vmatpush.msrb.mxu2 %v1626_v57  ;;  %1914 = vmatpush.msrb.mxu3 %v1627_v18  ;;  %v5041_v57 = vld [vmem:[%s5661_s5] sm:$0xff] }
 0x4c1   :  { %1838 = vperm.xlu0 %3986, %v5041_v57  }
 0x4c3   :  { %v3918_v49 = vpop.permute.xlu1 %3917  ;;  %v3908_v45 = vpop.permute.xlu0 %3907 }
 0x4c4   :  { %v3920_v19 = vunpack.i.h.bf16 %v3918_v49  ;;  %v3919_v11 = vunpack.i.l.bf16 %v3918_v49  ;;  %v3910_v55 = vunpack.i.h.bf16 %v3908_v45  ;;  %v3909_v2 = vunpack.i.l.bf16 %v3908_v45  ;;  %v5017_v56 = vpop.permute.xlu2 %3942 }
 0x4c5   :  { %v3944_v24 = vunpack.i.l.bf16 %v5017_v56 }
 0x4c6   :  { %v1670_v5 = vsel %vm336_vm2, %v3909_v2, %v3910_v55  ;;  %v1671_v15 = vsel %vm336_vm2, %v3910_v55, %v3889_v8  ;;  %v1580_v22 = vsel %vm242_vm4, %v3919_v11, %v3920_v19 }
 0x4c7   :  { %1853 = vmatpush.msrb.mxu0 %v1670_v5  ;;  %1873 = vmatpush.msrb.mxu1 %v1671_v15  ;;  %v1581_v25 = vsel %vm242_vm4, %v3920_v19, %v3944_v24 }
 0x4c8   :  { %1895 = vmatpush.msrb.mxu2 %v1580_v22  ;;  %1915 = vmatpush.msrb.mxu3 %v1581_v25 }
 0x4cb   :  { %v3933_v3 = vpop.permute.xlu1 %3932  ;;  %v3923_v27 = vpop.permute.xlu0 %3922 }
 0x4cc   :  { %v3935_v10 = vunpack.i.h.bf16 %v3933_v3  ;;  %v3934_v35 = vunpack.i.l.bf16 %v3933_v3  ;;  %v3925_v40 = vunpack.i.h.bf16 %v3923_v27  ;;  %v3924_v36 = vunpack.i.l.bf16 %v3923_v27  ;;  %v5026_v42 = vpop.permute.xlu2 %3957 }
 0x4cd   :  { %v3959_v8 = vunpack.i.l.bf16 %v5026_v42 }
 0x4ce   :  { %v1624_v13 = vsel %vm289_vm3, %v3924_v36, %v3925_v40  ;;  %v1625_v37 = vsel %vm289_vm3, %v3925_v40, %v3904_v50  ;;  %v1534_v44 = vsel %vm195_vm5, %v3934_v35, %v3935_v10  ;;  %v3885_v36 = vunpack.i.h.bf16 %v4983_v26  ;;  %v5071_v26 = vld [vmem:[%s5660_s4] sm:$0xff] }
 0x4cf   :  { %1854 = vmatpush.msrb.mxu0 %v1624_v13  ;;  %1874 = vmatpush.msrb.mxu1 %v1625_v37  ;;  %v1535_v47 = vsel %vm195_vm5, %v3935_v10, %v3959_v8  ;;  %v3900_v37 = vunpack.i.h.bf16 %v4993_v23 }
 0x4d0   :  { %1896 = vmatpush.msrb.mxu2 %v1534_v44  ;;  %1916 = vmatpush.msrb.mxu3 %v1535_v47 }
 0x4d3   :  { %v3948_v48 = vpop.permute.xlu1 %3947  ;;  %v3938_v21 = vpop.permute.xlu0 %3937 }
 0x4d4   :  { %v3950_v17 = vunpack.i.h.bf16 %v3948_v48  ;;  %v3949_v12 = vunpack.i.l.bf16 %v3948_v48  ;;  %v3940_v51 = vunpack.i.h.bf16 %v3938_v21  ;;  %v3939_v28 = vunpack.i.l.bf16 %v3938_v21  ;;  %v3968_v62 = vpop.permute.xlu2 %3967 }
 0x4d5   :  { %v3970_v18 = vunpack.i.h.bf16 %v3968_v62  ;;  %v3969_v19 = vunpack.i.l.bf16 %v3968_v62  ;;  %v1766_v21 = vsel %vm430_vm0, %v3884_v6, %v3885_v36  ;;  %v1720_v62 = vsel %vm383_vm1, %v3899_v34, %v3900_v37 }
 0x4d6   :  { %v1578_v52 = vsel %vm242_vm4, %v3939_v28, %v3940_v51  ;;  %v1579_v50 = vsel %vm242_vm4, %v3940_v51, %v3919_v11  ;;  %v1488_v4 = vsel %vm148_vm6, %v3949_v12, %v3950_v17  ;;  %v3930_v6 = vunpack.i.h.bf16 %v5008_v30 }
 0x4d7   :  { %1855 = vmatpush.msrb.mxu0 %v1578_v52  ;;  %1875 = vmatpush.msrb.mxu1 %v1579_v50  ;;  %v1486_v10 = vsel %vm148_vm6, %v3969_v19, %v3970_v18  ;;  %v1487_v40 = vsel %vm148_vm6, %v3970_v18, %v3949_v12  ;;  %v3945_v52 = vunpack.i.h.bf16 %v5017_v56  ;;  %v1767_v34 = vsel %vm430_vm0, %v3885_v36, %v4979_v9 }
 0x4d8   :  { %1897 = vmatpush.msrb.mxu2 %v1488_v4  ;;  %v3960_v50 = vunpack.i.h.bf16 %v5026_v42  ;;  %v1628_v4 = vsel %vm289_vm3, %v3929_v1, %v3930_v6  ;;  %v1721_v18 = vsel %vm383_vm1, %v3900_v37, %v4981_v16 }
 0x4da   :  { %v1536_v1 = vsel %vm195_vm5, %v3959_v8, %v3960_v50 }
 0x4db   :  { %v5044_v49 = vpop.permute.xlu1 %3972  ;;  %v3953_v45 = vpop.permute.xlu0 %3952 }
 0x4dc   :  { %v3974_v55 = vunpack.i.l.bf16 %v5044_v49  ;;  %v3955_v11 = vunpack.i.h.bf16 %v3953_v45  ;;  %v3954_v2 = vunpack.i.l.bf16 %v3953_v45  ;;  %v3978_v5 = vpop.permute.xlu2 %3977  ;;  %v3975_v9 = vunpack.i.h.bf16 %v5044_v49 }
 0x4dd   :  { %v3980_v15 = vunpack.i.h.bf16 %v3978_v5  ;;  %v3979_v22 = vunpack.i.l.bf16 %v3978_v5  ;;  %v1629_v45 = vsel %vm289_vm3, %v3930_v6, %v4975_v59 }
 0x4de   :  { %v1532_v25 = vsel %vm195_vm5, %v3954_v2, %v3955_v11  ;;  %v1533_v3 = vsel %vm195_vm5, %v3955_v11, %v3934_v35  ;;  %v1489_v27 = vsel %vm148_vm6, %v3950_v17, %v3974_v55  ;;  %v3915_v17 = vunpack.i.h.bf16 %v4999_v39 }
 0x4df   :  { %1856 = vmatpush.msrb.mxu0 %v1532_v25  ;;  %1876 = vmatpush.msrb.mxu1 %v1533_v3  ;;  %v1440_v13 = vsel %vm101_vm7, %v3979_v22, %v3980_v15  ;;  %v1490_v56 = vsel %vm148_vm6, %v3974_v55, %v3975_v9 }
 0x4e0   :  { %1917 = vmatpush.msrb.mxu3 %v1489_v27  ;;  %v1674_v23 = vsel %vm336_vm2, %v3914_v41, %v3915_v17  ;;  %v1582_v41 = vsel %vm242_vm4, %v3944_v24, %v3945_v52  ;;  %v1675_v30 = vsel %vm336_vm2, %v3915_v17, %v4991_v31  ;;  %v1583_v31 = vsel %vm242_vm4, %v3945_v52, %v4989_v7 }
 0x4e1   :  { %1857 = vmatpush.msrb.mxu0 %v1486_v10  ;;  %1877 = vmatpush.msrb.mxu1 %v1487_v40 }
 0x4e3   :  { %v3963_v35 = vpop.permute.xlu0 %3962  ;;  %1858 = vmatpush.msrb.mxu0 %v1440_v13  ;;  %v1435_v48 = vpop.permute.xlu1 %1434 }
 0x4e4   :  { %v3965_v44 = vunpack.i.h.bf16 %v3963_v35  ;;  %v3964_v47 = vunpack.i.l.bf16 %v3963_v35  ;;  %v3983_v39 = vpop.permute.xlu2 %3982 }
 0x4e5   :  { %1859 = vmatpush.msrb.mxu0 %v4927_v20  ;;  %v3984_v16 = vunpack.i.l.bf16 %v3983_v39  ;;  %v3985_v11 = vunpack.i.h.bf16 %v3983_v39 }
 0x4e6   :  { %v1441_v12 = vsel %vm101_vm7, %v3980_v15, %v3964_v47  ;;  %v1442_v51 = vsel %vm101_vm7, %v3964_v47, %v3965_v44  ;;  %v1443_v28 = vsel %vm101_vm7, %v3965_v44, %v1435_v48  ;;  %3588 = vmatmul.msk.f32.vlgmr.msrb.gmra.mxu0 %vm510_vm8, %v5071_v26 }
 0x4e7   :  { %1931 = vmatpush.msra.mxu0 %v1766_v21  ;;  %1878 = vmatpush.msrb.mxu1 %v1441_v12  ;;  %v1444_v42 = vsel %vm101_vm7, %v1435_v48, %v3984_v16  ;;  %v1445_v7 = vsel %vm101_vm7, %v3984_v16, %v3985_v11 }
 0x4e8   :  { %1898 = vmatpush.msrb.mxu2 %v1442_v51  ;;  %1918 = vmatpush.msrb.mxu3 %v1443_v28 }
 0x4e9   :  { %1932 = vmatpush.msra.mxu0 %v1720_v62  ;;  %1879 = vmatpush.msrb.mxu1 %v4930_v61 }
 0x4ea   :  { %1899 = vmatpush.msrb.mxu2 %v4917_v14  ;;  %1919 = vmatpush.msrb.mxu3 %v4914_v60 }
 0x4eb   :  { %3590 = vmatmul.msk.f32.vlgmr.msrb.gmra.mxu2 %vm510_vm8, %v5071_v26  ;;  %1933 = vmatpush.msra.mxu0 %v1674_v23  ;;  %v1531_v19 = vpop.permute.xlu0 %1530  ;;  %v1485_v24 = vpop.permute.xlu1 %1484 }
 0x4ec   :  { %1951 = vmatpush.msra.mxu1 %v1767_v34  ;;  %3591 = vmatmul.msk.f32.vlgmr.msrb.gmra.mxu3 %vm510_vm8, %v5071_v26  ;;  %v1537_v8 = vsel %vm195_vm5, %v3960_v50, %v1531_v19  ;;  %v1491_v59 = vsel %vm148_vm6, %v3975_v9, %v1485_v24 }
 0x4ed   :  { %1934 = vmatpush.msra.mxu0 %v1628_v4  ;;  %3589 = vmatmul.msk.f32.vlgmr.msrb.gmra.mxu1 %vm510_vm8, %v5071_v26 }
 0x4ee   :  { %1952 = vmatpush.msra.mxu1 %v1721_v18 }
 0x4ef   :  { %1935 = vmatpush.msra.mxu0 %v1582_v41 }
 0x4f0   :  { %1953 = vmatpush.msra.mxu1 %v1675_v30 }
 0x4f1   :  { %1936 = vmatpush.msra.mxu0 %v1536_v1 }
 0x4f2   :  { %1954 = vmatpush.msra.mxu1 %v1629_v45 }
 0x4f3   :  { %1937 = vmatpush.msra.mxu0 %v1490_v56 }
 0x4f4   :  { %1955 = vmatpush.msra.mxu1 %v1583_v31 }
 0x4f5   :  { %1938 = vmatpush.msra.mxu0 %v1444_v42 }
 0x4f6   :  { %1956 = vmatpush.msra.mxu1 %v1537_v8 }
 0x4f7   :  { %1939 = vmatpush.msra.mxu0 %v4940_v63 }
 0x4f8   :  { %1957 = vmatpush.msra.mxu1 %v1491_v59  ;;  %3592 = vmatmul.msk.f32.vlgmr.msra.gmra.mxu0 %vm510_vm8, %v5071_v26 }
 0x4fa   :  { %1958 = vmatpush.msra.mxu1 %v1445_v7 }
 0x4fc   :  { %1959 = vmatpush.msra.mxu1 %v4943_v58 }
 0x4fd   :  { %3593 = vmatmul.msk.f32.vlgmr.msra.gmra.mxu1 %vm510_vm8, %v5071_v26 }
 0x533   :  { %v1839_v49 = vpop.permute.xlu0 %1838 }
 0x563   :  { %v1861_v55 = vpop.f32.mrf.mxu0 }
 0x564   :  { %v1862_v2 = vadd.f32 %v1861_v55, %v1839_v49 }
 0x566   :  { %v1964_v15 = vmul.f32 %v1862_v2, %v4590_v32 }
 0x568   :  { %v1977_v40 = vmul.f32 %v1964_v15, %v1862_v2 }
 0x56a   :  { %v1881_v5 = vpop.f32.mrf.mxu1 }
 0x56b   :  { %v1882_v22 = vadd.f32 %v1881_v5, %v1839_v49 }
 0x56d   :  { %v1965_v3 = vmul.f32 %v1882_v22, %v4592_v33 }
 0x56e   :  { %v1901_v25 = vpop.f32.mrf.mxu2 }
 0x56f   :  { %v5125_v27 = vadd.f32 %v1901_v25, %v1839_v49  ;;  %v1921_v10 = vpop.f32.mrf.mxu3  ;;  %v1978_v36 = vmul.f32 %v1965_v3, %v1882_v22  ;;  %v1970_v35 = vadd.f32 %v1965_v3, %v1964_v15 }
 0x570   :  { %v5129_v37 = vadd.f32 %v1921_v10, %v1839_v49 }
 0x571   :  { %v1966_v13 = vmul.f32 %v5125_v27, %v4586_v29  ;;  %v1983_v44 = vadd.f32 %v1978_v36, %v1977_v40 }
 0x572   :  { %v1967_v48 = vmul.f32 %v5129_v37, %v4598_v38 }
 0x573   :  { %v1979_v47 = vmul.f32 %v1966_v13, %v5125_v27  ;;  %v1971_v17 = vadd.f32 %v1970_v35, %v1966_v13 }
 0x574   :  { %v1980_v28 = vmul.f32 %v1967_v48, %v5129_v37 }
 0x575   :  { %v1941_v21 = vpop.f32.mrf.mxu0  ;;  %v1984_v51 = vadd.f32 %v1983_v44, %v1979_v47  ;;  %v1972_v34 = vadd.f32 %v1971_v17, %v1967_v48 }
 0x576   :  { %v1942_v12 = vadd.f32 %v1941_v21, %v1839_v49 }
 0x577   :  { %v1985_v18 = vadd.f32 %v1984_v51, %v1980_v28 }
 0x578   :  { %v1968_v62 = vmul.f32 %v1942_v12, %v4601_v43 }
 0x57a   :  { %v1961_v6 = vpop.f32.mrf.mxu1  ;;  %v1981_v52 = vmul.f32 %v1968_v62, %v1942_v12  ;;  %v1973_v4 = vadd.f32 %v1972_v34, %v1968_v62 }
 0x57b   :  { %v1962_v23 = vadd.f32 %v1961_v6, %v1839_v49 }
 0x57c   :  { %v1986_v41 = vadd.f32 %v1985_v18, %v1981_v52 }
 0x57d   :  { %v1969_v50 = vmul.f32 %v1962_v23, %v4603_v46 }
 0x57f   :  { %v1974_v39 = vadd.f32 %v1973_v4, %v1969_v50  ;;  %v1982_v9 = vmul.f32 %v1969_v50, %v1962_v23 }
 0x581   :  { %1975 = vadd.xlane.f32.xlu2 %v1974_v39  ;;  %v1987_v30 = vadd.f32 %v1986_v41, %v1982_v9 }
 0x583   :  { %1988 = vadd.xlane.f32.xlu1 %v1987_v30 }
 0x5f4   :  { %v1976_v16 = vpop.xlane.xlu2 %1975 }
 0x5f5   :  { %v1990_v1 = vmul.f32 0.001953125, %v1976_v16 }
 0x5f6   :  { %v1989_v45 = vpop.xlane.xlu1 %1988 }
 0x5f7   :  { %v1991_v19 = vmul.f32 0.001953125, %v1989_v45  ;;  %v1992_v56 = vmul.f32 %v1990_v1, %v1990_v1  ;;  %v1999_v55 = vsub.f32 %v1962_v23, %v1990_v1  ;;  %v1998_v5 = vsub.f32 %v1942_v12, %v1990_v1 }
 0x5f8   :  { %v1994_v15 = vsub.f32 %v1862_v2, %v1990_v1  ;;  %v1995_v3 = vsub.f32 %v1882_v22, %v1990_v1  ;;  %v1996_v28 = vsub.f32 %v5125_v27, %v1990_v1  ;;  %v1997_v27 = vsub.f32 %v5129_v37, %v1990_v1 }
 0x5f9   :  { %v1993_v31 = vsub.f32 %v1991_v19, %v1992_v56 }
 0x5fb   :  { %v2000_v24 = vadd.f32 1e-05, %v1993_v31 }
 0x5fd   :  { %4230 = vrsqrt.f32 %v2000_v24  ;;  %vm2007_vm9 = vweird.f32 %v2000_v24 }
 0x603   :  { %v4231_v11 = vpop.eup %4230 }
 0x604   :  { %v2002_v42 = vmul.f32 %v4231_v11, %v2000_v24  ;;  %vm2008_vm15 = vweird.f32 %v4231_v11 }
 0x605   :  { %vm2009_vm12 = vmor %vm2007_vm9, %vm2008_vm15 }
 0x606   :  { %v2003_v8 = vmul.f32 %v4231_v11, %v2002_v42 }
 0x608   :  { %v2004_v59 = vmul.f32 0.5, %v2003_v8 }
 0x60a   :  { %v2005_v7 = vsub.f32 1.5, %v2004_v59 }
 0x60c   :  { %v2006_v49 = vmul.f32 %v4231_v11, %v2005_v7 }
 0x60e   :  { %v2010_v25 = vsel %vm2009_vm12, %v4231_v11, %v2006_v49 }
 0x60f   :  { %v2016_v10 = vmul.f32 %v2010_v25, %v1999_v55  ;;  %v2015_v40 = vmul.f32 %v2010_v25, %v1998_v5  ;;  %v2011_v36 = vmul.f32 %v2010_v25, %v1994_v15  ;;  %v2012_v13 = vmul.f32 %v2010_v25, %v1995_v3 }
 0x610   :  { %v2013_v34 = vmul.f32 %v2010_v25, %v1996_v28  ;;  %v2014_v9 = vmul.f32 %v2010_v25, %v1997_v27 }
 0x611   :  { %v2022_v35 = vmul.f32 %v2016_v10, %v4869_v53  ;;  %v2021_v44 = vmul.f32 %v2015_v40, %v4869_v53  ;;  %v2017_v47 = vmul.f32 %v2011_v36, %v4869_v53  ;;  %v2018_v2 = vmul.f32 %v2012_v13, %v4869_v53 }
 0x612   :  { %v2019_v4 = vmul.f32 %v2013_v34, %v4869_v53  ;;  %v2020_v30 = vmul.f32 %v2014_v9, %v4869_v53 }
 0x613   :  { %v2028_v48 = vadd.f32 %v2022_v35, %v4874_v54  ;;  %v2027_v21 = vadd.f32 %v2021_v44, %v4874_v54  ;;  %v2023_v17 = vadd.f32 %v2017_v47, %v4874_v54  ;;  %v2024_v23 = vadd.f32 %v2018_v2, %v4874_v54 }
 0x614   :  { %v2025_v39 = vadd.f32 %v2019_v4, %v4874_v54  ;;  %v2026_v45 = vadd.f32 %v2020_v30, %v4874_v54 }
 0x615   :  { %v2041_v12 = vmax.f32 %v2028_v48, 0.0  ;;  %v2040_v22 = vmax.f32 %v2027_v21, 0.0  ;;  %v2036_v51 = vmax.f32 %v2023_v17, 0.0  ;;  %v2037_v50 = vmax.f32 %v2024_v23, 0.0 }
 0x616   :  { %v2038_v41 = vmax.f32 %v2025_v39, 0.0  ;;  %v2039_v19 = vmax.f32 %v2026_v45, 0.0 }
 0x617   :  { %v2047_v62 = vmul.f32 %v2041_v12, %v4603_v46  ;;  %v2046_v6 = vmul.f32 %v2040_v22, %v4601_v43  ;;  %v2042_v52 = vmul.f32 %v2036_v51, %v4590_v32  ;;  %v2043_v18 = vmul.f32 %v2037_v50, %v4592_v33 }
 0x618   :  { %v2044_v16 = vmul.f32 %v2038_v41, %v4586_v29  ;;  %v2045_v56 = vmul.f32 %v2039_v19, %v4598_v38 }
 0x619   :  { %2064 = vrot.lane.b32.xlu1 %v2047_v62, %s4320_s29  ;;  %2062 = vrot.lane.b32.xlu2 %v2046_v6, %s4320_s29 }
 0x61a   :  { %2054 = vrot.lane.b32.xlu0 %v2042_v52, %s4320_s29 }
 0x622   :  { %2056 = vrot.lane.b32.xlu0 %v2043_v18, %s4320_s29 }
 0x62a   :  { %2058 = vrot.lane.b32.xlu0 %v2044_v16, %s4320_s29 }
 0x632   :  { %2060 = vrot.lane.b32.xlu0 %v2045_v56, %s4320_s29 }
 0x673   :  { %v2063_v7 = vpop.permute.xlu2 %2062 }
 0x68b   :  { %v2065_v37 = vpop.permute.xlu1 %2064 }
 0x68c   :  { %v2084_v1 = vadd.f32 %v2065_v37, %v4903_v0  ;;  %v2055_v31 = vpop.permute.xlu0 %2054  ;;  %v2070_v40 = vsel %vm677_vm10, %v2063_v7, %v2065_v37 }
 0x68d   :  { %v2078_v24 = vadd.f32 %v2055_v31, %v4927_v20 }
 0x68e   :  { %2091 = vst.msk [vmem:[#allocation2 + $0x30] sm:$0xff] %vm677_vm10, %v2084_v1 }
 0x68f   :  { %2085 = vst.msk [vmem:[#allocation2] sm:$0xff] %vm690_vm11, %v2078_v24 }
 0x694   :  { %v2057_v11 = vpop.permute.xlu0 %2056 }
 0x695   :  { %v5167_v42 = vld [vmem:[#allocation2 + $0x30] sm:$0xff]  ;;  %v2066_v8 = vsel %vm677_vm10, %v2055_v31, %v2057_v11 }
 0x696   :  { %2406 = vrot.lane.b32.xlu1 %v5167_v42, %s4314_s20  ;;  %2360 = vrot.lane.b32.xlu2 %v5167_v42, %s4312_s19  ;;  %v5183_v20 = vadd.f32 %v2066_v8, %v4930_v61  ;;  %v5185_v59 = vld [vmem:[#allocation2] sm:$0xff] }
 0x697   :  { %2452 = vrot.lane.b32.xlu0 %v5167_v42, %s4311_s18 }
 0x698   :  { %v3987_v55 = vpack.i.bf16 %v5183_v20, %v5185_v59 }
 0x69c   :  { %v2059_v0 = vpop.permute.xlu0 %2058 }
 0x69d   :  { %v2067_v15 = vsel %vm677_vm10, %v2057_v11, %v2059_v0 }
 0x69e   :  { %2268 = vrot.lane.b32.xlu1 %v5167_v42, %s4315_s21  ;;  %2314 = vrot.lane.b32.xlu2 %v5167_v42, %s4313_s0  ;;  %v5198_v25 = vadd.f32 %v2067_v15, %v4917_v14 }
 0x69f   :  { %2222 = vrot.lane.b32.xlu0 %v5167_v42, %s4316_s22 }
 0x6a4   :  { %v2061_v49 = vpop.permute.xlu0 %2060 }
 0x6a5   :  { %v2069_v5 = vsel %vm677_vm10, %v2061_v49, %v2063_v7  ;;  %v2068_v10 = vsel %vm677_vm10, %v2059_v0, %v2061_v49 }
 0x6a6   :  { %4003 = vrot.lane.b32.xlu2 %v3987_v55, %s4312_s19  ;;  %4013 = vrot.lane.b32.xlu1 %v3987_v55, %s4313_s0  ;;  %v5195_v61 = vadd.f32 %v2069_v5, %v4940_v63  ;;  %v5208_v36 = vadd.f32 %v2068_v10, %v4914_v60  ;;  %v5211_v63 = vadd.f32 %v2070_v40, %v4943_v58 }
 0x6a7   :  { %3988 = vrot.lane.b32.xlu0 %v3987_v55, %s4311_s18 }
 0x6a8   :  { %v4017_v3 = vpack.i.bf16 %v5195_v61, %v5198_v25  ;;  %v4032_v14 = vpack.i.bf16 %v5208_v36, %v5211_v63 }
 0x6ae   :  { %4018 = vrot.lane.b32.xlu2 %v4017_v3, %s4312_s19  ;;  %4028 = vrot.lane.b32.xlu1 %v4017_v3, %s4313_s0 }
 0x6af   :  { %3993 = vrot.lane.b32.xlu0 %v3987_v55, %s4314_s20 }
 0x6b6   :  { %4043 = vrot.lane.b32.xlu1 %v4017_v3, %s4315_s21  ;;  %4033 = vrot.lane.b32.xlu2 %v4032_v14, %s4311_s18 }
 0x6b7   :  { %3998 = vrot.lane.b32.xlu0 %v4017_v3, %s4311_s18 }
 0x6be   :  { %4053 = vrot.lane.b32.xlu1 %v3987_v55, %s4317_s23  ;;  %4048 = vrot.lane.b32.xlu2 %v4032_v14, %s4314_s20 }
 0x6bf   :  { %4008 = vrot.lane.b32.xlu0 %v4017_v3, %s4314_s20 }
 0x6c6   :  { %4058 = vrot.lane.b32.xlu2 %v4017_v3, %s4316_s22  ;;  %4078 = vrot.lane.b32.xlu1 %v4032_v14, %s4313_s0 }
 0x6c7   :  { %4023 = vrot.lane.b32.xlu0 %v3987_v55, %s4315_s21 }
 0x6ce   :  { %4068 = vrot.lane.b32.xlu2 %v3987_v55, %s4318_s24  ;;  %4088 = vrot.lane.b32.xlu1 %v4032_v14, %s4315_s21 }
 0x6cf   :  { %4038 = vrot.lane.b32.xlu0 %v3987_v55, %s4316_s22 }
 0x6d6   :  { %4098 = vrot.lane.b32.xlu2 %v4032_v14, %s4317_s23  ;;  %4103 = vrot.lane.b32.xlu1 %v4032_v14, %s4318_s24 }
 0x6d7   :  { %4063 = vrot.lane.b32.xlu0 %v4032_v14, %s4312_s19 }
 0x6de   :  { %2176 = vrot.lane.b32.xlu2 %v5167_v42, %s4317_s23  ;;  %2530 = vperm.xlu1 %4107, %v5041_v57  }
 0x6df   :  { %4073 = vrot.lane.b32.xlu0 %v4017_v3, %s4317_s23 }
 0x6e7   :  { %4083 = vrot.lane.b32.xlu0 %v4017_v3, %s4318_s24 }
 0x6ef   :  { %4093 = vrot.lane.b32.xlu0 %v4032_v14, %s4316_s22 }
 0x6f0   :  { %v5238_v60 = vpop.permute.xlu2 %2360 }
 0x6f7   :  { %2130 = vrot.lane.b32.xlu0 %v5167_v42, %s4318_s24 }
 0x6f8   :  { %v5240_v58 = vpop.permute.xlu2 %2314 }
 0x700   :  { %v4004_v44 = vpop.permute.xlu2 %4003 }
 0x701   :  { %v4006_v62 = vunpack.i.h.bf16 %v4004_v44  ;;  %v4005_v6 = vunpack.i.l.bf16 %v4004_v44 }
 0x703   :  { %v2362_v18 = vsel %vm336_vm2, %v4005_v6, %v4006_v62 }
 0x708   :  { %v5242_v13 = vpop.permute.xlu1 %2406  ;;  %v5250_v21 = vpop.permute.xlu2 %4018 }
 0x709   :  { %v5244_v35 = vpop.permute.xlu0 %2452  ;;  %v4020_v24 = vunpack.i.l.bf16 %v5250_v21 }
 0x70b   :  { %v2363_v3 = vsel %vm336_vm2, %v4006_v62, %v4020_v24 }
 0x710   :  { %v5246_v47 = vpop.permute.xlu1 %2268  ;;  %v5255_v34 = vpop.permute.xlu2 %4033 }
 0x711   :  { %v5248_v57 = vpop.permute.xlu0 %2222  ;;  %v4036_v41 = vunpack.i.h.bf16 %v5255_v34 }
 0x718   :  { %v4014_v48 = vpop.permute.xlu1 %4013  ;;  %v5272_v1 = vpop.permute.xlu2 %4048 }
 0x719   :  { %v3989_v17 = vpop.permute.xlu0 %3988  ;;  %v4016_v50 = vunpack.i.h.bf16 %v4014_v48  ;;  %v4015_v4 = vunpack.i.l.bf16 %v4014_v48  ;;  %v4051_v11 = vunpack.i.h.bf16 %v5272_v1 }
 0x71a   :  { %v3991_v2 = vunpack.i.h.bf16 %v3989_v17  ;;  %v3990_v12 = vunpack.i.l.bf16 %v3989_v17 }
 0x71b   :  { %v2316_v39 = vsel %vm289_vm3, %v4015_v4, %v4016_v50 }
 0x71c   :  { %v2454_v22 = vsel %vm430_vm0, %v3990_v12, %v3991_v2 }
 0x71d   :  { %2543 = vmatpush.msra.mxu2 %v2454_v22 }
 0x720   :  { %v5253_v28 = vpop.permute.xlu1 %4028  ;;  %v5287_v10 = vpop.permute.xlu2 %4058 }
 0x721   :  { %v3994_v51 = vpop.permute.xlu0 %3993  ;;  %v4030_v7 = vunpack.i.l.bf16 %v5253_v28 }
 0x722   :  { %v3996_v52 = vunpack.i.h.bf16 %v3994_v51  ;;  %v3995_v23 = vunpack.i.l.bf16 %v3994_v51  ;;  %v4060_v51 = vunpack.i.l.bf16 %v5287_v10 }
 0x723   :  { %v2317_v40 = vsel %vm289_vm3, %v4016_v50, %v4030_v7 }
 0x724   :  { %v2408_v27 = vsel %vm383_vm1, %v3995_v23, %v3996_v52 }
 0x725   :  { %2544 = vmatpush.msra.mxu2 %v2408_v27 }
 0x727   :  { %2545 = vmatpush.msra.mxu2 %v2362_v18 }
 0x728   :  { %v5265_v45 = vpop.permute.xlu1 %4043  ;;  %v4069_v62 = vpop.permute.xlu2 %4068 }
 0x729   :  { %v5260_v9 = vpop.permute.xlu0 %3998  ;;  %2546 = vmatpush.msra.mxu2 %v2316_v39  ;;  %v4045_v44 = vunpack.i.l.bf16 %v5265_v45  ;;  %v4071_v27 = vunpack.i.h.bf16 %v4069_v62  ;;  %v4070_v18 = vunpack.i.l.bf16 %v4069_v62 }
 0x72a   :  { %v4001_v30 = vunpack.i.h.bf16 %v5260_v9  ;;  %v4000_v16 = vunpack.i.l.bf16 %v5260_v9 }
 0x72c   :  { %v2455_v19 = vsel %vm430_vm0, %v3991_v2, %v4000_v16  ;;  %v2456_v56 = vsel %vm430_vm0, %v4000_v16, %v4036_v41  ;;  %v2457_v37 = vsel %vm430_vm0, %v4036_v41, %v4001_v30 }
 0x72d   :  { %2563 = vmatpush.msra.mxu3 %v2455_v19  ;;  %2583 = vmatpush.msrb.mxu0 %v2456_v56  ;;  %v2132_v19 = vsel %vm101_vm7, %v4070_v18, %v4071_v27  ;;  %v4035_v56 = vunpack.i.l.bf16 %v5255_v34  ;;  %v4031_v34 = vunpack.i.h.bf16 %v5253_v28 }
 0x72e   :  { %2603 = vmatpush.msrb.mxu1 %v2457_v37 }
 0x730   :  { %v5284_v15 = vpop.permute.xlu1 %4053 }
 0x731   :  { %v5274_v31 = vpop.permute.xlu0 %4008  ;;  %v4055_v23 = vunpack.i.l.bf16 %v5284_v15 }
 0x732   :  { %v4011_v0 = vunpack.i.h.bf16 %v5274_v31  ;;  %v4010_v8 = vunpack.i.l.bf16 %v5274_v31 }
 0x734   :  { %v2409_v49 = vsel %vm383_vm1, %v3996_v52, %v4010_v8  ;;  %v2410_v55 = vsel %vm383_vm1, %v4010_v8, %v4051_v11  ;;  %v2411_v5 = vsel %vm383_vm1, %v4051_v11, %v4011_v0  ;;  %v4056_v52 = vunpack.i.h.bf16 %v5284_v15 }
 0x735   :  { %2564 = vmatpush.msra.mxu3 %v2409_v49  ;;  %2584 = vmatpush.msrb.mxu0 %v2410_v55  ;;  %v4021_v11 = vunpack.i.h.bf16 %v5250_v21  ;;  %v4050_v55 = vunpack.i.l.bf16 %v5272_v1  ;;  %v2458_v15 = vsel %vm430_vm0, %v4001_v30, %v4035_v56 }
 0x736   :  { %2604 = vmatpush.msrb.mxu1 %v2411_v5  ;;  %v2178_v16 = vsel %vm148_vm6, %v4055_v23, %v4056_v52  ;;  %v4099_v23 = vpop.permute.xlu2 %4098 }
 0x737   :  { %2565 = vmatpush.msra.mxu3 %v2363_v3  ;;  %v2412_v1 = vsel %vm383_vm1, %v4011_v0, %v4050_v55  ;;  %v2413_v18 = vsel %vm383_vm1, %v4050_v55, %v5242_v13 }
 0x738   :  { %v5293_v22 = vpop.permute.xlu1 %4078 }
 0x739   :  { %v4024_v14 = vpop.permute.xlu0 %4023  ;;  %2566 = vmatpush.msra.mxu3 %v2317_v40  ;;  %v4081_v8 = vunpack.i.h.bf16 %v5293_v22 }
 0x73a   :  { %v4026_v48 = vunpack.i.h.bf16 %v4024_v14  ;;  %v4025_v17 = vunpack.i.l.bf16 %v4024_v14  ;;  %v4080_v14 = vunpack.i.l.bf16 %v5293_v22 }
 0x73b   :  { %v2318_v9 = vsel %vm289_vm3, %v4030_v7, %v4081_v8  ;;  %v2319_v28 = vsel %vm289_vm3, %v4081_v8, %v4031_v34 }
 0x73c   :  { %v2270_v2 = vsel %vm242_vm4, %v4025_v17, %v4026_v48  ;;  %v2271_v12 = vsel %vm242_vm4, %v4026_v48, %v4045_v44  ;;  %v4046_v48 = vunpack.i.h.bf16 %v5265_v45  ;;  %v2320_v45 = vsel %vm289_vm3, %v4031_v34, %v4080_v14 }
 0x73d   :  { %2547 = vmatpush.msra.mxu2 %v2270_v2  ;;  %2567 = vmatpush.msra.mxu3 %v2271_v12  ;;  %v2321_v8 = vsel %vm289_vm3, %v4080_v14, %v5240_v58 }
 0x73e   :  { %v2177_v34 = vpop.permute.xlu2 %2176 }
 0x740   :  { %v5305_v37 = vpop.permute.xlu1 %4088 }
 0x741   :  { %v4039_v6 = vpop.permute.xlu0 %4038  ;;  %v4091_v3 = vunpack.i.h.bf16 %v5305_v37  ;;  %v4090_v30 = vunpack.i.l.bf16 %v5305_v37 }
 0x742   :  { %v4041_v50 = vunpack.i.h.bf16 %v4039_v6  ;;  %v4040_v4 = vunpack.i.l.bf16 %v4039_v6 }
 0x743   :  { %v2272_v17 = vsel %vm242_vm4, %v4045_v44, %v4091_v3  ;;  %v2273_v2 = vsel %vm242_vm4, %v4091_v3, %v4046_v48  ;;  %v2274_v7 = vsel %vm242_vm4, %v4046_v48, %v4090_v30 }
 0x744   :  { %v2224_v39 = vsel %vm195_vm5, %v4040_v4, %v4041_v50  ;;  %v2225_v41 = vsel %vm195_vm5, %v4041_v50, %v4060_v51  ;;  %v2459_v50 = vsel %vm430_vm0, %v4035_v56, %v5244_v35 }
 0x745   :  { %2548 = vmatpush.msra.mxu2 %v2224_v39  ;;  %2568 = vmatpush.msra.mxu3 %v2225_v41 }
 0x747   :  { %2549 = vmatpush.msra.mxu2 %v2178_v16  ;;  %v4101_v16 = vunpack.i.h.bf16 %v4099_v23 }
 0x749   :  { %v4064_v31 = vpop.permute.xlu0 %4063  ;;  %2550 = vmatpush.msra.mxu2 %v2132_v19  ;;  %v4104_v19 = vpop.permute.xlu1 %4103 }
 0x74a   :  { %v4066_v49 = vunpack.i.h.bf16 %v4064_v31  ;;  %v4065_v5 = vunpack.i.l.bf16 %v4064_v31 }
 0x74b   :  { %2551 = vmatpush.msra.mxu2 %v5185_v59 }
 0x74c   :  { %v2364_v40 = vsel %vm336_vm2, %v4020_v24, %v4066_v49  ;;  %v2365_v21 = vsel %vm336_vm2, %v4066_v49, %v4021_v11  ;;  %v2366_v24 = vsel %vm336_vm2, %v4021_v11, %v4065_v5  ;;  %3594 = vmatmul.msk.f32.vlgmr.msra.gmra.mxu2 %vm510_vm8, %v5071_v26  ;;  %v2367_v37 = vsel %vm336_vm2, %v4065_v5, %v5238_v60 }
 0x74d   :  { %2623 = vmatpush.msrb.mxu2 %v2458_v15  ;;  %2585 = vmatpush.msrb.mxu0 %v2364_v40  ;;  %v4100_v11 = vunpack.i.l.bf16 %v4099_v23  ;;  %v4106_v49 = vunpack.i.h.bf16 %v4104_v19  ;;  %v2275_v5 = vsel %vm242_vm4, %v4090_v30, %v5246_v47 }
 0x74e   :  { %2605 = vmatpush.msrb.mxu1 %v2365_v21 }
 0x74f   :  { %2624 = vmatpush.msrb.mxu2 %v2412_v1  ;;  %2586 = vmatpush.msrb.mxu0 %v2318_v9  ;;  %v2183_v47 = vsel %vm148_vm6, %v4100_v11, %v2177_v34 }
 0x750   :  { %2606 = vmatpush.msrb.mxu1 %v2319_v28 }
 0x751   :  { %2625 = vmatpush.msrb.mxu2 %v2366_v24  ;;  %v4074_v12 = vpop.permute.xlu0 %4073  ;;  %2587 = vmatpush.msrb.mxu0 %v2272_v17  ;;  %v2531_v14 = vpop.permute.xlu1 %2530 }
 0x752   :  { %2607 = vmatpush.msrb.mxu1 %v2273_v2  ;;  %v4075_v0 = vunpack.i.l.bf16 %v4074_v12  ;;  %v4076_v39 = vunpack.i.h.bf16 %v4074_v12 }
 0x753   :  { %2626 = vmatpush.msrb.mxu2 %v2320_v45 }
 0x754   :  { %v2179_v22 = vsel %vm148_vm6, %v4056_v52, %v4075_v0  ;;  %v4061_v52 = vunpack.i.h.bf16 %v5287_v10  ;;  %v2180_v60 = vsel %vm148_vm6, %v4075_v0, %v4101_v16  ;;  %v2181_v55 = vsel %vm148_vm6, %v4101_v16, %v4076_v39 }
 0x755   :  { %2627 = vmatpush.msrb.mxu2 %v2274_v7  ;;  %2569 = vmatpush.msra.mxu3 %v2179_v22  ;;  %v4105_v10 = vunpack.i.l.bf16 %v4104_v19 }
 0x759   :  { %v4084_v62 = vpop.permute.xlu0 %4083 }
 0x75a   :  { %v4085_v44 = vunpack.i.l.bf16 %v4084_v62  ;;  %v4086_v35 = vunpack.i.h.bf16 %v4084_v62 }
 0x75c   :  { %v2133_v6 = vsel %vm101_vm7, %v4071_v27, %v4085_v44  ;;  %v2134_v15 = vsel %vm101_vm7, %v4085_v44, %v4106_v49  ;;  %v2135_v58 = vsel %vm101_vm7, %v4106_v49, %v4086_v35  ;;  %v2136_v3 = vsel %vm101_vm7, %v4086_v35, %v4105_v10 }
 0x75d   :  { %2570 = vmatpush.msra.mxu3 %v2133_v6 }
 0x75f   :  { %2571 = vmatpush.msra.mxu3 %v5183_v20 }
 0x760   :  { %3595 = vmatmul.msk.f32.vlgmr.msra.gmra.mxu3 %vm510_vm8, %v5071_v26 }
 0x761   :  { %2643 = vmatpush.msrb.mxu3 %v2459_v50  ;;  %v4094_v4 = vpop.permute.xlu0 %4093 }
 0x762   :  { %v4096_v41 = vunpack.i.h.bf16 %v4094_v4  ;;  %v4095_v27 = vunpack.i.l.bf16 %v4094_v4 }
 0x763   :  { %2644 = vmatpush.msrb.mxu3 %v2413_v18 }
 0x764   :  { %v2226_v13 = vsel %vm195_vm5, %v4060_v51, %v4096_v41  ;;  %v2227_v56 = vsel %vm195_vm5, %v4096_v41, %v4061_v52  ;;  %v2228_v31 = vsel %vm195_vm5, %v4061_v52, %v4095_v27  ;;  %v2182_v51 = vsel %vm148_vm6, %v4076_v39, %v4100_v11 }
 0x765   :  { %2645 = vmatpush.msrb.mxu3 %v2367_v37  ;;  %2588 = vmatpush.msrb.mxu0 %v2226_v13  ;;  %v2229_v40 = vsel %vm195_vm5, %v4095_v27, %v5248_v57 }
 0x766   :  { %2608 = vmatpush.msrb.mxu1 %v2227_v56  ;;  %2628 = vmatpush.msrb.mxu2 %v2228_v31 }
 0x767   :  { %2646 = vmatpush.msrb.mxu3 %v2321_v8  ;;  %2589 = vmatpush.msrb.mxu0 %v2180_v60 }
 0x768   :  { %2609 = vmatpush.msrb.mxu1 %v2181_v55  ;;  %2629 = vmatpush.msrb.mxu2 %v2182_v51 }
 0x769   :  { %2647 = vmatpush.msrb.mxu3 %v2275_v5  ;;  %2590 = vmatpush.msrb.mxu0 %v2134_v15  ;;  %v2131_v21 = vpop.permute.xlu0 %2130 }
 0x76a   :  { %2610 = vmatpush.msrb.mxu1 %v2135_v58  ;;  %2630 = vmatpush.msrb.mxu2 %v2136_v3  ;;  %v2137_v57 = vsel %vm101_vm7, %v4105_v10, %v2131_v21 }
 0x76b   :  { %2648 = vmatpush.msrb.mxu3 %v2229_v40  ;;  %2591 = vmatpush.msrb.mxu0 %v5198_v25 }
 0x76c   :  { %2611 = vmatpush.msrb.mxu1 %v5208_v36  ;;  %2631 = vmatpush.msrb.mxu2 %v5195_v61 }
 0x76d   :  { %3596 = vmatmul.msk.f32.vlgmr.msrb.gmra.mxu0 %vm510_vm8, %v5071_v26  ;;  %3598 = vmatmul.msk.f32.vlgmr.msrb.gmra.mxu2 %vm510_vm8, %v5071_v26 }
 0x76e   :  { %2649 = vmatpush.msrb.mxu3 %v2183_v47  ;;  %3597 = vmatmul.msk.f32.vlgmr.msrb.gmra.mxu1 %vm510_vm8, %v5071_v26 }
 0x770   :  { %2650 = vmatpush.msrb.mxu3 %v2137_v57 }
 0x772   :  { %2651 = vmatpush.msrb.mxu3 %v5211_v63 }
 0x773   :  { %3599 = vmatmul.msk.f32.vlgmr.msrb.gmra.mxu3 %vm510_vm8, %v5071_v26 }
 0x7cf   :  { %v2553_v1 = vpop.f32.mrf.mxu2 }
 0x7d0   :  { %v2554_v48 = vadd.f32 %v2553_v1, %v2531_v14 }
 0x7d2   :  { %v2656_v30 = vmul.f32 %v2554_v48, %v4590_v32 }
 0x7d4   :  { %v2669_v12 = vmul.f32 %v2656_v30, %v2554_v48 }
 0x7e3   :  { %v2573_v9 = vpop.f32.mrf.mxu3 }
 0x7e4   :  { %v2574_v28 = vadd.f32 %v2573_v9, %v2531_v14 }
 0x7e6   :  { %v2657_v24 = vmul.f32 %v2574_v28, %v4592_v33 }
 0x7e8   :  { %v2662_v0 = vadd.f32 %v2657_v24, %v2656_v30  ;;  %v2670_v7 = vmul.f32 %v2657_v24, %v2574_v28 }
 0x7ea   :  { %v2593_v17 = vpop.f32.mrf.mxu0  ;;  %v2675_v62 = vadd.f32 %v2670_v7, %v2669_v12 }
 0x7eb   :  { %v5376_v2 = vadd.f32 %v2593_v17, %v2531_v14  ;;  %v2613_v45 = vpop.f32.mrf.mxu1 }
 0x7ec   :  { %v5380_v26 = vadd.f32 %v2613_v45, %v2531_v14 }
 0x7ed   :  { %v2658_v22 = vmul.f32 %v5376_v2, %v4586_v29 }
 0x7ee   :  { %v2659_v23 = vmul.f32 %v5380_v26, %v4598_v38 }
 0x7ef   :  { %v2663_v44 = vadd.f32 %v2662_v0, %v2658_v22  ;;  %v2671_v6 = vmul.f32 %v2658_v22, %v5376_v2 }
 0x7f0   :  { %v2633_v50 = vpop.f32.mrf.mxu2  ;;  %v2672_v41 = vmul.f32 %v2659_v23, %v5380_v26 }
 0x7f1   :  { %v5385_v4 = vadd.f32 %v2633_v50, %v2531_v14  ;;  %v2676_v52 = vadd.f32 %v2675_v62, %v2671_v6  ;;  %v2664_v39 = vadd.f32 %v2663_v44, %v2659_v23 }
 0x7f3   :  { %v2660_v18 = vmul.f32 %v5385_v4, %v4601_v43  ;;  %v2677_v37 = vadd.f32 %v2676_v52, %v2672_v41 }
 0x7f5   :  { %v2673_v16 = vmul.f32 %v2660_v18, %v5385_v4  ;;  %v2665_v13 = vadd.f32 %v2664_v39, %v2660_v18 }
 0x7f6   :  { %v2653_v27 = vpop.f32.mrf.mxu3 }
 0x7f7   :  { %v2654_v19 = vadd.f32 %v2653_v27, %v2531_v14  ;;  %v2678_v11 = vadd.f32 %v2677_v37, %v2673_v16 }
 0x7f9   :  { %v2661_v35 = vmul.f32 %v2654_v19, %v4603_v46 }
 0x7fb   :  { %v2674_v56 = vmul.f32 %v2661_v35, %v2654_v19  ;;  %v2666_v31 = vadd.f32 %v2665_v13, %v2661_v35 }
 0x7fd   :  { %2667 = vadd.xlane.f32.xlu2 %v2666_v31  ;;  %v2679_v8 = vadd.f32 %v2678_v11, %v2674_v56 }
 0x7ff   :  { %2680 = vadd.xlane.f32.xlu0 %v2679_v8 }
 0x870   :  { %v2668_v49 = vpop.xlane.xlu2 %2667 }
 0x871   :  { %v2682_v60 = vmul.f32 0.001953125, %v2668_v49 }
 0x872   :  { %v2681_v55 = vpop.xlane.xlu0 %2680 }
 0x873   :  { %v2683_v10 = vmul.f32 0.001953125, %v2681_v55  ;;  %v2684_v51 = vmul.f32 %v2682_v60, %v2682_v60  ;;  %v2691_v57 = vsub.f32 %v2654_v19, %v2682_v60  ;;  %v2686_v14 = vsub.f32 %v2554_v48, %v2682_v60 }
 0x874   :  { %v2687_v1 = vsub.f32 %v2574_v28, %v2682_v60  ;;  %v2688_v6 = vsub.f32 %v5376_v2, %v2682_v60  ;;  %v2689_v39 = vsub.f32 %v5380_v26, %v2682_v60  ;;  %v2690_v16 = vsub.f32 %v5385_v4, %v2682_v60 }
 0x875   :  { %v2685_v5 = vsub.f32 %v2683_v10, %v2684_v51 }
 0x877   :  { %v2692_v15 = vadd.f32 1e-05, %v2685_v5 }
 0x879   :  { %4232 = vrsqrt.f32 %v2692_v15  ;;  %vm2699_vm14 = vweird.f32 %v2692_v15 }
 0x87f   :  { %v4233_v58 = vpop.eup %4232 }
 0x880   :  { %v2694_v34 = vmul.f32 %v4233_v58, %v2692_v15  ;;  %vm2700_vm13 = vweird.f32 %v4233_v58 }
 0x881   :  { %vm2701_vm15 = vmor %vm2699_vm14, %vm2700_vm13 }
 0x882   :  { %v2695_v3 = vmul.f32 %v4233_v58, %v2694_v34 }
 0x884   :  { %v2696_v40 = vmul.f32 0.5, %v2695_v3 }
 0x886   :  { %v2697_v21 = vsub.f32 1.5, %v2696_v40 }
 0x888   :  { %v2698_v47 = vmul.f32 %v4233_v58, %v2697_v21 }
 0x88a   :  { %v2702_v9 = vsel %vm2701_vm15, %v4233_v58, %v2698_v47 }
 0x88b   :  { %v2708_v30 = vmul.f32 %v2702_v9, %v2691_v57  ;;  %v2703_v24 = vmul.f32 %v2702_v9, %v2686_v14  ;;  %v2704_v17 = vmul.f32 %v2702_v9, %v2687_v1  ;;  %v2705_v50 = vmul.f32 %v2702_v9, %v2688_v6 }
 0x88c   :  { %v2706_v27 = vmul.f32 %v2702_v9, %v2689_v39  ;;  %v2707_v35 = vmul.f32 %v2702_v9, %v2690_v16 }
 0x88d   :  { %v2714_v12 = vmul.f32 %v2708_v30, %v4869_v53  ;;  %v2709_v45 = vmul.f32 %v2703_v24, %v4869_v53  ;;  %v2710_v22 = vmul.f32 %v2704_v17, %v4869_v53  ;;  %v2711_v52 = vmul.f32 %v2705_v50, %v4869_v53 }
 0x88f   :  { %v2720_v0 = vadd.f32 %v2714_v12, %v4874_v54  ;;  %v2715_v7 = vadd.f32 %v2709_v45, %v4874_v54  ;;  %v2716_v23 = vadd.f32 %v2710_v22, %v4874_v54  ;;  %v2717_v2 = vadd.f32 %v2711_v52, %v4874_v54 }
 0x891   :  { %v2733_v62 = vmax.f32 %v2720_v0, 0.0  ;;  %v2728_v44 = vmax.f32 %v2715_v7, 0.0  ;;  %v2729_v18 = vmax.f32 %v2716_v23, 0.0 }
 0x893   :  { %v2739_v48 = vmul.f32 %v2733_v62, %v4603_v46  ;;  %v2734_v28 = vmul.f32 %v2728_v44, %v4590_v32  ;;  %v2735_v41 = vmul.f32 %v2729_v18, %v4592_v33  ;;  %v2730_v32 = vmax.f32 %v2717_v2, 0.0 }
 0x894   :  { %v2712_v46 = vmul.f32 %v2706_v27, %v4869_v53  ;;  %v2713_v33 = vmul.f32 %v2707_v35, %v4869_v53 }
 0x895   :  { %2756 = vrot.lane.b32.xlu2 %v2739_v48, %s4320_s29  ;;  %2746 = vrot.lane.b32.xlu1 %v2734_v28, %s4320_s29  ;;  %v2736_v19 = vmul.f32 %v2730_v32, %v4586_v29 }
 0x896   :  { %v2718_v37 = vadd.f32 %v2712_v46, %v4874_v54  ;;  %v2719_v56 = vadd.f32 %v2713_v33, %v4874_v54 }
 0x898   :  { %v2731_v26 = vmax.f32 %v2718_v37, 0.0  ;;  %v2732_v31 = vmax.f32 %v2719_v56, 0.0 }
 0x89a   :  { %v2737_v13 = vmul.f32 %v2731_v26, %v4598_v38  ;;  %v2738_v11 = vmul.f32 %v2732_v31, %v4601_v43 }
 0x89d   :  { %2748 = vrot.lane.b32.xlu1 %v2735_v41, %s4320_s29 }
 0x8a5   :  { %2750 = vrot.lane.b32.xlu1 %v2736_v19, %s4320_s29 }
 0x8ad   :  { %2752 = vrot.lane.b32.xlu1 %v2737_v13, %s4320_s29 }
 0x8b5   :  { %2754 = vrot.lane.b32.xlu1 %v2738_v11, %s4320_s29 }
 0x8ef   :  { %v2757_v29 = vpop.permute.xlu2 %2756 }
 0x8f0   :  { %v2776_v4 = vadd.f32 %v2757_v29, %v5167_v42 }
 0x8f2   :  { %2783 = vst.msk [vmem:[#allocation2 + $0x30] sm:$0xff] %vm677_vm10, %v2776_v4 }
 0x8f9   :  { %v3124_v8 = vld [vmem:[#allocation2 + $0x30] sm:$0xff] }
 0x8fa   :  { %3144 = vrot.lane.b32.xlu0 %v3124_v8, %s4311_s18  ;;  %3052 = vrot.lane.b32.xlu2 %v3124_v8, %s4312_s19 }
 0x8fb   :  { %3098 = vrot.lane.b32.xlu1 %v3124_v8, %s4314_s20 }
 0x902   :  { %3006 = vrot.lane.b32.xlu0 %v3124_v8, %s4313_s0  ;;  %2960 = vrot.lane.b32.xlu2 %v3124_v8, %s4315_s21 }
 0x907   :  { %v2747_v38 = vpop.permute.xlu1 %2746 }
 0x908   :  { %v2770_v43 = vadd.f32 %v2747_v38, %v5185_v59 }
 0x90a   :  { %2777 = vst.msk [vmem:[#allocation2] sm:$0xff] %vm690_vm11, %v2770_v43 }
 0x90f   :  { %v2749_v53 = vpop.permute.xlu1 %2748 }
 0x910   :  { %v2758_v54 = vsel %vm677_vm10, %v2747_v38, %v2749_v53 }
 0x911   :  { %v5430_v42 = vadd.f32 %v2758_v54, %v5183_v20  ;;  %v5432_v49 = vld [vmem:[#allocation2] sm:$0xff] }
 0x913   :  { %v4108_v60 = vpack.i.bf16 %v5430_v42, %v5432_v49 }
 0x915   :  { %4109 = vrot.lane.b32.xlu1 %v4108_v60, %s4311_s18 }
 0x917   :  { %v2751_v55 = vpop.permute.xlu1 %2750 }
 0x918   :  { %v2759_v10 = vsel %vm677_vm10, %v2749_v53, %v2751_v55 }
 0x919   :  { %v5439_v59 = vadd.f32 %v2759_v10, %v5198_v25 }
 0x91d   :  { %4119 = vrot.lane.b32.xlu1 %v4108_v60, %s4314_s20 }
 0x91f   :  { %v2753_v51 = vpop.permute.xlu1 %2752 }
 0x920   :  { %v2760_v5 = vsel %vm677_vm10, %v2751_v55, %v2753_v51 }
 0x921   :  { %v5444_v20 = vadd.f32 %v2760_v5, %v5208_v36 }
 0x923   :  { %v4113_v15 = vpack.i.bf16 %v5444_v20, %v5439_v59 }
 0x925   :  { %4114 = vrot.lane.b32.xlu0 %v4113_v15, %s4311_s18  ;;  %4124 = vrot.lane.b32.xlu1 %v4113_v15, %s4314_s20 }
 0x927   :  { %v2755_v58 = vpop.permute.xlu1 %2754 }
 0x928   :  { %v2761_v34 = vsel %vm677_vm10, %v2753_v51, %v2755_v58  ;;  %v2762_v25 = vsel %vm677_vm10, %v2755_v58, %v2757_v29 }
 0x929   :  { %v5453_v3 = vadd.f32 %v2761_v34, %v5195_v61  ;;  %v5456_v40 = vadd.f32 %v2762_v25, %v5211_v63  ;;  %v3219_v61 = vld [vmem:[%s5665_s9] sm:$0xff] }
 0x92b   :  { %v4128_v36 = vpack.i.bf16 %v5456_v40, %v5453_v3  ;;  %v4223_v63 = vpack.i.bf16 %v3124_v8, %v5456_v40 }
 0x92d   :  { %4134 = vrot.lane.b32.xlu0 %v4108_v60, %s4312_s19  ;;  %4139 = vrot.lane.b32.xlu1 %v4113_v15, %s4312_s19 }
 0x92e   :  { %4129 = vrot.lane.b32.xlu2 %v4128_v36, %s4311_s18 }
 0x935   :  { %4149 = vrot.lane.b32.xlu0 %v4108_v60, %s4313_s0  ;;  %4154 = vrot.lane.b32.xlu1 %v4113_v15, %s4313_s0 }
 0x936   :  { %4144 = vrot.lane.b32.xlu2 %v4128_v36, %s4314_s20 }
 0x93d   :  { %4164 = vrot.lane.b32.xlu0 %v4108_v60, %s4315_s21  ;;  %4169 = vrot.lane.b32.xlu1 %v4113_v15, %s4315_s21 }
 0x93e   :  { %4159 = vrot.lane.b32.xlu2 %v4128_v36, %s4312_s19 }
 0x945   :  { %4179 = vrot.lane.b32.xlu1 %v4108_v60, %s4316_s22  ;;  %4189 = vrot.lane.b32.xlu0 %v4128_v36, %s4315_s21 }
 0x946   :  { %4174 = vrot.lane.b32.xlu2 %v4128_v36, %s4313_s0 }
 0x94d   :  { %4199 = vrot.lane.b32.xlu0 %v4113_v15, %s4317_s23  ;;  %4204 = vrot.lane.b32.xlu1 %v4128_v36, %s4316_s22 }
 0x94e   :  { %4184 = vrot.lane.b32.xlu2 %v4113_v15, %s4316_s22 }
 0x954   :  { %v5488_v21 = vpop.permute.xlu2 %3052 }
 0x955   :  { %4209 = vrot.lane.b32.xlu0 %v4108_v60, %s4318_s24  ;;  %4214 = vrot.lane.b32.xlu1 %v4113_v15, %s4318_s24 }
 0x956   :  { %4194 = vrot.lane.b32.xlu2 %v4108_v60, %s4317_s23 }
 0x95c   :  { %v5492_v57 = vpop.permute.xlu2 %2960 }
 0x95d   :  { %2914 = vrot.lane.b32.xlu0 %v3124_v8, %s4316_s22  ;;  %2818 = vrot.lane.b32.xlu1 %v5453_v3, %s4318_s24  ;;  %s3566_s22 = sshll.u32 %s5666_s10, 4  ;;  %s3567_s22 = int_to_ptr.hbm [resolvable:$true] %s3566_s22 }
 0x95e   :  { %4219 = vrot.lane.b32.xlu2 %v4128_v36, %s4317_s23 }
 0x965   :  { %3222 = vperm.xlu0 %3986, %v3219_v61   ;;  %2868 = vrot.lane.b32.xlu1 %v3124_v8, %s4317_s23 }
 0x966   :  { %4224 = vrot.lane.b32.xlu2 %v4223_v63, %s4318_s24 }
 0x96c   :  { %v5494_v14 = vpop.permute.xlu0 %3144 }
 0x96d   :  { %v5490_v47 = vpop.permute.xlu1 %3098 }
 0x974   :  { %v5499_v12 = vpop.permute.xlu0 %3006 }
 0x987   :  { %v4110_v1 = vpop.permute.xlu1 %4109 }
 0x988   :  { %v5496_v9 = vpop.permute.xlu2 %4129  ;;  %v4112_v30 = vunpack.i.h.bf16 %v4110_v1  ;;  %v4111_v24 = vunpack.i.l.bf16 %v4110_v1 }
 0x989   :  { %v4131_v44 = vunpack.i.l.bf16 %v5496_v9 }
 0x98a   :  { %v3146_v17 = vsel %vm430_vm0, %v4111_v24, %v4112_v30 }
 0x98b   :  { %3235 = vmatpush.msra.mxu0 %v3146_v17 }
 0x98f   :  { %v4120_v45 = vpop.permute.xlu1 %4119 }
 0x990   :  { %v5501_v0 = vpop.permute.xlu2 %4144  ;;  %v4122_v7 = vunpack.i.h.bf16 %v4120_v45  ;;  %v4121_v22 = vunpack.i.l.bf16 %v4120_v45 }
 0x991   :  { %v4146_v27 = vunpack.i.l.bf16 %v5501_v0 }
 0x992   :  { %v3100_v62 = vsel %vm383_vm1, %v4121_v22, %v4122_v7 }
 0x993   :  { %3236 = vmatpush.msra.mxu0 %v3100_v62 }
 0x997   :  { %v4115_v6 = vpop.permute.xlu0 %4114  ;;  %v4125_v48 = vpop.permute.xlu1 %4124 }
 0x998   :  { %v4117_v28 = vunpack.i.h.bf16 %v4115_v6  ;;  %v4116_v23 = vunpack.i.l.bf16 %v4115_v6  ;;  %v5505_v50 = vpop.permute.xlu2 %4159  ;;  %v4127_v18 = vunpack.i.h.bf16 %v4125_v48  ;;  %v4126_v52 = vunpack.i.l.bf16 %v4125_v48 }
 0x999   :  { %v4161_v19 = vunpack.i.l.bf16 %v5505_v50 }
 0x99a   :  { %v3147_v39 = vsel %vm430_vm0, %v4112_v30, %v4116_v23  ;;  %v3148_v41 = vsel %vm430_vm0, %v4116_v23, %v4117_v28  ;;  %v3149_v2 = vsel %vm430_vm0, %v4117_v28, %v4131_v44  ;;  %v3101_v32 = vsel %vm383_vm1, %v4122_v7, %v4126_v52 }
 0x99b   :  { %3255 = vmatpush.msra.mxu1 %v3147_v39  ;;  %3275 = vmatpush.msra.mxu2 %v3148_v41  ;;  %v3102_v46 = vsel %vm383_vm1, %v4126_v52, %v4127_v18  ;;  %v3103_v16 = vsel %vm383_vm1, %v4127_v18, %v4146_v27 }
 0x99c   :  { %3295 = vmatpush.msra.mxu3 %v3149_v2 }
 0x99d   :  { %3256 = vmatpush.msra.mxu1 %v3101_v32  ;;  %3276 = vmatpush.msra.mxu2 %v3102_v46 }
 0x99e   :  { %3296 = vmatpush.msra.mxu3 %v3103_v16 }
 0x99f   :  { %v4135_v37 = vpop.permute.xlu0 %4134  ;;  %v4140_v35 = vpop.permute.xlu1 %4139 }
 0x9a0   :  { %v4137_v26 = vunpack.i.h.bf16 %v4135_v37  ;;  %v4136_v33 = vunpack.i.l.bf16 %v4135_v37  ;;  %v5519_v13 = vpop.permute.xlu2 %4174  ;;  %v4142_v56 = vunpack.i.h.bf16 %v4140_v35  ;;  %v4141_v31 = vunpack.i.l.bf16 %v4140_v35 }
 0x9a1   :  { %v4176_v38 = vunpack.i.l.bf16 %v5519_v13 }
 0x9a2   :  { %v3054_v11 = vsel %vm336_vm2, %v4136_v33, %v4137_v26  ;;  %v3055_v29 = vsel %vm336_vm2, %v4137_v26, %v4141_v31  ;;  %v3056_v4 = vsel %vm336_vm2, %v4141_v31, %v4142_v56  ;;  %v3057_v8 = vsel %vm336_vm2, %v4142_v56, %v4161_v19 }
 0x9a3   :  { %3237 = vmatpush.msra.mxu0 %v3054_v11  ;;  %3257 = vmatpush.msra.mxu1 %v3055_v29 }
 0x9a4   :  { %3277 = vmatpush.msra.mxu2 %v3056_v4  ;;  %3297 = vmatpush.msra.mxu3 %v3057_v8 }
 0x9a7   :  { %v4150_v43 = vpop.permute.xlu0 %4149  ;;  %v4155_v53 = vpop.permute.xlu1 %4154 }
 0x9a8   :  { %v4152_v54 = vunpack.i.h.bf16 %v4150_v43  ;;  %v4151_v60 = vunpack.i.l.bf16 %v4150_v43  ;;  %v4157_v55 = vunpack.i.h.bf16 %v4155_v53  ;;  %v4156_v10 = vunpack.i.l.bf16 %v4155_v53  ;;  %v4185_v51 = vpop.permute.xlu2 %4184 }
 0x9a9   :  { %v4187_v24 = vunpack.i.h.bf16 %v4185_v51  ;;  %v4186_v17 = vunpack.i.l.bf16 %v4185_v51 }
 0x9aa   :  { %v3008_v5 = vsel %vm289_vm3, %v4151_v60, %v4152_v54  ;;  %v3009_v15 = vsel %vm289_vm3, %v4152_v54, %v4156_v10  ;;  %v3010_v58 = vsel %vm289_vm3, %v4156_v10, %v4157_v55  ;;  %v3011_v34 = vsel %vm289_vm3, %v4157_v55, %v4176_v38 }
 0x9ab   :  { %3238 = vmatpush.msra.mxu0 %v3008_v5  ;;  %3258 = vmatpush.msra.mxu1 %v3009_v15  ;;  %v2918_v6 = vsel %vm195_vm5, %v4186_v17, %v4187_v24 }
 0x9ac   :  { %3278 = vmatpush.msra.mxu2 %v3010_v58  ;;  %3298 = vmatpush.msra.mxu3 %v3011_v34  ;;  %v4132_v34 = vunpack.i.h.bf16 %v5496_v9 }
 0x9af   :  { %v4165_v25 = vpop.permute.xlu0 %4164  ;;  %v4170_v36 = vpop.permute.xlu1 %4169 }
 0x9b0   :  { %v4167_v61 = vunpack.i.h.bf16 %v4165_v25  ;;  %v4166_v63 = vunpack.i.l.bf16 %v4165_v25  ;;  %v4172_v1 = vunpack.i.h.bf16 %v4170_v36  ;;  %v4171_v30 = vunpack.i.l.bf16 %v4170_v36  ;;  %v4195_v62 = vpop.permute.xlu2 %4194  ;;  %v3164_v25 = vld [vmem:[%s5664_s8] sm:$0xff]  ;;  %s4322_s8 = smov [#allocation7]  }
 0x9b1   :  { %v4197_v48 = vunpack.i.h.bf16 %v4195_v62  ;;  %v4196_v18 = vunpack.i.l.bf16 %v4195_v62  ;;  %v4147_v36 = vunpack.i.h.bf16 %v5501_v0  ;;  %s3564_s0 = sshll.u32 %s4322_s8, 4  ;;  %s3565_s0 = int_to_ptr.vmem [resolvable:$true] %s3564_s0 }
 0x9b2   :  { %v2962_v45 = vsel %vm242_vm4, %v4166_v63, %v4167_v61  ;;  %v2963_v7 = vsel %vm242_vm4, %v4167_v61, %v4171_v30  ;;  %v2964_v22 = vsel %vm242_vm4, %v4171_v30, %v4172_v1  ;;  %v4162_v61 = vunpack.i.h.bf16 %v5505_v50 }
 0x9b3   :  { %3239 = vmatpush.msra.mxu0 %v2962_v45  ;;  %3259 = vmatpush.msra.mxu1 %v2963_v7  ;;  %v2870_v16 = vsel %vm148_vm6, %v4196_v18, %v4197_v48  ;;  %v3150_v63 = vsel %vm430_vm0, %v4131_v44, %v4132_v34  ;;  %v3104_v30 = vsel %vm383_vm1, %v4146_v27, %v4147_v36 }
 0x9b4   :  { %3279 = vmatpush.msra.mxu2 %v2964_v22  ;;  %v3059_v44 = vsel %vm336_vm2, %v4162_v61, %v5488_v21 }
 0x9b6   :  { %3280 = vmatpush.msra.mxu2 %v2918_v6 }
 0x9b7   :  { %v5538_v28 = vpop.permute.xlu0 %4189  ;;  %v4180_v23 = vpop.permute.xlu1 %4179 }
 0x9b8   :  { %v4191_v52 = vunpack.i.l.bf16 %v5538_v28  ;;  %v4182_v39 = vunpack.i.h.bf16 %v4180_v23  ;;  %v4181_v41 = vunpack.i.l.bf16 %v4180_v23  ;;  %v5549_v26 = vpop.permute.xlu2 %4219  ;;  %v4192_v9 = vunpack.i.h.bf16 %v5538_v28 }
 0x9b9   :  { %v4221_v8 = vunpack.i.l.bf16 %v5549_v26  ;;  %v4222_v21 = vunpack.i.h.bf16 %v5549_v26 }
 0x9ba   :  { %v2916_v2 = vsel %vm195_vm5, %v4181_v41, %v4182_v39  ;;  %v2917_v32 = vsel %vm195_vm5, %v4182_v39, %v4186_v17  ;;  %v2965_v46 = vsel %vm242_vm4, %v4172_v1, %v4191_v52  ;;  %v3151_v1 = vsel %vm430_vm0, %v4132_v34, %v5494_v14 }
 0x9bb   :  { %3240 = vmatpush.msra.mxu0 %v2916_v2  ;;  %3260 = vmatpush.msra.mxu1 %v2917_v32  ;;  %v3058_v14 = vsel %vm336_vm2, %v4161_v19, %v4162_v61  ;;  %v2967_v17 = vsel %vm242_vm4, %v4192_v9, %v5492_v57  ;;  %v2874_v62 = vsel %vm148_vm6, %v4221_v8, %v4222_v21 }
 0x9bc   :  { %3299 = vmatpush.msra.mxu3 %v2965_v46 }
 0x9bd   :  { %3241 = vmatpush.msra.mxu0 %v2870_v16 }
 0x9bf   :  { %v4200_v37 = vpop.permute.xlu0 %4199  ;;  %v5547_v35 = vpop.permute.xlu1 %4204 }
 0x9c0   :  { %v4202_v33 = vunpack.i.h.bf16 %v4200_v37  ;;  %v4201_v56 = vunpack.i.l.bf16 %v4200_v37  ;;  %v4206_v31 = vunpack.i.l.bf16 %v5547_v35  ;;  %v4225_v0 = vpop.permute.xlu2 %4224  ;;  %v4207_v27 = vunpack.i.h.bf16 %v5547_v35 }
 0x9c1   :  { %v4227_v7 = vunpack.i.h.bf16 %v4225_v0 }
 0x9c2   :  { %v2871_v11 = vsel %vm148_vm6, %v4197_v48, %v4201_v56  ;;  %v2872_v29 = vsel %vm148_vm6, %v4201_v56, %v4202_v33  ;;  %v2919_v4 = vsel %vm195_vm5, %v4187_v24, %v4206_v31  ;;  %v2873_v43 = vsel %vm148_vm6, %v4202_v33, %v4221_v8 }
 0x9c3   :  { %3261 = vmatpush.msra.mxu1 %v2871_v11  ;;  %3281 = vmatpush.msra.mxu2 %v2872_v29  ;;  %v3105_v24 = vsel %vm383_vm1, %v4147_v36, %v5490_v47 }
 0x9c4   :  { %3300 = vmatpush.msra.mxu3 %v2919_v4 }
 0x9c6   :  { %3301 = vmatpush.msra.mxu3 %v2873_v43 }
 0x9c7   :  { %v4210_v53 = vpop.permute.xlu0 %4209  ;;  %v4215_v54 = vpop.permute.xlu1 %4214 }
 0x9c8   :  { %v4212_v60 = vunpack.i.h.bf16 %v4210_v53  ;;  %v4211_v55 = vunpack.i.l.bf16 %v4210_v53  ;;  %v4217_v10 = vunpack.i.h.bf16 %v4215_v54  ;;  %v4216_v51 = vunpack.i.l.bf16 %v4215_v54 }
 0x9ca   :  { %v2824_v5 = vsel %vm101_vm7, %v4211_v55, %v4212_v60  ;;  %v2825_v15 = vsel %vm101_vm7, %v4212_v60, %v4216_v51  ;;  %v2826_v58 = vsel %vm101_vm7, %v4216_v51, %v4217_v10 }
 0x9cb   :  { %3242 = vmatpush.msra.mxu0 %v2824_v5  ;;  %3262 = vmatpush.msra.mxu1 %v2825_v15 }
 0x9cc   :  { %3282 = vmatpush.msra.mxu2 %v2826_v58 }
 0x9cd   :  { %3243 = vmatpush.msra.mxu0 %v5432_v49  ;;  %3263 = vmatpush.msra.mxu1 %v5430_v42 }
 0x9ce   :  { %3283 = vmatpush.msra.mxu2 %v5439_v59  ;;  %3600 = vmatmul.msk.f32.vlgmr.msra.gmra.mxu0 %vm510_vm8, %v3164_v25  ;;  %v4177_v59 = vunpack.i.h.bf16 %v5519_v13  ;;  %v4226_v13 = vunpack.i.l.bf16 %v4225_v0 }
 0x9cf   :  { %3601 = vmatmul.msk.f32.vlgmr.msra.gmra.mxu1 %vm510_vm8, %v3164_v25  ;;  %3602 = vmatmul.msk.f32.vlgmr.msra.gmra.mxu2 %vm510_vm8, %v3164_v25  ;;  %v2819_v49 = vpop.permute.xlu1 %2818  ;;  %v2915_v19 = vpop.permute.xlu0 %2914 }
 0x9d0   :  { %3315 = vmatpush.msrb.mxu0 %v3150_v63  ;;  %3335 = vmatpush.msrb.mxu1 %v3151_v1  ;;  %v2827_v42 = vsel %vm101_vm7, %v4217_v10, %v2819_v49  ;;  %v3012_v47 = vsel %vm289_vm3, %v4176_v38, %v4177_v59  ;;  %v3013_v50 = vsel %vm289_vm3, %v4177_v59, %v5499_v12 }
 0x9d1   :  { %3302 = vmatpush.msra.mxu3 %v2827_v42  ;;  %v2920_v12 = vsel %vm195_vm5, %v4206_v31, %v4207_v27  ;;  %v2921_v38 = vsel %vm195_vm5, %v4207_v27, %v2915_v19  ;;  %v2828_v57 = vsel %vm101_vm7, %v2819_v49, %v4226_v13  ;;  %v2829_v6 = vsel %vm101_vm7, %v4226_v13, %v4227_v7 }
 0x9d2   :  { %3316 = vmatpush.msrb.mxu0 %v3104_v30  ;;  %3336 = vmatpush.msrb.mxu1 %v3105_v24 }
 0x9d3   :  { %3303 = vmatpush.msra.mxu3 %v5444_v20  ;;  %v2966_v20 = vsel %vm242_vm4, %v4191_v52, %v4192_v9 }
 0x9d4   :  { %3317 = vmatpush.msrb.mxu0 %v3058_v14  ;;  %3337 = vmatpush.msrb.mxu1 %v3059_v44 }
 0x9d5   :  { %3603 = vmatmul.msk.f32.vlgmr.msra.gmra.mxu3 %vm510_vm8, %v3164_v25 }
 0x9d6   :  { %3318 = vmatpush.msrb.mxu0 %v3012_v47  ;;  %3338 = vmatpush.msrb.mxu1 %v3013_v50 }
 0x9d7   :  { %v2869_v45 = vpop.permute.xlu1 %2868  ;;  %v3223_v48 = vpop.permute.xlu0 %3222 }
 0x9d8   :  { %3319 = vmatpush.msrb.mxu0 %v2966_v20  ;;  %3339 = vmatpush.msrb.mxu1 %v2967_v17  ;;  %v2875_v22 = vsel %vm148_vm6, %v4222_v21, %v2869_v45 }
 0x9da   :  { %3320 = vmatpush.msrb.mxu0 %v2920_v12  ;;  %3340 = vmatpush.msrb.mxu1 %v2921_v38 }
 0x9dc   :  { %3321 = vmatpush.msrb.mxu0 %v2874_v62  ;;  %3341 = vmatpush.msrb.mxu1 %v2875_v22 }
 0x9de   :  { %3322 = vmatpush.msrb.mxu0 %v2828_v57  ;;  %3342 = vmatpush.msrb.mxu1 %v2829_v6 }
 0x9e0   :  { %3323 = vmatpush.msrb.mxu0 %v5453_v3  ;;  %3343 = vmatpush.msrb.mxu1 %v5456_v40 }
 0x9e1   :  { %3604 = vmatmul.msk.f32.vlgmr.msrb.gmra.mxu0 %vm510_vm8, %v3164_v25  ;;  %3605 = vmatmul.msk.f32.vlgmr.msrb.gmra.mxu1 %vm510_vm8, %v3164_v25 }
 0xa4b   :  { %v3245_v28 = vpop.f32.mrf.mxu0 }
 0xa4c   :  { %v3246_v23 = vadd.f32 %v3245_v28, %v3223_v48  ;;  %v3265_v18 = vpop.f32.mrf.mxu1 }
 0xa4d   :  { %v3266_v52 = vadd.f32 %v3265_v18, %v3223_v48 }
 0xa4e   :  { %v3606_v39 = vmul.f32 -1.442695, %v3246_v23 }
 0xa4f   :  { %v3607_v41 = vmul.f32 -1.442695, %v3266_v52 }
 0xa50   :  { %4234 = vpow2.f32 %v3606_v39 }
 0xa51   :  { %4236 = vpow2.f32 %v3607_v41 }
 0xa52   :  { %v3285_v2 = vpop.f32.mrf.mxu2 }
 0xa53   :  { %v3286_v32 = vadd.f32 %v3285_v2, %v3223_v48 }
 0xa55   :  { %v3608_v46 = vmul.f32 -1.442695, %v3286_v32 }
 0xa56   :  { %v4235_v16 = vpop.eup %4234 }
 0xa57   :  { %v4237_v3 = vpop.eup %4236  ;;  %v3366_v37 = vadd.f32 1.0, %v4235_v16  ;;  %4238 = vpow2.f32 %v3608_v46 }
 0xa58   :  { %v3367_v40 = vadd.f32 1.0, %v4237_v3  ;;  %v3305_v35 = vpop.f32.mrf.mxu3 }
 0xa59   :  { %4240 = vrcp.f32 %v3366_v37  ;;  %v3306_v26 = vadd.f32 %v3305_v35, %v3223_v48  ;;  %v3381_v5 = vand.u32 2147483647, %v3366_v37  ;;  %v3383_v25 = vand.u32 2147483648, %v3366_v37 }
 0xa5a   :  { %4242 = vrcp.f32 %v3367_v40  ;;  %v3398_v34 = vand.u32 2147483648, %v3367_v40  ;;  %v3396_v1 = vand.u32 2147483647, %v3367_v40  ;;  %vm3377_vm2 = vweird.f32 %v3366_v37 }
 0xa5b   :  { %v3609_v33 = vmul.f32 -1.442695, %v3306_v26  ;;  %vm3392_vm3 = vweird.f32 %v3367_v40  ;;  %v3384_v30 = vor.u32 1.1754944e-38, %v3383_v25  ;;  %vm3382_vm7 = vcmp.eq.f32.partialorder %v3381_v5, 8.507059e+37 }
 0xa5c   :  { %v3399_v9 = vor.u32 1.1754944e-38, %v3398_v34  ;;  %vm3397_vm8 = vcmp.eq.f32.partialorder %v3396_v1, 8.507059e+37  ;;  %v3464_v1 = vld [vmem:[#allocation4 + $0x10] sm:$0xff] }
 0xa5d   :  { %v4239_v56 = vpop.eup %4238  ;;  %4244 = vpow2.f32 %v3609_v33 }
 0xa5e   :  { %v5622_v31 = vadd.f32 1.0, %v4239_v56  ;;  %v3325_v11 = vpop.f32.mrf.mxu0  ;;  %v3345_v29 = vpop.f32.mrf.mxu1 }
 0xa5f   :  { %v4241_v4 = vpop.eup %4240  ;;  %v3326_v8 = vadd.f32 %v3325_v11, %v3223_v48  ;;  %v3346_v43 = vadd.f32 %v3345_v29, %v3223_v48 }
 0xa60   :  { %v4243_v53 = vpop.eup %4242  ;;  %4246 = vrcp.f32 %v5622_v31  ;;  %v3373_v54 = vmul.f32 %v4241_v4, %v3366_v37  ;;  %vm3378_vm0 = vweird.f32 %v4241_v4  ;;  %v3413_v20 = vand.u32 2147483648, %v5622_v31 }
 0xa61   :  { %v3610_v60 = vmul.f32 -1.442695, %v3326_v8  ;;  %v3611_v55 = vmul.f32 -1.442695, %v3346_v43  ;;  %v3388_v10 = vmul.f32 %v4243_v53, %v3367_v40  ;;  %vm3393_vm1 = vweird.f32 %v4243_v53  ;;  %vm3379_vm5 = vmor %vm3377_vm2, %vm3378_vm0 }
 0xa62   :  { %v3374_v51 = vsub.f32 1.0, %v3373_v54  ;;  %vm3394_vm6 = vmor %vm3392_vm3, %vm3393_vm1  ;;  %v3411_v7 = vand.u32 2147483647, %v5622_v31  ;;  %vm3407_vm9 = vweird.f32 %v5622_v31  ;;  %v3414_v22 = vor.u32 1.1754944e-38, %v3413_v20 }
 0xa63   :  { %v4245_v15 = vpop.eup %4244  ;;  %4248 = vpow2.f32 %v3610_v60  ;;  %v3389_v58 = vsub.f32 1.0, %v3388_v10  ;;  %v3463_v10 = vld [vmem:[#allocation4 + $0x8] sm:$0xff] }
 0xa64   :  { %v3369_v36 = vadd.f32 1.0, %v4245_v15  ;;  %4250 = vpow2.f32 %v3611_v55  ;;  %v3375_v61 = vmul.f32 %v4241_v4, %v3374_v51  ;;  %vm3412_vm13 = vcmp.eq.f32.partialorder %v3411_v7, 8.507059e+37  ;;  %v3462_v55 = vld [vmem:[#allocation4] sm:$0xff] }
 0xa65   :  { %v3390_v63 = vmul.f32 %v4243_v53, %v3389_v58 }
 0xa66   :  { %v4247_v49 = vpop.eup %4246  ;;  %4252 = vrcp.f32 %v3369_v36  ;;  %v3376_v42 = vadd.f32 %v4241_v4, %v3375_v61  ;;  %v3428_v48 = vand.u32 2147483648, %v3369_v36  ;;  %v3426_v23 = vand.u32 2147483647, %v3369_v36 }
 0xa67   :  { %v3391_v59 = vadd.f32 %v4243_v53, %v3390_v63  ;;  %v3403_v24 = vmul.f32 %v4247_v49, %v5622_v31  ;;  %vm3408_vm11 = vweird.f32 %v4247_v49  ;;  %vm3422_vm15 = vweird.f32 %v3369_v36 }
 0xa68   :  { %v3380_v14 = vsel %vm3379_vm5, %v4241_v4, %v3376_v42  ;;  %vm3409_vm12 = vmor %vm3407_vm9, %vm3408_vm11  ;;  %v3429_v2 = vor.u32 1.1754944e-38, %v3428_v48  ;;  %vm3427_vm1 = vcmp.eq.f32.partialorder %v3426_v23, 8.507059e+37 }
 0xa69   :  { %v4249_v44 = vpop.eup %4248  ;;  %v3395_v0 = vsel %vm3394_vm6, %v4243_v53, %v3391_v59  ;;  %v3385_v27 = vsel %vm3382_vm7, %v3384_v30, %v3380_v14  ;;  %v3404_v47 = vsub.f32 1.0, %v3403_v24  ;;  %v3465_v24 = vld [vmem:[#allocation4 + $0x18] sm:$0xff] }
 0xa6a   :  { %v4251_v50 = vpop.eup %4250  ;;  %v3370_v19 = vadd.f32 1.0, %v4249_v44  ;;  %v3400_v21 = vsel %vm3397_vm8, %v3399_v9, %v3395_v0  ;;  %3475 = vrot.lane.b32.xlu1 %v3385_v27, %s4320_s29  ;;  %v3466_v9 = vld [vmem:[#allocation4 + $0x20] sm:$0xff] }
 0xa6b   :  { %v3371_v17 = vadd.f32 1.0, %v4251_v50  ;;  %3477 = vrot.lane.b32.xlu2 %v3400_v21, %s4320_s29  ;;  %v3405_v45 = vmul.f32 %v4247_v49, %v3404_v47 }
 0xa6c   :  { %v4253_v13 = vpop.eup %4252  ;;  %4254 = vrcp.f32 %v3370_v19  ;;  %v3443_v40 = vand.u32 2147483648, %v3370_v19  ;;  %v3441_v33 = vand.u32 2147483647, %v3370_v19  ;;  %vm3437_vm5 = vweird.f32 %v3370_v19 }
 0xa6d   :  { %4256 = vrcp.f32 %v3371_v17  ;;  %v3406_v12 = vadd.f32 %v4247_v49, %v3405_v45  ;;  %v3418_v38 = vmul.f32 %v4253_v13, %v3369_v36  ;;  %vm3423_vm14 = vweird.f32 %v4253_v13 }
 0xa6e   :  { %vm3424_vm0 = vmor %vm3422_vm15, %vm3423_vm14  ;;  %v3458_v35 = vand.u32 2147483648, %v3371_v17  ;;  %v3456_v31 = vand.u32 2147483647, %v3371_v17  ;;  %vm3452_vm6 = vweird.f32 %v3371_v17  ;;  %v3444_v4 = vor.u32 1.1754944e-38, %v3443_v40 }
 0xa6f   :  { %v3410_v62 = vsel %vm3409_vm12, %v4247_v49, %v3406_v12  ;;  %v3419_v57 = vsub.f32 1.0, %v3418_v38  ;;  %vm3442_vm11 = vcmp.eq.f32.partialorder %v3441_v33, 8.507059e+37 }
 0xa70   :  { %v3415_v6 = vsel %vm3412_vm13, %v3414_v22, %v3410_v62  ;;  %v3459_v8 = vor.u32 1.1754944e-38, %v3458_v35  ;;  %vm3457_vm9 = vcmp.eq.f32.partialorder %v3456_v31, 8.507059e+37 }
 0xa71   :  { %3479 = vrot.lane.b32.xlu0 %v3415_v6, %s4320_s29  ;;  %v3420_v28 = vmul.f32 %v4253_v13, %v3419_v57 }
 0xa72   :  { %v4255_v18 = vpop.eup %4254 }
 0xa73   :  { %v4257_v52 = vpop.eup %4256  ;;  %v3421_v39 = vadd.f32 %v4253_v13, %v3420_v28  ;;  %v3433_v41 = vmul.f32 %v4255_v18, %v3370_v19  ;;  %vm3438_vm2 = vweird.f32 %v4255_v18 }
 0xa74   :  { %v3448_v32 = vmul.f32 %v4257_v52, %v3371_v17  ;;  %vm3453_vm3 = vweird.f32 %v4257_v52  ;;  %vm3439_vm7 = vmor %vm3437_vm5, %vm3438_vm2  ;;  %v3468_v17 = vld [vmem:[#allocation4 + $0x30] sm:$0xff] }
 0xa75   :  { %v3425_v46 = vsel %vm3424_vm0, %v4253_v13, %v3421_v39  ;;  %v3434_v16 = vsub.f32 1.0, %v3433_v41  ;;  %vm3454_vm8 = vmor %vm3452_vm6, %vm3453_vm3  ;;  %v3467_v13 = vld [vmem:[#allocation4 + $0x28] sm:$0xff] }
 0xa76   :  { %v3430_v3 = vsel %vm3427_vm1, %v3429_v2, %v3425_v46  ;;  %v3449_v37 = vsub.f32 1.0, %v3448_v32 }
 0xa77   :  { %3481 = vrot.lane.b32.xlu1 %v3430_v3, %s4320_s29  ;;  %v3435_v26 = vmul.f32 %v4255_v18, %v3434_v16 }
 0xa78   :  { %v3450_v56 = vmul.f32 %v4257_v52, %v3449_v37 }
 0xa79   :  { %v3436_v11 = vadd.f32 %v4255_v18, %v3435_v26 }
 0xa7a   :  { %v3451_v29 = vadd.f32 %v4257_v52, %v3450_v56 }
 0xa7b   :  { %v3440_v43 = vsel %vm3439_vm7, %v4255_v18, %v3436_v11 }
 0xa7c   :  { %v3455_v53 = vsel %vm3454_vm8, %v4257_v52, %v3451_v29  ;;  %v3445_v54 = vsel %vm3442_vm11, %v3444_v4, %v3440_v43 }
 0xa7d   :  { %v3460_v60 = vsel %vm3457_vm9, %v3459_v8, %v3455_v53  ;;  %3483 = vrot.lane.b32.xlu2 %v3445_v54, %s4320_s29 }
 0xa7e   :  { %3485 = vrot.lane.b32.xlu0 %v3460_v60, %s4320_s29 }
 0xac5   :  { %v3478_v51 = vpop.permute.xlu2 %3477 }
 0xad7   :  { %v3484_v14 = vpop.permute.xlu2 %3483 }
 0xadc   :  { %v3476_v5 = vpop.permute.xlu1 %3475 }
 0xadd   :  { %v3487_v15 = vsel %vm677_vm10, %v3476_v5, %v3478_v51  ;;  %v3499_v58 = vadd.f32 %v3476_v5, %v3462_v55 }
 0xade   :  { %v3500_v34 = vadd.f32 %v3487_v15, %v3463_v10 }
 0xadf   :  { %v3506_v25 = vmax.f32 %v3499_v58, 0.0001 }
 0xae0   :  { %v3507_v36 = vmax.f32 %v3500_v34, 0.0001 }
 0xae1   :  { %v3513_v61 = vmin.f32 %v3506_v25, 1.0 }
 0xae2   :  { %v3514_v63 = vmin.f32 %v3507_v36, 1.0 }
 0xae3   :  { %v3480_v49 = vpop.permute.xlu0 %3479  ;;  %3527 = vrot.lane.b32.xlu1 %v3513_v61, %s4315_s21 }
 0xae4   :  { %v3488_v42 = vsel %vm677_vm10, %v3478_v51, %v3480_v49  ;;  %3529 = vrot.lane.b32.xlu2 %v3514_v63, %s4315_s21 }
 0xae5   :  { %v3501_v59 = vadd.f32 %v3488_v42, %v3464_v1 }
 0xae7   :  { %v3508_v30 = vmax.f32 %v3501_v59, 0.0001 }
 0xae9   :  { %v3515_v44 = vmin.f32 %v3508_v30, 1.0  ;;  %v3482_v0 = vpop.permute.xlu1 %3481 }
 0xaea   :  { %v3489_v27 = vsel %vm677_vm10, %v3480_v49, %v3482_v0  ;;  %v3490_v47 = vsel %vm677_vm10, %v3482_v0, %v3484_v14 }
 0xaeb   :  { %v3502_v50 = vadd.f32 %v3489_v27, %v3465_v24  ;;  %v3503_v19 = vadd.f32 %v3490_v47, %v3466_v9  ;;  %3531 = vrot.lane.b32.xlu0 %v3515_v44, %s4315_s21 }
 0xaed   :  { %v3509_v21 = vmax.f32 %v3502_v50, 0.0001  ;;  %v3510_v20 = vmax.f32 %v3503_v19, 0.0001 }
 0xaef   :  { %v3516_v45 = vmin.f32 %v3509_v21, 1.0  ;;  %v3517_v7 = vmin.f32 %v3510_v20, 1.0 }
 0xaf0   :  { %v3486_v12 = vpop.permute.xlu0 %3485 }
 0xaf1   :  { %v3491_v38 = vsel %vm677_vm10, %v3484_v14, %v3486_v12  ;;  %v3505_v22 = vadd.f32 %v3486_v12, %v3468_v17  ;;  %3535 = vrot.lane.b32.xlu2 %v3517_v7, %s4315_s21  ;;  %3533 = vrot.lane.b32.xlu1 %v3516_v45, %s4315_s21 }
 0xaf2   :  { %v3504_v62 = vadd.f32 %v3491_v38, %v3467_v13 }
 0xaf3   :  { %v3512_v57 = vmax.f32 %v3505_v22, 0.0001 }
 0xaf4   :  { %v3511_v6 = vmax.f32 %v3504_v62, 0.0001 }
 0xaf5   :  { %v3519_v28 = vmin.f32 %v3512_v57, 1.0 }
 0xaf6   :  { %v3518_v48 = vmin.f32 %v3511_v6, 1.0 }
 0xaf8   :  { %3537 = vrot.lane.b32.xlu0 %v3518_v48, %s4315_s21 }
 0xaf9   :  { %3539 = vrot.lane.b32.xlu1 %v3519_v28, %s4315_s21 }
 0xb3e   :  { %v3530_v23 = vpop.permute.xlu2 %3529 }
 0xb4b   :  { %v3536_v2 = vpop.permute.xlu2 %3535 }
 0xb55   :  { %v3528_v18 = vpop.permute.xlu1 %3527 }
 0xb56   :  { %v3541_v52 = vsel %vm242_vm4, %v3528_v18, %v3530_v23 }
 0xb57   :  { %3553 = vst [vmem:[#allocation7] sm:$0xff] %v3541_v52 }
 0xb5d   :  { %v3532_v39 = vpop.permute.xlu0 %3531 }
 0xb5e   :  { %v3542_v41 = vsel %vm242_vm4, %v3530_v23, %v3532_v39 }
 0xb5f   :  { %3554 = vst [vmem:[#allocation7 + $0x8] sm:$0xff] %v3542_v41 }
 0xb63   :  { %v3534_v32 = vpop.permute.xlu1 %3533 }
 0xb64   :  { %v3543_v46 = vsel %vm242_vm4, %v3532_v39, %v3534_v32  ;;  %v3544_v16 = vsel %vm242_vm4, %v3534_v32, %v3536_v2 }
 0xb65   :  { %3555 = vst [vmem:[#allocation7 + $0x10] sm:$0xff] %v3543_v46 }
 0xb66   :  { %3556 = vst [vmem:[#allocation7 + $0x18] sm:$0xff] %v3544_v16 }
 0xb6a   :  { %v3538_v3 = vpop.permute.xlu0 %3537 }
 0xb6b   :  { %v3545_v37 = vsel %vm242_vm4, %v3536_v2, %v3538_v3  ;;  %v3540_v40 = vpop.permute.xlu1 %3539 }
 0xb6c   :  { %3557 = vst [vmem:[#allocation7 + $0x20] sm:$0xff] %v3545_v37  ;;  %v3546_v35 = vsel %vm242_vm4, %v3538_v3, %v3540_v40 }
 0xb6d   :  { %3558 = vst [vmem:[#allocation7 + $0x28] sm:$0xff] %v3546_v35 }
 0xb6e   :  { %3569 = dma.vmem_to_hbm [thread:$0]  %s3565_s0, 768, %s3567_s22, [#allocation6]  }
 0xb6f   :  { %4308 = dma.done.wait [#allocation6], 768  }
 0xb70   :  { %4309 = vsyncadd [#allocation6], 4294966528 }
 0xb71   :  { %3574 = vsyncpa [#allocation5], 1 }
 0xb72   :  { %3575 = vsyncpa [#allocation6], 1 }

</bundles_post_ra>
